<compile_context>
chip_gen: v6e
topology: v6e:2x2x1
jax: 0.10.0
libtpu: 0.0.40
codegen_flags: <defaults>
</compile_context>

<pallas_src>
import functools

import jax
import jax.numpy as jnp
from jax.experimental import pallas as pl
from jax.experimental.pallas import tpu as pltpu


def get_same_padding(kernel_size):
    assert isinstance(kernel_size, int), "kernel size should be int"
    assert kernel_size % 2 > 0, "kernel size should be odd number"
    return kernel_size // 2


def sub_filter_start_end(kernel_size, sub_kernel_size):
    center = kernel_size // 2
    dev = sub_kernel_size // 2
    start, end = center - dev, center + dev + 1
    assert end - start == sub_kernel_size
    return start, end


def _dw_conv3d_kernel(x_ref, w_ref, o_ref, xpad_ref, *, ks, pad, dilation):
    """One (batch, channel) volume of a depthwise 3-D conv with 'same' padding.

    x_ref   : (1, 1, D,  H,  W )  VMEM   input volume
    w_ref   : (C, ks*ks*ks)       SMEM   flattened per-channel taps (f32)
    o_ref   : (1, 1, Do, Ho, Wo)  VMEM   output volume
    xpad_ref: (D+2p, H+2p, W+2p)  VMEM   f32 scratch holding the zero halo
    """
    c = pl.program_id(1)
    d_in, h_in, w_in = x_ref.shape[2], x_ref.shape[3], x_ref.shape[4]
    d_out, h_out, w_out = o_ref.shape[2], o_ref.shape[3], o_ref.shape[4]

    # Build the zero-padded volume in VMEM.  Doing this here (instead of a
    # wrapper-side jnp.pad) removes a full HBM read+write of the activation.
    xpad_ref[...] = jnp.zeros_like(xpad_ref)
    xpad_ref[pad:pad + d_in, pad:pad + h_in, pad:pad + w_in] = (
        x_ref[0, 0].astype(jnp.float32))

    acc = jnp.zeros((d_out, h_out, w_out), jnp.float32)
    # ks / dilation are Python ints -> fully static (unrolled) tap loop.
    for kd in range(ks):
        od = kd * dilation
        for kh in range(ks):
            oh = kh * dilation
            for kw in range(ks):
                ow = kw * dilation
                tap = w_ref[c, (kd * ks + kh) * ks + kw]      # scalar (SMEM)
                win = xpad_ref[od:od + d_out, oh:oh + h_out, ow:ow + w_out]
                acc = acc + win * tap
    o_ref[0, 0] = acc.astype(o_ref.dtype)


def dynamic_separable_conv3d(x, weight, kernel_size, *, stride=1, dilation=1,
                             channels_per_group=1):
    """Forward of DynamicSeparableConv2d.

    x      : (N, C, D, H, W)                      activation (NCDHW, like PyTorch)
    weight : (>=C, channels_per_group, K, K, K)   full (max-kernel) filter bank
    kernel_size : active odd kernel size (<= K)
    """
    assert stride == 1, "TODO(synk): stride > 1 not implemented in the Pallas kernel"
    assert channels_per_group == 1, (
        "TODO(synk): grouped conv (channels_per_group > 1) not implemented")
    n, c, d, h, w = x.shape
    assert c % channels_per_group == 0
    k_max = weight.shape[-1]
    ks = int(kernel_size)
    pad = get_same_padding(ks)
    start, end = sub_filter_start_end(k_max, ks)

    # Centered active sub-filter (mirrors get_active_filter + .contiguous()).
    w_active = weight[:c, :, start:end, start:end, start:end]   # (C,1,ks,ks,ks)
    w_flat = w_active.reshape(c, ks * ks * ks).astype(jnp.float32)

    d_out = d + 2 * pad - dilation * (ks - 1)
    h_out = h + 2 * pad - dilation * (ks - 1)
    w_out = w + 2 * pad - dilation * (ks - 1)

    kernel = functools.partial(_dw_conv3d_kernel, ks=ks, pad=pad,
                               dilation=dilation)

    return pl.pallas_call(
        kernel,
        out_shape=jax.ShapeDtypeStruct((n, c, d_out, h_out, w_out), x.dtype),
        grid_spec=pltpu.PrefetchScalarGridSpec(
            num_scalar_prefetch=0,
            grid=(n, c),
            in_specs=[
                pl.BlockSpec((1, 1, d, h, w), lambda ni, ci: (ni, ci, 0, 0, 0)),
                # Whole (tiny) active filter bank resident in SMEM; taps are
                # read as scalars inside the kernel.
                pl.BlockSpec(memory_space=pltpu.MemorySpace.SMEM),
            ],
            out_specs=pl.BlockSpec((1, 1, d_out, h_out, w_out),
                                   lambda ni, ci: (ni, ci, 0, 0, 0)),
            scratch_shapes=[
                pltpu.VMEM((d + 2 * pad, h + 2 * pad, w + 2 * pad), jnp.float32),
            ],
        ),
        compiler_params=pltpu.CompilerParams(
            # Independent (N, C) grid axes -> v7x shards across its two
            # TensorCores; harmless on single-core v5e/v6e.
            dimension_semantics=("parallel", "parallel"),
        ),
    )(x, w_flat)


class DynamicSeparableConv2d:
    """JAX/Pallas port of the PyTorch module (holds the max-size weight bank)."""

    def __init__(self, max_in_channels, kernel_size_list, stride=1, dilation=1,
                 channels_per_group=1, *, key):
        assert max_in_channels % channels_per_group == 0
        self.max_in_channels = max_in_channels
        self.channels_per_group = channels_per_group
        self.kernel_size_list = kernel_size_list
        self.stride = stride
        self.dilation = dilation
        k = max(kernel_size_list)
        fan_in = channels_per_group * k ** 3
        bound = 1.0 / (fan_in ** 0.5)
        self.weight = jax.random.uniform(
            key, (max_in_channels, channels_per_group, k, k, k),
            dtype=jnp.float32, minval=-bound, maxval=bound)
        self._ks_set = sorted(set(kernel_size_list))
        self.active_kernel_size = max(kernel_size_list)

    def __call__(self, x, kernel_size=None):
        if kernel_size is None:
            kernel_size = self.active_kernel_size
        in_channel = x.shape[1]
        assert in_channel % self.channels_per_group == 0
        return dynamic_separable_conv3d(
            x, self.weight, kernel_size,
            stride=self.stride, dilation=self.dilation,
            channels_per_group=self.channels_per_group)


if __name__ == "__main__":
    key = jax.random.PRNGKey(0)
    k_x, k_w = jax.random.split(key)

    # Small 5-D NCDHW input (the module wraps an nn.Conv3d, so x is 5-D).
    N, C, D, H, W = 2, 4, 8, 12, 16
    x = jax.random.normal(k_x, (N, C, D, H, W), dtype=jnp.float32)

    module = DynamicSeparableConv2d(
        max_in_channels=C, kernel_size_list=[3, 5, 7], key=k_w)

    for ks in (3, 5):   # exercise the dynamic (sub-)kernel selection from K=7
        y = jax.block_until_ready(module(x, kernel_size=ks))
        assert y.shape == x.shape and y.dtype == x.dtype

        # Pure-JAX reference: depthwise conv3d with the same centered sub-filter.
        start, end = sub_filter_start_end(max(module.kernel_size_list), ks)
        w_sub = module.weight[:C, :, start:end, start:end, start:end]
        pad = get_same_padding(ks)
        y_ref = jax.lax.conv_general_dilated(
            x, w_sub, window_strides=(1, 1, 1),
            padding=[(pad, pad)] * 3,
            dimension_numbers=("NCDHW", "OIDHW", "NCDHW"),
            feature_group_count=C,
            precision=jax.lax.Precision.HIGHEST)
        assert jnp.max(jnp.abs(y - y_ref)) < 1e-4, f"mismatch at ks={ks}"

    print("KERNEL_OK")
</pallas_src>

<mosaic_0001>
module attributes {stable_mosaic.version = 11 : i64} {
  func.func @_dw_conv3d_kernel(%arg0: i32, %arg1: i32, %arg2: memref<1x1x8x12x16xf32, #tpu.memory_space<vmem>>, %arg3: memref<4x27xf32, #tpu.memory_space<smem>>, %arg4: memref<1x1x8x12x16xf32, #tpu.memory_space<vmem>>, %arg5: memref<10x14x18xf32, #tpu.memory_space<vmem>>) attributes {dimension_semantics = [#tpu.dimension_semantics<parallel>, #tpu.dimension_semantics<parallel>], iteration_bounds = array<i64: 2, 4>, scalar_prefetch = 0 : i64, scratch_operands = 1 : i64, tpu.core_type = #tpu.core_type<tc>, window_params = [{transform_indices = @transform_0, window_bounds = array<i64: 1, 1, 8, 12, 16>}, {transform_indices = @transform_1, window_bounds = array<i64: 4, 27>}, {transform_indices = @transform_2, window_bounds = array<i64: 1, 1, 8, 12, 16>}]} {
    %cst = arith.constant 0.000000e+00 : f32
    %0 = vector.broadcast %cst : f32 to vector<10x14x18xf32>
    %c0 = arith.constant 0 : index
    %c0_0 = arith.constant 0 : index
    %c0_1 = arith.constant 0 : index
    %1 = vector.load %arg5[%c0, %c0_0, %c0_1] : memref<10x14x18xf32, #tpu.memory_space<vmem>>, vector<10x14x18xf32>
    tpu.vector_store %arg5[%c0, %c0_0, %c0_1], %0 {strides = array<i32>} : memref<10x14x18xf32, #tpu.memory_space<vmem>>, vector<10x14x18xf32>,
    %c0_2 = arith.constant 0 : index
    %c0_3 = arith.constant 0 : index
    %c0_4 = arith.constant 0 : index
    %c0_5 = arith.constant 0 : index
    %c0_6 = arith.constant 0 : index
    %2 = vector.load %arg2[%c0_2, %c0_3, %c0_4, %c0_5, %c0_6] : memref<1x1x8x12x16xf32, #tpu.memory_space<vmem>>, vector<1x1x8x12x16xf32>
    %3 = vector.shape_cast %2 : vector<1x1x8x12x16xf32> to vector<8x12x16xf32>
    %c1 = arith.constant 1 : index
    %c1_7 = arith.constant 1 : index
    %c1_8 = arith.constant 1 : index
    %4 = vector.load %arg5[%c1, %c1_7, %c1_8] : memref<10x14x18xf32, #tpu.memory_space<vmem>>, vector<8x12x16xf32>
    tpu.vector_store %arg5[%c1, %c1_7, %c1_8], %3 {strides = array<i32>} : memref<10x14x18xf32, #tpu.memory_space<vmem>>, vector<8x12x16xf32>,
    %cst_9 = arith.constant 0.000000e+00 : f32
    %5 = vector.broadcast %cst_9 : f32 to vector<8x12x16xf32>
    %6 = arith.index_cast %arg1 : i32 to index
    %c0_10 = arith.constant 0 : index
    %7 = memref.load %arg3[%6, %c0_10] : memref<4x27xf32, #tpu.memory_space<smem>>
    %c0_11 = arith.constant 0 : index
    %c0_12 = arith.constant 0 : index
    %c0_13 = arith.constant 0 : index
    %8 = vector.load %arg5[%c0_11, %c0_12, %c0_13] : memref<10x14x18xf32, #tpu.memory_space<vmem>>, vector<8x12x16xf32>
    %9 = vector.broadcast %7 : f32 to vector<8x12x16xf32>
    %10 = arith.mulf %8, %9 : vector<8x12x16xf32>
    %11 = arith.addf %5, %10 : vector<8x12x16xf32>
    %12 = arith.index_cast %arg1 : i32 to index
    %c1_14 = arith.constant 1 : index
    %13 = memref.load %arg3[%12, %c1_14] : memref<4x27xf32, #tpu.memory_space<smem>>
    %c0_15 = arith.constant 0 : index
    %c0_16 = arith.constant 0 : index
    %c1_17 = arith.constant 1 : index
    %14 = vector.load %arg5[%c0_15, %c0_16, %c1_17] : memref<10x14x18xf32, #tpu.memory_space<vmem>>, vector<8x12x16xf32>
    %15 = vector.broadcast %13 : f32 to vector<8x12x16xf32>
    %16 = arith.mulf %14, %15 : vector<8x12x16xf32>
    %17 = arith.addf %11, %16 : vector<8x12x16xf32>
    %18 = arith.index_cast %arg1 : i32 to index
    %c2 = arith.constant 2 : index
    %19 = memref.load %arg3[%18, %c2] : memref<4x27xf32, #tpu.memory_space<smem>>
    %c0_18 = arith.constant 0 : index
    %c0_19 = arith.constant 0 : index
    %c2_20 = arith.constant 2 : index
    %20 = vector.load %arg5[%c0_18, %c0_19, %c2_20] : memref<10x14x18xf32, #tpu.memory_space<vmem>>, vector<8x12x16xf32>
    %21 = vector.broadcast %19 : f32 to vector<8x12x16xf32>
    %22 = arith.mulf %20, %21 : vector<8x12x16xf32>
    %23 = arith.addf %17, %22 : vector<8x12x16xf32>
    %24 = arith.index_cast %arg1 : i32 to index
    %c3 = arith.constant 3 : index
    %25 = memref.load %arg3[%24, %c3] : memref<4x27xf32, #tpu.memory_space<smem>>
    %c0_21 = arith.constant 0 : index
    %c1_22 = arith.constant 1 : index
    %c0_23 = arith.constant 0 : index
    %26 = vector.load %arg5[%c0_21, %c1_22, %c0_23] : memref<10x14x18xf32, #tpu.memory_space<vmem>>, vector<8x12x16xf32>
    %27 = vector.broadcast %25 : f32 to vector<8x12x16xf32>
    %28 = arith.mulf %26, %27 : vector<8x12x16xf32>
    %29 = arith.addf %23, %28 : vector<8x12x16xf32>
    %30 = arith.index_cast %arg1 : i32 to index
    %c4 = arith.constant 4 : index
    %31 = memref.load %arg3[%30, %c4] : memref<4x27xf32, #tpu.memory_space<smem>>
    %c0_24 = arith.constant 0 : index
    %c1_25 = arith.constant 1 : index
    %c1_26 = arith.constant 1 : index
    %32 = vector.load %arg5[%c0_24, %c1_25, %c1_26] : memref<10x14x18xf32, #tpu.memory_space<vmem>>, vector<8x12x16xf32>
    %33 = vector.broadcast %31 : f32 to vector<8x12x16xf32>
    %34 = arith.mulf %32, %33 : vector<8x12x16xf32>
    %35 = arith.addf %29, %34 : vector<8x12x16xf32>
    %36 = arith.index_cast %arg1 : i32 to index
    %c5 = arith.constant 5 : index
    %37 = memref.load %arg3[%36, %c5] : memref<4x27xf32, #tpu.memory_space<smem>>
    %c0_27 = arith.constant 0 : index
    %c1_28 = arith.constant 1 : index
    %c2_29 = arith.constant 2 : index
    %38 = vector.load %arg5[%c0_27, %c1_28, %c2_29] : memref<10x14x18xf32, #tpu.memory_space<vmem>>, vector<8x12x16xf32>
    %39 = vector.broadcast %37 : f32 to vector<8x12x16xf32>
    %40 = arith.mulf %38, %39 : vector<8x12x16xf32>
    %41 = arith.addf %35, %40 : vector<8x12x16xf32>
    %42 = arith.index_cast %arg1 : i32 to index
    %c6 = arith.constant 6 : index
    %43 = memref.load %arg3[%42, %c6] : memref<4x27xf32, #tpu.memory_space<smem>>
    %c0_30 = arith.constant 0 : index
    %c2_31 = arith.constant 2 : index
    %c0_32 = arith.constant 0 : index
    %44 = vector.load %arg5[%c0_30, %c2_31, %c0_32] : memref<10x14x18xf32, #tpu.memory_space<vmem>>, vector<8x12x16xf32>
    %45 = vector.broadcast %43 : f32 to vector<8x12x16xf32>
    %46 = arith.mulf %44, %45 : vector<8x12x16xf32>
    %47 = arith.addf %41, %46 : vector<8x12x16xf32>
    %48 = arith.index_cast %arg1 : i32 to index
    %c7 = arith.constant 7 : index
    %49 = memref.load %arg3[%48, %c7] : memref<4x27xf32, #tpu.memory_space<smem>>
    %c0_33 = arith.constant 0 : index
    %c2_34 = arith.constant 2 : index
    %c1_35 = arith.constant 1 : index
    %50 = vector.load %arg5[%c0_33, %c2_34, %c1_35] : memref<10x14x18xf32, #tpu.memory_space<vmem>>, vector<8x12x16xf32>
    %51 = vector.broadcast %49 : f32 to vector<8x12x16xf32>
    %52 = arith.mulf %50, %51 : vector<8x12x16xf32>
    %53 = arith.addf %47, %52 : vector<8x12x16xf32>
    %54 = arith.index_cast %arg1 : i32 to index
    %c8 = arith.constant 8 : index
    %55 = memref.load %arg3[%54, %c8] : memref<4x27xf32, #tpu.memory_space<smem>>
    %c0_36 = arith.constant 0 : index
    %c2_37 = arith.constant 2 : index
    %c2_38 = arith.constant 2 : index
    %56 = vector.load %arg5[%c0_36, %c2_37, %c2_38] : memref<10x14x18xf32, #tpu.memory_space<vmem>>, vector<8x12x16xf32>
    %57 = vector.broadcast %55 : f32 to vector<8x12x16xf32>
    %58 = arith.mulf %56, %57 : vector<8x12x16xf32>
    %59 = arith.addf %53, %58 : vector<8x12x16xf32>
    %60 = arith.index_cast %arg1 : i32 to index
    %c9 = arith.constant 9 : index
    %61 = memref.load %arg3[%60, %c9] : memref<4x27xf32, #tpu.memory_space<smem>>
    %c1_39 = arith.constant 1 : index
    %c0_40 = arith.constant 0 : index
    %c0_41 = arith.constant 0 : index
    %62 = vector.load %arg5[%c1_39, %c0_40, %c0_41] : memref<10x14x18xf32, #tpu.memory_space<vmem>>, vector<8x12x16xf32>
    %63 = vector.broadcast %61 : f32 to vector<8x12x16xf32>
    %64 = arith.mulf %62, %63 : vector<8x12x16xf32>
    %65 = arith.addf %59, %64 : vector<8x12x16xf32>
    %66 = arith.index_cast %arg1 : i32 to index
    %c10 = arith.constant 10 : index
    %67 = memref.load %arg3[%66, %c10] : memref<4x27xf32, #tpu.memory_space<smem>>
    %c1_42 = arith.constant 1 : index
    %c0_43 = arith.constant 0 : index
    %c1_44 = arith.constant 1 : index
    %68 = vector.load %arg5[%c1_42, %c0_43, %c1_44] : memref<10x14x18xf32, #tpu.memory_space<vmem>>, vector<8x12x16xf32>
    %69 = vector.broadcast %67 : f32 to vector<8x12x16xf32>
    %70 = arith.mulf %68, %69 : vector<8x12x16xf32>
    %71 = arith.addf %65, %70 : vector<8x12x16xf32>
    %72 = arith.index_cast %arg1 : i32 to index
    %c11 = arith.constant 11 : index
    %73 = memref.load %arg3[%72, %c11] : memref<4x27xf32, #tpu.memory_space<smem>>
    %c1_45 = arith.constant 1 : index
    %c0_46 = arith.constant 0 : index
    %c2_47 = arith.constant 2 : index
    %74 = vector.load %arg5[%c1_45, %c0_46, %c2_47] : memref<10x14x18xf32, #tpu.memory_space<vmem>>, vector<8x12x16xf32>
    %75 = vector.broadcast %73 : f32 to vector<8x12x16xf32>
    %76 = arith.mulf %74, %75 : vector<8x12x16xf32>
    %77 = arith.addf %71, %76 : vector<8x12x16xf32>
    %78 = arith.index_cast %arg1 : i32 to index
    %c12 = arith.constant 12 : index
    %79 = memref.load %arg3[%78, %c12] : memref<4x27xf32, #tpu.memory_space<smem>>
    %c1_48 = arith.constant 1 : index
    %c1_49 = arith.constant 1 : index
    %c0_50 = arith.constant 0 : index
    %80 = vector.load %arg5[%c1_48, %c1_49, %c0_50] : memref<10x14x18xf32, #tpu.memory_space<vmem>>, vector<8x12x16xf32>
    %81 = vector.broadcast %79 : f32 to vector<8x12x16xf32>
    %82 = arith.mulf %80, %81 : vector<8x12x16xf32>
    %83 = arith.addf %77, %82 : vector<8x12x16xf32>
    %84 = arith.index_cast %arg1 : i32 to index
    %c13 = arith.constant 13 : index
    %85 = memref.load %arg3[%84, %c13] : memref<4x27xf32, #tpu.memory_space<smem>>
    %c1_51 = arith.constant 1 : index
    %c1_52 = arith.constant 1 : index
    %c1_53 = arith.constant 1 : index
    %86 = vector.load %arg5[%c1_51, %c1_52, %c1_53] : memref<10x14x18xf32, #tpu.memory_space<vmem>>, vector<8x12x16xf32>
    %87 = vector.broadcast %85 : f32 to vector<8x12x16xf32>
    %88 = arith.mulf %86, %87 : vector<8x12x16xf32>
    %89 = arith.addf %83, %88 : vector<8x12x16xf32>
    %90 = arith.index_cast %arg1 : i32 to index
    %c14 = arith.constant 14 : index
    %91 = memref.load %arg3[%90, %c14] : memref<4x27xf32, #tpu.memory_space<smem>>
    %c1_54 = arith.constant 1 : index
    %c1_55 = arith.constant 1 : index
    %c2_56 = arith.constant 2 : index
    %92 = vector.load %arg5[%c1_54, %c1_55, %c2_56] : memref<10x14x18xf32, #tpu.memory_space<vmem>>, vector<8x12x16xf32>
    %93 = vector.broadcast %91 : f32 to vector<8x12x16xf32>
    %94 = arith.mulf %92, %93 : vector<8x12x16xf32>
    %95 = arith.addf %89, %94 : vector<8x12x16xf32>
    %96 = arith.index_cast %arg1 : i32 to index
    %c15 = arith.constant 15 : index
    %97 = memref.load %arg3[%96, %c15] : memref<4x27xf32, #tpu.memory_space<smem>>
    %c1_57 = arith.constant 1 : index
    %c2_58 = arith.constant 2 : index
    %c0_59 = arith.constant 0 : index
    %98 = vector.load %arg5[%c1_57, %c2_58, %c0_59] : memref<10x14x18xf32, #tpu.memory_space<vmem>>, vector<8x12x16xf32>
    %99 = vector.broadcast %97 : f32 to vector<8x12x16xf32>
    %100 = arith.mulf %98, %99 : vector<8x12x16xf32>
    %101 = arith.addf %95, %100 : vector<8x12x16xf32>
    %102 = arith.index_cast %arg1 : i32 to index
    %c16 = arith.constant 16 : index
    %103 = memref.load %arg3[%102, %c16] : memref<4x27xf32, #tpu.memory_space<smem>>
    %c1_60 = arith.constant 1 : index
    %c2_61 = arith.constant 2 : index
    %c1_62 = arith.constant 1 : index
    %104 = vector.load %arg5[%c1_60, %c2_61, %c1_62] : memref<10x14x18xf32, #tpu.memory_space<vmem>>, vector<8x12x16xf32>
    %105 = vector.broadcast %103 : f32 to vector<8x12x16xf32>
    %106 = arith.mulf %104, %105 : vector<8x12x16xf32>
    %107 = arith.addf %101, %106 : vector<8x12x16xf32>
    %108 = arith.index_cast %arg1 : i32 to index
    %c17 = arith.constant 17 : index
    %109 = memref.load %arg3[%108, %c17] : memref<4x27xf32, #tpu.memory_space<smem>>
    %c1_63 = arith.constant 1 : index
    %c2_64 = arith.constant 2 : index
    %c2_65 = arith.constant 2 : index
    %110 = vector.load %arg5[%c1_63, %c2_64, %c2_65] : memref<10x14x18xf32, #tpu.memory_space<vmem>>, vector<8x12x16xf32>
    %111 = vector.broadcast %109 : f32 to vector<8x12x16xf32>
    %112 = arith.mulf %110, %111 : vector<8x12x16xf32>
    %113 = arith.addf %107, %112 : vector<8x12x16xf32>
    %114 = arith.index_cast %arg1 : i32 to index
    %c18 = arith.constant 18 : index
    %115 = memref.load %arg3[%114, %c18] : memref<4x27xf32, #tpu.memory_space<smem>>
    %c2_66 = arith.constant 2 : index
    %c0_67 = arith.constant 0 : index
    %c0_68 = arith.constant 0 : index
    %116 = vector.load %arg5[%c2_66, %c0_67, %c0_68] : memref<10x14x18xf32, #tpu.memory_space<vmem>>, vector<8x12x16xf32>
    %117 = vector.broadcast %115 : f32 to vector<8x12x16xf32>
    %118 = arith.mulf %116, %117 : vector<8x12x16xf32>
    %119 = arith.addf %113, %118 : vector<8x12x16xf32>
    %120 = arith.index_cast %arg1 : i32 to index
    %c19 = arith.constant 19 : index
    %121 = memref.load %arg3[%120, %c19] : memref<4x27xf32, #tpu.memory_space<smem>>
    %c2_69 = arith.constant 2 : index
    %c0_70 = arith.constant 0 : index
    %c1_71 = arith.constant 1 : index
    %122 = vector.load %arg5[%c2_69, %c0_70, %c1_71] : memref<10x14x18xf32, #tpu.memory_space<vmem>>, vector<8x12x16xf32>
    %123 = vector.broadcast %121 : f32 to vector<8x12x16xf32>
    %124 = arith.mulf %122, %123 : vector<8x12x16xf32>
    %125 = arith.addf %119, %124 : vector<8x12x16xf32>
    %126 = arith.index_cast %arg1 : i32 to index
    %c20 = arith.constant 20 : index
    %127 = memref.load %arg3[%126, %c20] : memref<4x27xf32, #tpu.memory_space<smem>>
    %c2_72 = arith.constant 2 : index
    %c0_73 = arith.constant 0 : index
    %c2_74 = arith.constant 2 : index
    %128 = vector.load %arg5[%c2_72, %c0_73, %c2_74] : memref<10x14x18xf32, #tpu.memory_space<vmem>>, vector<8x12x16xf32>
    %129 = vector.broadcast %127 : f32 to vector<8x12x16xf32>
    %130 = arith.mulf %128, %129 : vector<8x12x16xf32>
    %131 = arith.addf %125, %130 : vector<8x12x16xf32>
    %132 = arith.index_cast %arg1 : i32 to index
    %c21 = arith.constant 21 : index
    %133 = memref.load %arg3[%132, %c21] : memref<4x27xf32, #tpu.memory_space<smem>>
    %c2_75 = arith.constant 2 : index
    %c1_76 = arith.constant 1 : index
    %c0_77 = arith.constant 0 : index
    %134 = vector.load %arg5[%c2_75, %c1_76, %c0_77] : memref<10x14x18xf32, #tpu.memory_space<vmem>>, vector<8x12x16xf32>
    %135 = vector.broadcast %133 : f32 to vector<8x12x16xf32>
    %136 = arith.mulf %134, %135 : vector<8x12x16xf32>
    %137 = arith.addf %131, %136 : vector<8x12x16xf32>
    %138 = arith.index_cast %arg1 : i32 to index
    %c22 = arith.constant 22 : index
    %139 = memref.load %arg3[%138, %c22] : memref<4x27xf32, #tpu.memory_space<smem>>
    %c2_78 = arith.constant 2 : index
    %c1_79 = arith.constant 1 : index
    %c1_80 = arith.constant 1 : index
    %140 = vector.load %arg5[%c2_78, %c1_79, %c1_80] : memref<10x14x18xf32, #tpu.memory_space<vmem>>, vector<8x12x16xf32>
    %141 = vector.broadcast %139 : f32 to vector<8x12x16xf32>
    %142 = arith.mulf %140, %141 : vector<8x12x16xf32>
    %143 = arith.addf %137, %142 : vector<8x12x16xf32>
    %144 = arith.index_cast %arg1 : i32 to index
    %c23 = arith.constant 23 : index
    %145 = memref.load %arg3[%144, %c23] : memref<4x27xf32, #tpu.memory_space<smem>>
    %c2_81 = arith.constant 2 : index
    %c1_82 = arith.constant 1 : index
    %c2_83 = arith.constant 2 : index
    %146 = vector.load %arg5[%c2_81, %c1_82, %c2_83] : memref<10x14x18xf32, #tpu.memory_space<vmem>>, vector<8x12x16xf32>
    %147 = vector.broadcast %145 : f32 to vector<8x12x16xf32>
    %148 = arith.mulf %146, %147 : vector<8x12x16xf32>
    %149 = arith.addf %143, %148 : vector<8x12x16xf32>
    %150 = arith.index_cast %arg1 : i32 to index
    %c24 = arith.constant 24 : index
    %151 = memref.load %arg3[%150, %c24] : memref<4x27xf32, #tpu.memory_space<smem>>
    %c2_84 = arith.constant 2 : index
    %c2_85 = arith.constant 2 : index
    %c0_86 = arith.constant 0 : index
    %152 = vector.load %arg5[%c2_84, %c2_85, %c0_86] : memref<10x14x18xf32, #tpu.memory_space<vmem>>, vector<8x12x16xf32>
    %153 = vector.broadcast %151 : f32 to vector<8x12x16xf32>
    %154 = arith.mulf %152, %153 : vector<8x12x16xf32>
    %155 = arith.addf %149, %154 : vector<8x12x16xf32>
    %156 = arith.index_cast %arg1 : i32 to index
    %c25 = arith.constant 25 : index
    %157 = memref.load %arg3[%156, %c25] : memref<4x27xf32, #tpu.memory_space<smem>>
    %c2_87 = arith.constant 2 : index
    %c2_88 = arith.constant 2 : index
    %c1_89 = arith.constant 1 : index
    %158 = vector.load %arg5[%c2_87, %c2_88, %c1_89] : memref<10x14x18xf32, #tpu.memory_space<vmem>>, vector<8x12x16xf32>
    %159 = vector.broadcast %157 : f32 to vector<8x12x16xf32>
    %160 = arith.mulf %158, %159 : vector<8x12x16xf32>
    %161 = arith.addf %155, %160 : vector<8x12x16xf32>
    %162 = arith.index_cast %arg1 : i32 to index
    %c26 = arith.constant 26 : index
    %163 = memref.load %arg3[%162, %c26] : memref<4x27xf32, #tpu.memory_space<smem>>
    %c2_90 = arith.constant 2 : index
    %c2_91 = arith.constant 2 : index
    %c2_92 = arith.constant 2 : index
    %164 = vector.load %arg5[%c2_90, %c2_91, %c2_92] : memref<10x14x18xf32, #tpu.memory_space<vmem>>, vector<8x12x16xf32>
    %165 = vector.broadcast %163 : f32 to vector<8x12x16xf32>
    %166 = arith.mulf %164, %165 : vector<8x12x16xf32>
    %167 = arith.addf %161, %166 : vector<8x12x16xf32>
    %c0_93 = arith.constant 0 : index
    %c0_94 = arith.constant 0 : index
    %c0_95 = arith.constant 0 : index
    %c0_96 = arith.constant 0 : index
    %c0_97 = arith.constant 0 : index
    %168 = vector.load %arg4[%c0_93, %c0_94, %c0_95, %c0_96, %c0_97] : memref<1x1x8x12x16xf32, #tpu.memory_space<vmem>>, vector<1x1x8x12x16xf32>
    %169 = vector.shape_cast %168 : vector<1x1x8x12x16xf32> to vector<8x12x16xf32>
    %170 = vector.shape_cast %167 : vector<8x12x16xf32> to vector<1x1x8x12x16xf32>
    tpu.vector_store %arg4[%c0_93, %c0_94, %c0_95, %c0_96, %c0_97], %170 {strides = array<i32>} : memref<1x1x8x12x16xf32, #tpu.memory_space<vmem>>, vector<1x1x8x12x16xf32>,
    return
  }
  func.func @transform_0(%arg0: i32, %arg1: i32) -> (i32, i32, i32, i32, i32) {
    %c0_i32 = arith.constant 0 : i32
    %c0_i32_0 = arith.constant 0 : i32
    %c0_i32_1 = arith.constant 0 : i32
    %c0_i32_2 = arith.constant 0 : i32
    return %arg0, %arg1, %c0_i32, %c0_i32_0, %c0_i32_1 : i32, i32, i32, i32, i32
  }
  func.func @transform_1(%arg0: i32, %arg1: i32) -> (i32, i32) {
    %c0_i32 = arith.constant 0 : i32
    %c0_i32_0 = arith.constant 0 : i32
    %c0_i32_1 = arith.constant 0 : i32
    return %c0_i32, %c0_i32_0 : i32, i32
  }
  func.func @transform_2(%arg0: i32, %arg1: i32) -> (i32, i32, i32, i32, i32) {
    %c0_i32 = arith.constant 0 : i32
    %c0_i32_0 = arith.constant 0 : i32
    %c0_i32_1 = arith.constant 0 : i32
    %c0_i32_2 = arith.constant 0 : i32
    return %arg0, %arg1, %c0_i32, %c0_i32_0, %c0_i32_1 : i32, i32, i32, i32, i32
  }
}

</mosaic_0001>

<bundles_post_ra>
// kernel: tpu_custom_call.1
= control target key start
LH: loop header
LB: loop body
LE: loop exit
PB: predicated region body
PF: predicated region fallthrough
CT: control target
= control target key end

     0   :  { %7 = vsyncpa [#allocation4], 0  ;;  %s2851_s9 = smov 0   ;;  %s2853_s10 = smov 0   ;;  %s5234_s0 = inlined_call_operand.vmem [shape: f32[2,4,8,12,16], index: 0, kind: input, shape index: {}]   ;;  %s5235_s1 = inlined_call_operand.vmem [shape: f32[4,27], index: 1, kind: input, shape index: {}]   ;;  %s5236_s2 = inlined_call_operand.vmem [shape: f32[2,4,8,12,16], index: 2, kind: output, shape index: {}]  }
   0x1   :  { %s2855_s11 = smov 0   ;;  %s2857_s12 = smov 0  }
   0x2   :  { %s2859_s13 = smov 0  }
   0x3 LB: > { %s2683_s14 = sadd.s32 4294967295, %s2829_s13   ;;  %s22_s15 = sadd.s32 1, %s2821_s11  ;;  %s2829_s13 = sphi %s2859_s13, %s13_s13   ;;  %s2825_s12 = sphi %s2857_s12, %s5413_s12   ;;  %s2821_s11 = sphi %s2855_s11, %s5412_s11   ;;  %s2817_s10 = sphi %s2853_s10, %s5411_s10   ;;  %s2813_s9 = sphi %s2851_s9, %s5410_s9  }
   0x4   : > { %p23_p0 = scmp.ge.s32.totalorder %s22_s15, 4  ;;  %s25_s16 = sadd.s32 1, %s2825_s12 }
   0x5   : > { %p2685_p1 = scmp.ge.s32.totalorder %s2829_s13, 1  ;;  %p107_p2 = scmp.lt.s32.totalorder %s2829_s13, 9 }
   0x6   : > { %s5415_s15 = smov (%p23_p0, %s22_s15), 0  ;;  %s5417_s16 = smov (!%p23_p0, %s25_s16), %s2825_s12 }
   0x7   : > { %p2884_p3 = pnand %p2685_p1, %p107_p2  ;;  %p27_p4 = scmp.ge.s32.totalorder %s5417_s16, 2 }
   0x8   : > { %p2888_p5 = scmp.eq.s32.totalorder %s2683_s14, 0  ;;  %s120_s21 = sshll.u32 %s5235_s1, 4  ;;  %s121_s21 = int_to_ptr.vmem [resolvable:$true] %s120_s21 }
   0x9   : > { %p2703_p6 = pneg %p2884_p3  ;;  %s5419_s16 = smov (%p27_p4, %s5417_s16), 0 }
   0xa   : > { %s2772_s22 = scalar_lea.vmem %s121_s21, 64  ;;  %p2780_p12 = scmp.lt.s32.totalorder %s121_s21, %s121_s21 }
   0xb   : > { %p2704_p7 = pnand %p2888_p5, %p2703_p6  ;;  %p2773_p8 = scmp.ne.s32.totalorder %s121_s21, %s2772_s22 }
   0xc   : > { %p2781_p13 = scmp.lt.s32.totalorder %s2772_s22, %s2772_s22 }
   0xd   : > { %p2774_p9 = pneg %p2704_p7 }
   0xe   : > { %p2782_p0 = por %p2781_p13, %p2780_p12 }
   0xf   : > { %p2775_p10 = pnand %p2774_p9, %p2773_p8 }
  0x11   : > { %p2776_p11 = pneg %p2775_p10 }
  0x13   : > { %p2783_p1 = pnand %p2782_p0, %p2776_p11 }
  0x15   : > { %2786 = shalt.err (!%p2783_p1)
}
  0x16   : > { %s2831_s23 = smov [#allocation3]   ;;  %145 = sbr.rel (%p2884_p3) target bundleno = 843 (0x34b), region = 28 }
  0x17   : > { %2706 = dma.vmem_to_smem (!%p2704_p7), %s121_s21, 64, %s2831_s23, [#allocation4]  }
  0x1b   : > { %2808 = dma.done.wait (%p2888_p5), [#allocation4], 64  }
  0x1c   : > { %2810 = vsyncadd (%p2888_p5), [#allocation4], 4294967232 }
  0x1d   : > { %151 = sfence }
  0x1e   : > { %p176_p2 = scmp.lt.s32.totalorder %s2817_s10, 1  ;;  %p178_p4 = scmp.lt.s32.totalorder %s2813_s9, 3  ;;  %vm196_vm0 = vcmask 144384   ;;  %vm194_vm1 = vcmask 146432   ;;  %v2832_v0 = vmov 0.0   ;;  %vm297_vm2 = vcmask 138248  }
  0x1f   : > { %197 = vst.msk [vmem:[#allocation2 + $0x8] sm:$0x3f] %vm196_vm0, %v2832_v0  ;;  %199 = vst.msk [vmem:[#allocation2 + $0x18] sm:$0x3f] %vm196_vm0, %v2832_v0  ;;  %s2833_s4 = smov 1   ;;  %s2950_s5 = sshll.u32 %s2813_s9, 7 }
  0x20   : > { %201 = vst.msk [vmem:[#allocation2 + $0x28] sm:$0x3f] %vm196_vm0, %v2832_v0  ;;  %203 = vst.msk [vmem:[#allocation2 + $0x38] sm:$0x3f] %vm196_vm0, %v2832_v0  ;;  %s5421_s10 = smov (!%p176_p2, %s2817_s10), 1  ;;  %s366_s6 = sadd.s32 1, %s2950_s5 }
  0x21   : > { %205 = vst.msk [vmem:[#allocation2 + $0x48] sm:$0x3f] %vm196_vm0, %v2832_v0  ;;  %207 = vst.msk [vmem:[#allocation2 + $0x58] sm:$0x3f] %vm196_vm0, %v2832_v0  ;;  %s179_s24 = scalar_select %p178_p4, %s2813_s9, 3  ;;  %vm299_vm3 = vcmask 134152  }
  0x22   : > { %209 = vst.msk [vmem:[#allocation2 + $0x68] sm:$0x3f] %vm196_vm0, %v2832_v0  ;;  %211 = vst.msk [vmem:[#allocation2 + $0x78] sm:$0x3f] %vm196_vm0, %v2832_v0  ;;  %s2691_s25 = sshll.u32 %s5421_s10, 6  ;;  %s367_s7 = sld [smem:[#allocation3 + %s366_s6]] }
  0x23   : > { %213 = vst.msk [vmem:[#allocation2 + $0x88] sm:$0x3f] %vm196_vm0, %v2832_v0  ;;  %215 = vst.msk [vmem:[#allocation2 + $0x98] sm:$0x3f] %vm196_vm0, %v2832_v0  ;;  %s2690_s26 = sshll.u32 %s179_s24, 4  ;;  %s465_s8 = sadd.s32 2, %s2950_s5 }
  0x24   : > { %195 = vst.msk [vmem:[#allocation2] sm:$0xff] %vm194_vm1, %v2832_v0  ;;  %198 = vst.msk [vmem:[#allocation2 + $0x10] sm:$0xff] %vm194_vm1, %v2832_v0  ;;  %s2925_s27 = sadd.s32 %s2691_s25, %s2690_s26  ;;  %s466_s9 = sld [smem:[#allocation3 + %s465_s8]]  ;;  %vm2557_vm4 = vcmask 130048   ;;  %vm2559_vm5 = vcmask 125952  }
  0x25   : > { %200 = vst.msk [vmem:[#allocation2 + $0x20] sm:$0xff] %vm194_vm1, %v2832_v0  ;;  %202 = vst.msk [vmem:[#allocation2 + $0x30] sm:$0xff] %vm194_vm1, %v2832_v0  ;;  %s2692_s28 = sshll.u32 %s2925_s27, 3  ;;  %s615_s10 = sadd.s32 4, %s2950_s5 }
  0x26   : > { %204 = vst.msk [vmem:[#allocation2 + $0x40] sm:$0xff] %vm194_vm1, %v2832_v0  ;;  %206 = vst.msk [vmem:[#allocation2 + $0x50] sm:$0xff] %vm194_vm1, %v2832_v0  ;;  %s2933_s3 = scalar_lea.vmem %s5234_s0, %s2692_s28  ;;  %v318_v15 = vld [vmem:[#allocation2 + $0x8] sm:$0xf]  ;;  %s616_s14 = sld [smem:[#allocation3 + %s615_s10]] }
  0x27   : > { %208 = vst.msk [vmem:[#allocation2 + $0x60] sm:$0xff] %vm194_vm1, %v2832_v0  ;;  %210 = vst.msk [vmem:[#allocation2 + $0x70] sm:$0xff] %vm194_vm1, %v2832_v0  ;;  %v218_v1 = vld [vmem:[%s2933_s3 + $0x10] sm:$0xff]  ;;  %v216_v2 = vld [vmem:[%s2933_s3] sm:$0xff]  ;;  %s714_s17 = sadd.s32 5, %s2950_s5  ;;  %s2834_s19 = smov 127  }
  0x28   : > { %212 = vst.msk [vmem:[#allocation2 + $0x80] sm:$0xff] %vm194_vm1, %v2832_v0  ;;  %214 = vst.msk [vmem:[#allocation2 + $0x90] sm:$0xff] %vm194_vm1, %v2832_v0  ;;  %252 = vrot.lane.b32.xlu1 %v218_v1, %s2833_s4  ;;  %248 = vrot.lane.b32.xlu0 %v216_v2, %s2833_s4  ;;  %v219_v3 = vld [vmem:[%s2933_s3 + $0x18] sm:$0xf]  ;;  %v217_v4 = vld [vmem:[%s2933_s3 + $0x8] sm:$0xf] }
  0x29   : > { %v220_v5 = vld [vmem:[%s2933_s3 + $0x20] sm:$0xff]  ;;  %v221_v6 = vld [vmem:[%s2933_s3 + $0x28] sm:$0xf]  ;;  %v222_v7 = vld [vmem:[%s2933_s3 + $0x30] sm:$0xff]  ;;  %v2971_v18 = vstv %s367_s7  ;;  %s715_s18 = sld [smem:[#allocation3 + %s714_s17]]  ;;  %s2835_s20 = smov 126  }
  0x2a   : > { %v223_v8 = vld [vmem:[%s2933_s3 + $0x38] sm:$0xf]  ;;  %v224_v9 = vld [vmem:[%s2933_s3 + $0x40] sm:$0xff]  ;;  %v225_v10 = vld [vmem:[%s2933_s3 + $0x48] sm:$0xf]  ;;  %v370_v20 = vmul.f32 %v2971_v18, %v318_v15  ;;  %v2978_v22 = vstv %s466_s9  ;;  %s864_s21 = sadd.s32 7, %s2950_s5 }
  0x2b   : > { %v226_v11 = vld [vmem:[%s2933_s3 + $0x50] sm:$0xff]  ;;  %v227_v12 = vld [vmem:[%s2933_s3 + $0x58] sm:$0xf]  ;;  %v228_v13 = vld [vmem:[%s2933_s3 + $0x60] sm:$0xff]  ;;  %v469_v23 = vmul.f32 %v2978_v22, %v318_v15  ;;  %s865_s22 = sld [smem:[#allocation3 + %s864_s21]]  ;;  %s963_s24 = sadd.s32 8, %s2950_s5 }
  0x2c   : > { %254 = vrot.lane.b32.xlu1 %v219_v3, %s2833_s4  ;;  %250 = vrot.lane.b32.xlu0 %v217_v4, %s2833_s4  ;;  %v229_v14 = vld [vmem:[%s2933_s3 + $0x68] sm:$0xf]  ;;  %v231_v16 = vld [vmem:[%s2933_s3 + $0x78] sm:$0xf]  ;;  %v317_v19 = vld [vmem:[#allocation2] sm:$0xff]  ;;  %s316_s23 = sld [smem:[#allocation3 + %s2950_s5]] }
  0x2d   : > { %v230_v17 = vld [vmem:[%s2933_s3 + $0x70] sm:$0xff]  ;;  %v369_v21 = vmul.f32 %v2971_v18, %v317_v19  ;;  %v468_v24 = vmul.f32 %v2978_v22, %v317_v19  ;;  %v567_v25 = vld [vmem:[#allocation2 + $0x9] sm:$0xf]  ;;  %v2984_v26 = vstv %s616_s14  ;;  %v566_v27 = vld [vmem:[#allocation2 + $0x1] sm:$0xff]  ;;  %s564_s25 = sadd.s32 3, %s2950_s5  ;;  %s964_s26 = sld [smem:[#allocation3 + %s963_s24]] }
  0x2e   : > { %v619_v28 = vmul.f32 %v2984_v26, %v567_v25  ;;  %v618_v29 = vmul.f32 %v2984_v26, %v566_v27  ;;  %s565_s29 = sld [smem:[#allocation3 + %s564_s25]]  ;;  %s1113_s30 = sadd.s32 10, %s2950_s5 }
  0x2f   : > { %v2990_v30 = vstv %s715_s18  ;;  %s1114_s3 = sld [smem:[#allocation3 + %s1113_s30]]  ;;  %s1212_s7 = sadd.s32 11, %s2950_s5 }
  0x30   : > { %256 = vrot.lane.b32.xlu0 %v220_v5, %s2833_s4  ;;  %258 = vrot.lane.b32.xlu1 %v221_v6, %s2833_s4  ;;  %v718_v31 = vmul.f32 %v2990_v30, %v567_v25  ;;  %v717_v32 = vmul.f32 %v2990_v30, %v566_v27  ;;  %s1213_s8 = sld [smem:[#allocation3 + %s1212_s7]]  ;;  %s1362_s9 = sadd.s32 13, %s2950_s5 }
  0x31   : > { %s1363_s10 = sld [smem:[#allocation3 + %s1362_s9]]  ;;  %s1062_s14 = sadd.s32 9, %s2950_s5 }
  0x32   : > { %s1063_s17 = sld [smem:[#allocation3 + %s1062_s14]]  ;;  %s1461_s18 = sadd.s32 14, %s2950_s5 }
  0x33   : > { %s3849_s21 = sld [smem:[#allocation3 + %s1461_s18]]  ;;  %s1311_s24 = sadd.s32 12, %s2950_s5 }
  0x34   : > { %260 = vrot.lane.b32.xlu0 %v222_v7, %s2833_s4  ;;  %262 = vrot.lane.b32.xlu1 %v223_v8, %s2833_s4  ;;  %s1312_s25 = sld [smem:[#allocation3 + %s1311_s24]]  ;;  %s1861_s30 = sadd.s32 19, %s2950_s5 }
  0x35   : > { %s1960_s7 = sadd.s32 20, %s2950_s5  ;;  %s2110_s9 = sadd.s32 22, %s2950_s5 }
  0x36   : > { %s1809_s14 = sadd.s32 18, %s2950_s5  ;;  %s2209_s18 = sadd.s32 23, %s2950_s5 }
  0x37   : > { %s2059_s24 = sadd.s32 21, %s2950_s5 }
  0x38   : > { %264 = vrot.lane.b32.xlu0 %v224_v9, %s2833_s4  ;;  %266 = vrot.lane.b32.xlu1 %v225_v10, %s2833_s4 }
  0x3c   : > { %268 = vrot.lane.b32.xlu0 %v226_v11, %s2833_s4  ;;  %270 = vrot.lane.b32.xlu1 %v227_v12, %s2833_s4 }
  0x40   : > { %272 = vrot.lane.b32.xlu0 %v228_v13, %s2833_s4  ;;  %274 = vrot.lane.b32.xlu1 %v229_v14, %s2833_s4 }
  0x44   : > { %278 = vrot.lane.b32.xlu1 %v231_v16, %s2833_s4  ;;  %276 = vrot.lane.b32.xlu0 %v230_v17, %s2833_s4  ;;  %s813_s4 = sadd.s32 6, %s2950_s5 }
  0x45   : > { %s814_s6 = sld [smem:[#allocation3 + %s813_s4]]  ;;  %s1560_s4 = sadd.s32 15, %s2950_s5 }
  0x48   : > { %403 = vrot.lane.b32.xlu1 %v370_v20, %s2834_s19  ;;  %401 = vrot.lane.b32.xlu0 %v369_v21, %s2834_s19 }
  0x4c   : > { %502 = vrot.lane.b32.xlu1 %v469_v23, %s2835_s20  ;;  %500 = vrot.lane.b32.xlu0 %v468_v24, %s2835_s20 }
  0x50   : > { %652 = vrot.lane.b32.xlu1 %v619_v28, %s2834_s19  ;;  %650 = vrot.lane.b32.xlu0 %v618_v29, %s2834_s19 }
  0x54   : > { %751 = vrot.lane.b32.xlu1 %v718_v31, %s2835_s20  ;;  %749 = vrot.lane.b32.xlu0 %v717_v32, %s2835_s20 }
  0x9a   : > { %v253_v33 = vpop.permute.xlu1 %252  ;;  %v249_v34 = vpop.permute.xlu0 %248 }
  0x9b   : > { %301 = vst.msk [vmem:[#allocation2 + $0x21] sm:$0xff] %vm297_vm2, %v253_v33  ;;  %298 = vst.msk [vmem:[#allocation2 + $0x11] sm:$0xff] %vm297_vm2, %v249_v34 }
  0x9e   : > { %v255_v35 = vpop.permute.xlu1 %254  ;;  %v251_v36 = vpop.permute.xlu0 %250 }
  0x9f   : > { %302 = vst.msk [vmem:[#allocation2 + $0x29] sm:$0xf] %vm299_vm3, %v255_v35  ;;  %300 = vst.msk [vmem:[#allocation2 + $0x19] sm:$0xf] %vm299_vm3, %v251_v36 }
  0xa2   : > { %v257_v37 = vpop.permute.xlu0 %256  ;;  %v3002_v38 = vld [vmem:[#allocation2 + $0x10] sm:$0xff]  ;;  %v259_v39 = vpop.permute.xlu1 %258  ;;  %v3004_v40 = vld [vmem:[#allocation2 + $0x20] sm:$0xff] }
  0xa3   : > { %5293 = vst [vmem:[#allocation6_spill] sm:$0xff] %v3002_v38  ;;  %5294 = vst [vmem:[#allocation7_spill] sm:$0xff] %v3004_v40  ;;  %v371_v41 = vmul.f32 %v2971_v18, %v3002_v38  ;;  %v373_v42 = vmul.f32 %v2971_v18, %v3004_v40  ;;  %v470_v13 = vmul.f32 %v2978_v22, %v3002_v38  ;;  %v3121_v28 = vld [vmem:[#allocation2 + $0x11] sm:$0xff]  ;;  %v3131_v33 = vld [vmem:[#allocation2 + $0x21] sm:$0xff] }
  0xa4   : > { %303 = vst.msk [vmem:[#allocation2 + $0x31] sm:$0xff] %vm297_vm2, %v257_v37  ;;  %v472_v15 = vmul.f32 %v2978_v22, %v3004_v40  ;;  %5297 = vst [vmem:[#allocation10_spill] sm:$0xff] %v3121_v28  ;;  %v620_v31 = vmul.f32 %v2984_v26, %v3121_v28  ;;  %v622_v35 = vmul.f32 %v2984_v26, %v3131_v33 }
  0xa5   : > { %304 = vst.msk [vmem:[#allocation2 + $0x39] sm:$0xf] %vm299_vm3, %v259_v39  ;;  %405 = vrot.lane.b32.xlu0 %v371_v41, %s2834_s19  ;;  %5298 = vst [vmem:[#allocation11_spill] sm:$0xff] %v3131_v33 }
  0xa6   : > { %v261_v43 = vpop.permute.xlu0 %260  ;;  %v3013_v44 = vld [vmem:[#allocation2 + $0x18] sm:$0xf]  ;;  %v263_v45 = vpop.permute.xlu1 %262  ;;  %v3019_v47 = vld [vmem:[#allocation2 + $0x28] sm:$0xf] }
  0xa7   : > { %305 = vst.msk [vmem:[#allocation2 + $0x41] sm:$0xff] %vm297_vm2, %v261_v43  ;;  %v372_v46 = vmul.f32 %v2971_v18, %v3013_v44  ;;  %v374_v52 = vmul.f32 %v2971_v18, %v3019_v47  ;;  %v471_v14 = vmul.f32 %v2978_v22, %v3013_v44  ;;  %v473_v16 = vmul.f32 %v2978_v22, %v3019_v47  ;;  %v3129_v32 = vld [vmem:[#allocation2 + $0x19] sm:$0xf]  ;;  %v3139_v36 = vld [vmem:[#allocation2 + $0x29] sm:$0xf] }
  0xa8   : > { %306 = vst.msk [vmem:[#allocation2 + $0x49] sm:$0xf] %vm299_vm3, %v263_v45  ;;  %v621_v34 = vmul.f32 %v2984_v26, %v3129_v32  ;;  %v623_v37 = vmul.f32 %v2984_v26, %v3139_v36 }
  0xa9   : > { %409 = vrot.lane.b32.xlu0 %v373_v42, %s2834_s19  ;;  %407 = vrot.lane.b32.xlu1 %v372_v46, %s2834_s19 }
  0xaa   : > { %v265_v48 = vpop.permute.xlu0 %264  ;;  %v267_v50 = vpop.permute.xlu1 %266 }
  0xab   : > { %v3023_v49 = vld [vmem:[#allocation2 + $0x30] sm:$0xff]  ;;  %307 = vst.msk [vmem:[#allocation2 + $0x51] sm:$0xff] %vm297_vm2, %v265_v48 }
  0xac   : > { %v3025_v51 = vld [vmem:[#allocation2 + $0x38] sm:$0xf]  ;;  %v375_v53 = vmul.f32 %v2971_v18, %v3023_v49  ;;  %308 = vst.msk [vmem:[#allocation2 + $0x59] sm:$0xf] %vm299_vm3, %v267_v50  ;;  %v474_v17 = vmul.f32 %v2978_v22, %v3023_v49 }
  0xad   : > { %411 = vrot.lane.b32.xlu1 %v374_v52, %s2834_s19  ;;  %v376_v54 = vmul.f32 %v2971_v18, %v3025_v51  ;;  %v3149_v41 = vld [vmem:[#allocation2 + $0x39] sm:$0xf] }
  0xae   : > { %413 = vrot.lane.b32.xlu0 %v375_v53, %s2834_s19  ;;  %v269_v55 = vpop.permute.xlu0 %268  ;;  %v3037_v56 = vld [vmem:[#allocation2 + $0x40] sm:$0xff]  ;;  %v271_v57 = vpop.permute.xlu1 %270  ;;  %v625_v43 = vmul.f32 %v2984_v26, %v3149_v41 }
  0xaf   : > { %v3039_v58 = vld [vmem:[#allocation2 + $0x48] sm:$0xf]  ;;  %309 = vst.msk [vmem:[#allocation2 + $0x61] sm:$0xff] %vm297_vm2, %v269_v55  ;;  %v377_v59 = vmul.f32 %v2971_v18, %v3037_v56  ;;  %v476_v19 = vmul.f32 %v2978_v22, %v3037_v56 }
  0xb0   : > { %310 = vst.msk [vmem:[#allocation2 + $0x69] sm:$0xf] %vm299_vm3, %v271_v57  ;;  %v378_v60 = vmul.f32 %v2971_v18, %v3039_v58  ;;  %v477_v20 = vmul.f32 %v2978_v22, %v3039_v58  ;;  %v3151_v42 = vld [vmem:[#allocation2 + $0x41] sm:$0xff]  ;;  %v3159_v46 = vld [vmem:[#allocation2 + $0x49] sm:$0xf] }
  0xb1   : > { %415 = vrot.lane.b32.xlu1 %v376_v54, %s2834_s19  ;;  %5300 = vst [vmem:[#allocation13_spill] sm:$0xff] %v3151_v42  ;;  %v626_v45 = vmul.f32 %v2984_v26, %v3151_v42  ;;  %v627_v50 = vmul.f32 %v2984_v26, %v3159_v46 }
  0xb2   : > { %417 = vrot.lane.b32.xlu0 %v377_v59, %s2834_s19  ;;  %v273_v61 = vpop.permute.xlu0 %272  ;;  %v3049_v62 = vld [vmem:[#allocation2 + $0x50] sm:$0xff]  ;;  %v275_v63 = vpop.permute.xlu1 %274 }
  0xb3   : > { %v3051_v0 = vld [vmem:[#allocation2 + $0x58] sm:$0xf]  ;;  %311 = vst.msk [vmem:[#allocation2 + $0x71] sm:$0xff] %vm297_vm2, %v273_v61  ;;  %v379_v1 = vmul.f32 %v2971_v18, %v3049_v62  ;;  %v478_v21 = vmul.f32 %v2978_v22, %v3049_v62 }
  0xb4   : > { %312 = vst.msk [vmem:[#allocation2 + $0x79] sm:$0xf] %vm299_vm3, %v275_v63  ;;  %v380_v2 = vmul.f32 %v2971_v18, %v3051_v0  ;;  %v479_v23 = vmul.f32 %v2978_v22, %v3051_v0  ;;  %v3161_v48 = vld [vmem:[#allocation2 + $0x51] sm:$0xff]  ;;  %v3169_v53 = vld [vmem:[#allocation2 + $0x59] sm:$0xf] }
  0xb5   : > { %419 = vrot.lane.b32.xlu1 %v378_v60, %s2834_s19  ;;  %5301 = vst [vmem:[#allocation14_spill] sm:$0xff] %v3161_v48  ;;  %v628_v52 = vmul.f32 %v2984_v26, %v3161_v48  ;;  %v629_v55 = vmul.f32 %v2984_v26, %v3169_v53 }
  0xb6   : > { %421 = vrot.lane.b32.xlu0 %v379_v1, %s2834_s19  ;;  %v3061_v3 = vld [vmem:[#allocation2 + $0x60] sm:$0xff]  ;;  %v279_v5 = vpop.permute.xlu1 %278  ;;  %v277_v6 = vpop.permute.xlu0 %276 }
  0xb7   : > { %5295 = vst [vmem:[#allocation8_spill] sm:$0xff] %v3061_v3  ;;  %v3063_v4 = vld [vmem:[#allocation2 + $0x68] sm:$0xf]  ;;  %v381_v7 = vmul.f32 %v2971_v18, %v3061_v3  ;;  %314 = vst.msk [vmem:[#allocation2 + $0x89] sm:$0xf] %vm299_vm3, %v279_v5  ;;  %v480_v24 = vmul.f32 %v2978_v22, %v3061_v3  ;;  %v719_v5 = vmul.f32 %v2990_v30, %v3121_v28 }
  0xb8   : > { %313 = vst.msk [vmem:[#allocation2 + $0x81] sm:$0xff] %vm297_vm2, %v277_v6  ;;  %v382_v8 = vmul.f32 %v2971_v18, %v3063_v4  ;;  %v481_v25 = vmul.f32 %v2978_v22, %v3063_v4  ;;  %v3171_v54 = vld [vmem:[#allocation2 + $0x61] sm:$0xff]  ;;  %v3179_v59 = vld [vmem:[#allocation2 + $0x69] sm:$0xf]  ;;  %v720_v6 = vmul.f32 %v2990_v30, %v3129_v32 }
  0xb9   : > { %423 = vrot.lane.b32.xlu1 %v380_v2, %s2834_s19  ;;  %5302 = vst [vmem:[#allocation15_spill] sm:$0xff] %v3171_v54  ;;  %v630_v57 = vmul.f32 %v2984_v26, %v3171_v54  ;;  %v631_v61 = vmul.f32 %v2984_v26, %v3179_v59 }
  0xba   : > { %425 = vrot.lane.b32.xlu0 %v381_v7, %s2834_s19  ;;  %v3073_v9 = vld [vmem:[#allocation2 + $0x70] sm:$0xff]  ;;  %v721_v7 = vmul.f32 %v2990_v30, %v3131_v33  ;;  %v3365_v33 = vstv %s964_s26  ;;  %s1710_s26 = sadd.s32 17, %s2950_s5 }
  0xbb   : > { %5296 = vst [vmem:[#allocation9_spill] sm:$0xff] %v3073_v9  ;;  %v3075_v10 = vld [vmem:[#allocation2 + $0x78] sm:$0xf]  ;;  %v383_v11 = vmul.f32 %v2971_v18, %v3073_v9  ;;  %v482_v27 = vmul.f32 %v2978_v22, %v3073_v9 }
  0xbc   : > { %v384_v12 = vmul.f32 %v2971_v18, %v3075_v10  ;;  %v475_v18 = vmul.f32 %v2978_v22, %v3025_v51  ;;  %v483_v29 = vmul.f32 %v2978_v22, %v3075_v10  ;;  %v3141_v22 = vld [vmem:[#allocation2 + $0x31] sm:$0xff]  ;;  %v3189_v1 = vld [vmem:[#allocation2 + $0x79] sm:$0xf] }
  0xbd   : > { %427 = vrot.lane.b32.xlu1 %v382_v8, %s2834_s19  ;;  %5299 = vst [vmem:[#allocation12_spill] sm:$0xff] %v3141_v22  ;;  %v624_v39 = vmul.f32 %v2984_v26, %v3141_v22  ;;  %v3181_v60 = vld [vmem:[#allocation2 + $0x71] sm:$0xff]  ;;  %5304 = vst [vmem:[#allocation17_spill] sm:$0xff] %v3189_v1  ;;  %v633_v2 = vmul.f32 %v2984_v26, %v3189_v1  ;;  %v723_v8 = vmul.f32 %v2990_v30, %v3141_v22 }
  0xbe   : > { %429 = vrot.lane.b32.xlu0 %v383_v11, %s2834_s19  ;;  %5303 = vst [vmem:[#allocation16_spill] sm:$0xff] %v3181_v60  ;;  %v632_v63 = vmul.f32 %v2984_v26, %v3181_v60  ;;  %v722_v26 = vmul.f32 %v2990_v30, %v3139_v36  ;;  %v3209_v11 = vpop.permute.xlu0 %401 }
  0xbf   : > { %5305 = vst [vmem:[#allocation18_spill] sm:$0xff] %v3209_v11  ;;  %v3363_v11 = vld [vmem:[#allocation2 + $0x7a] sm:$0xf] }
  0xc0   : > { %5319 = vst [vmem:[#allocation32_spill] sm:$0xff] %v3363_v11 }
  0xc1   : > { %431 = vrot.lane.b32.xlu1 %v384_v12, %s2834_s19  ;;  %v724_v12 = vmul.f32 %v2990_v30, %v3149_v41 }
  0xc2   : > { %504 = vrot.lane.b32.xlu0 %v470_v13, %s2835_s20  ;;  %v725_v13 = vmul.f32 %v2990_v30, %v3151_v42 }
  0xc5   : > { %506 = vrot.lane.b32.xlu1 %v471_v14, %s2835_s20  ;;  %v3219_v14 = vpop.permute.xlu1 %403 }
  0xc6   : > { %508 = vrot.lane.b32.xlu0 %v472_v15, %s2835_s20  ;;  %5306 = vst [vmem:[#allocation19_spill] sm:$0xff] %v3219_v14  ;;  %v3221_v15 = vpop.permute.xlu0 %500 }
  0xc7   : > { %5307 = vst [vmem:[#allocation20_spill] sm:$0xff] %v3221_v15 }
  0xc9   : > { %510 = vrot.lane.b32.xlu1 %v473_v16, %s2835_s20  ;;  %v726_v16 = vmul.f32 %v2990_v30, %v3159_v46 }
  0xca   : > { %512 = vrot.lane.b32.xlu0 %v474_v17, %s2835_s20  ;;  %v727_v17 = vmul.f32 %v2990_v30, %v3161_v48 }
  0xcd   : > { %514 = vrot.lane.b32.xlu1 %v475_v18, %s2835_s20  ;;  %v3230_v18 = vpop.permute.xlu1 %502 }
  0xce   : > { %516 = vrot.lane.b32.xlu0 %v476_v19, %s2835_s20  ;;  %5308 = vst [vmem:[#allocation21_spill] sm:$0xff] %v3230_v18  ;;  %v728_v19 = vmul.f32 %v2990_v30, %v3169_v53 }
  0xd1   : > { %518 = vrot.lane.b32.xlu1 %v477_v20, %s2835_s20  ;;  %v729_v20 = vmul.f32 %v2990_v30, %v3171_v54 }
  0xd2   : > { %520 = vrot.lane.b32.xlu0 %v478_v21, %s2835_s20  ;;  %v3236_v21 = vpop.permute.xlu0 %650 }
  0xd3   : > { %5309 = vst [vmem:[#allocation22_spill] sm:$0xff] %v3236_v21  ;;  %v3349_v21 = vstv %s316_s23 }
  0xd4   : > { %5318 = vst [vmem:[#allocation31_spill] sm:$0xff] %v3349_v21  ;;  %v336_v14 = vmul.f32 %v3349_v21, %v3002_v38 }
  0xd5   : > { %522 = vrot.lane.b32.xlu1 %v479_v23, %s2835_s20  ;;  %v3240_v23 = vld [vmem:[#allocation2 + $0x2] sm:$0xff] }
  0xd6   : > { %524 = vrot.lane.b32.xlu0 %v480_v24, %s2835_s20  ;;  %5310 = vst [vmem:[#allocation23_spill] sm:$0xff] %v3240_v23  ;;  %v730_v24 = vmul.f32 %v2990_v30, %v3179_v59 }
  0xd9   : > { %526 = vrot.lane.b32.xlu1 %v481_v25, %s2835_s20  ;;  %v731_v25 = vmul.f32 %v2990_v30, %v3181_v60 }
  0xda   : > { %528 = vrot.lane.b32.xlu0 %v482_v27, %s2835_s20  ;;  %v3246_v27 = vstv %s865_s22  ;;  %s1611_s22 = sadd.s32 16, %s2950_s5 }
  0xdb   : > { %v882_v38 = vmul.f32 %v3246_v27, %v3363_v11  ;;  %s1612_s23 = sld [smem:[#allocation3 + %s1611_s22]]  ;;  %s2359_s22 = sadd.s32 25, %s2950_s5 }
  0xdd   : > { %530 = vrot.lane.b32.xlu1 %v483_v29, %s2835_s20  ;;  %v3248_v29 = vpop.permute.xlu1 %652 }
  0xde   : > { %654 = vrot.lane.b32.xlu0 %v620_v31, %s2834_s19  ;;  %5311 = vst [vmem:[#allocation24_spill] sm:$0xff] %v3248_v29  ;;  %v3252_v31 = vpop.permute.xlu0 %749  ;;  %v3347_v29 = vld [vmem:[#allocation2 + $0x72] sm:$0xff] }
  0xdf   : > { %5312 = vst [vmem:[#allocation25_spill] sm:$0xff] %v3252_v31  ;;  %v3345_v31 = vld [vmem:[#allocation2 + $0x6a] sm:$0xf]  ;;  %5317 = vst [vmem:[#allocation30_spill] sm:$0xff] %v3347_v29  ;;  %v881_v15 = vmul.f32 %v3246_v27, %v3347_v29  ;;  %v337_v29 = vmul.f32 %v3349_v21, %v3013_v44 }
  0xe0   : > { %5316 = vst [vmem:[#allocation29_spill] sm:$0xff] %v3345_v31  ;;  %v880_v18 = vmul.f32 %v3246_v27, %v3345_v31 }
  0xe1   : > { %656 = vrot.lane.b32.xlu1 %v621_v34, %s2834_s19  ;;  %v867_v34 = vmul.f32 %v3246_v27, %v3240_v23 }
  0xe2   : > { %658 = vrot.lane.b32.xlu0 %v622_v35, %s2834_s19  ;;  %v732_v35 = vmul.f32 %v2990_v30, %v3189_v1  ;;  %v3274_v30 = vld [vmem:[#allocation2 + $0x22] sm:$0xff] }
  0xe5   : > { %660 = vrot.lane.b32.xlu1 %v623_v37, %s2834_s19  ;;  %v3258_v37 = vld [vmem:[#allocation2 + $0xa] sm:$0xf] }
  0xe6   : > { %662 = vrot.lane.b32.xlu0 %v624_v39, %s2834_s19  ;;  %5313 = vst [vmem:[#allocation26_spill] sm:$0xff] %v3258_v37  ;;  %v3260_v39 = vld [vmem:[#allocation2 + $0x12] sm:$0xff] }
  0xe7   : > { %v968_v44 = vmul.f32 %v3365_v33, %v3260_v39 }
  0xe9   : > { %664 = vrot.lane.b32.xlu1 %v625_v43, %s2834_s19  ;;  %v868_v43 = vmul.f32 %v3246_v27, %v3258_v37 }
  0xea   : > { %666 = vrot.lane.b32.xlu0 %v626_v45, %s2834_s19  ;;  %v3266_v45 = vpop.permute.xlu1 %751 }
  0xeb   : > { %5314 = vst [vmem:[#allocation27_spill] sm:$0xff] %v3266_v45 }
  0xed   : > { %668 = vrot.lane.b32.xlu1 %v627_v50, %s2834_s19 }
  0xee   : > { %670 = vrot.lane.b32.xlu0 %v628_v52, %s2834_s19  ;;  %v869_v52 = vmul.f32 %v3246_v27, %v3260_v39 }
  0xf1   : > { %672 = vrot.lane.b32.xlu1 %v629_v55, %s2834_s19  ;;  %v3272_v55 = vld [vmem:[#allocation2 + $0x1a] sm:$0xf] }
  0xf2   : > { %674 = vrot.lane.b32.xlu0 %v630_v57, %s2834_s19 }
  0xf5   : > { %676 = vrot.lane.b32.xlu1 %v631_v61, %s2834_s19 }
  0xf6   : > { %678 = vrot.lane.b32.xlu0 %v632_v63, %s2834_s19  ;;  %v870_v63 = vmul.f32 %v3246_v27, %v3272_v55 }
  0xf9   : > { %680 = vrot.lane.b32.xlu1 %v633_v2, %s2834_s19  ;;  %v871_v2 = vmul.f32 %v3246_v27, %v3274_v30 }
  0xfa   : > { %753 = vrot.lane.b32.xlu0 %v719_v5, %s2835_s20  ;;  %v3286_v5 = vld [vmem:[#allocation2 + $0x2a] sm:$0xf] }
  0xfd   : > { %755 = vrot.lane.b32.xlu1 %v720_v6, %s2835_s20  ;;  %v3288_v6 = vld [vmem:[#allocation2 + $0x32] sm:$0xff] }
  0xfe   : > { %757 = vrot.lane.b32.xlu0 %v721_v7, %s2835_s20 }
 0x101   : > { %759 = vrot.lane.b32.xlu1 %v722_v26, %s2835_s20 }
 0x102   : > { %761 = vrot.lane.b32.xlu0 %v723_v8, %s2835_s20  ;;  %v872_v8 = vmul.f32 %v3246_v27, %v3286_v5 }
 0x105   : > { %763 = vrot.lane.b32.xlu1 %v724_v12, %s2835_s20  ;;  %v873_v12 = vmul.f32 %v3246_v27, %v3288_v6 }
 0x106   : > { %765 = vrot.lane.b32.xlu0 %v725_v13, %s2835_s20  ;;  %v3300_v13 = vld [vmem:[#allocation2 + $0x3a] sm:$0xf] }
 0x109   : > { %767 = vrot.lane.b32.xlu1 %v726_v16, %s2835_s20  ;;  %v3302_v16 = vld [vmem:[#allocation2 + $0x42] sm:$0xff] }
 0x10a   : > { %769 = vrot.lane.b32.xlu0 %v727_v17, %s2835_s20 }
 0x10d   : > { %771 = vrot.lane.b32.xlu1 %v728_v19, %s2835_s20 }
 0x10e   : > { %773 = vrot.lane.b32.xlu0 %v729_v20, %s2835_s20  ;;  %v874_v20 = vmul.f32 %v3246_v27, %v3300_v13 }
 0x111   : > { %775 = vrot.lane.b32.xlu1 %v730_v24, %s2835_s20  ;;  %v875_v24 = vmul.f32 %v3246_v27, %v3302_v16 }
 0x112   : > { %777 = vrot.lane.b32.xlu0 %v731_v25, %s2835_s20  ;;  %v3314_v25 = vld [vmem:[#allocation2 + $0x4a] sm:$0xf] }
 0x115   : > { %779 = vrot.lane.b32.xlu1 %v732_v35, %s2835_s20 }
 0x116   : > { %899 = vrot.lane.b32.xlu0 %v867_v34, %s2834_s19  ;;  %v3316_v34 = vld [vmem:[#allocation2 + $0x52] sm:$0xff] }
 0x117   : > { %v3268_v50 = vpop.permute.xlu0 %405 }
 0x119   : > { %901 = vrot.lane.b32.xlu1 %v868_v43, %s2834_s19 }
 0x11a   : > { %903 = vrot.lane.b32.xlu0 %v869_v52, %s2834_s19  ;;  %v876_v52 = vmul.f32 %v3246_v27, %v3314_v25 }
 0x11b   : > { %v3278_v57 = vpop.permute.xlu1 %407  ;;  %v3280_v61 = vpop.permute.xlu0 %409 }
 0x11c   : > { %5315 = vst [vmem:[#allocation28_spill] sm:$0xff] %v3280_v61  ;;  %v451_v61 = vadd.f32 %v3268_v50, %v336_v14  ;;  %v967_v14 = vmul.f32 %v3365_v33, %v3258_v37 }
 0x11d   : > { %905 = vrot.lane.b32.xlu1 %v870_v63, %s2834_s19  ;;  %v877_v63 = vmul.f32 %v3246_v27, %v3316_v34 }
 0x11e   : > { %907 = vrot.lane.b32.xlu0 %v871_v2, %s2834_s19  ;;  %v3331_v2 = vld [vmem:[#allocation2 + $0x5a] sm:$0xf] }
 0x11f   : > { %v3292_v7 = vpop.permute.xlu1 %411 }
 0x120   : > { %v3294_v26 = vpop.permute.xlu0 %413 }
 0x121   : > { %909 = vrot.lane.b32.xlu1 %v872_v8, %s2834_s19  ;;  %v3333_v8 = vld [vmem:[#allocation2 + $0x62] sm:$0xff] }
 0x122   : > { %911 = vrot.lane.b32.xlu0 %v873_v12, %s2834_s19  ;;  %v879_v45 = vmul.f32 %v3246_v27, %v3333_v8 }
 0x123   : > { %v3306_v17 = vpop.permute.xlu1 %415 }
 0x124   : > { %v3308_v19 = vpop.permute.xlu0 %417 }
 0x125   : > { %913 = vrot.lane.b32.xlu1 %v874_v20, %s2834_s19 }
 0x126   : > { %915 = vrot.lane.b32.xlu0 %v875_v24, %s2834_s19  ;;  %v878_v24 = vmul.f32 %v3246_v27, %v3331_v2 }
 0x127   : > { %v3323_v35 = vpop.permute.xlu1 %419 }
 0x128   : > { %v3325_v43 = vpop.permute.xlu0 %421 }
 0x129   : > { %917 = vrot.lane.b32.xlu1 %v876_v52, %s2834_s19 }
 0x12a   : > { %919 = vrot.lane.b32.xlu0 %v877_v63, %s2834_s19 }
 0x12b   : > { %v3337_v12 = vpop.permute.xlu1 %423 }
 0x12c   : > { %v3339_v20 = vpop.permute.xlu0 %425 }
 0x12d   : > { %921 = vrot.lane.b32.xlu1 %v878_v24, %s2834_s19  ;;  %v3367_v24 = vstv %s565_s29  ;;  %s1711_s29 = sld [smem:[#allocation3 + %s1710_s26]]  ;;  %s2458_s26 = sadd.s32 26, %s2950_s5 }
 0x12e   : > { %923 = vrot.lane.b32.xlu0 %v879_v45, %s2834_s19  ;;  %5320 = vst [vmem:[#allocation33_spill] sm:$0xff] %v3367_v24  ;;  %v966_v45 = vmul.f32 %v3365_v33, %v3240_v23 }
 0x12f   : > { %v3353_v52 = vpop.permute.xlu1 %427 }
 0x130   : > { %v3355_v63 = vpop.permute.xlu0 %429 }
 0x131   : > { %925 = vrot.lane.b32.xlu1 %v880_v18, %s2834_s19  ;;  %v585_v18 = vmul.f32 %v3367_v24, %v3121_v28 }
 0x132   : > { %927 = vrot.lane.b32.xlu0 %v881_v15, %s2834_s19  ;;  %v452_v15 = vadd.f32 %v3278_v57, %v337_v29 }
 0x133   : > { %v3374_v40 = vpop.permute.xlu1 %431 }
 0x134   : > { %v505_v1 = vpop.permute.xlu0 %504 }
 0x135   : > { %v550_v31 = vadd.f32 %v505_v1, %v451_v61  ;;  %929 = vrot.lane.b32.xlu1 %v882_v38, %s2834_s19  ;;  %v339_v1 = vmul.f32 %v3349_v21, %v3019_v47  ;;  %v340_v38 = vmul.f32 %v3349_v21, %v3023_v49  ;;  %v341_v47 = vmul.f32 %v3349_v21, %v3025_v51 }
 0x136   : > { %998 = vrot.lane.b32.xlu0 %v966_v45, %s2835_s20  ;;  %v586_v45 = vmul.f32 %v3367_v24, %v3129_v32  ;;  %v969_v32 = vmul.f32 %v3365_v33, %v3272_v55 }
 0x137   : > { %v3387_v50 = vadd.f32 %v585_v18, %v550_v31  ;;  %v507_v23 = vpop.permute.xlu1 %506  ;;  %v454_v29 = vadd.f32 %v3292_v7, %v339_v1  ;;  %v455_v31 = vadd.f32 %v3294_v26, %v340_v38  ;;  %v342_v18 = vmul.f32 %v3349_v21, %v3037_v56 }
 0x138   : > { %v3389_v27 = vpop.permute.xlu0 %508  ;;  %v551_v61 = vadd.f32 %v507_v23, %v452_v15  ;;  %v588_v26 = vmul.f32 %v3367_v24, %v3139_v36  ;;  %v589_v1 = vmul.f32 %v3367_v24, %v3141_v22  ;;  %v456_v51 = vadd.f32 %v3306_v17, %v341_v47 }
 0x139   : > { %1000 = vrot.lane.b32.xlu1 %v967_v14, %s2835_s20  ;;  %v970_v14 = vmul.f32 %v3365_v33, %v3274_v30  ;;  %v457_v38 = vadd.f32 %v3308_v19, %v342_v18  ;;  %v344_v36 = vmul.f32 %v3349_v21, %v3049_v62  ;;  %v972_v17 = vmul.f32 %v3365_v33, %v3288_v6 }
 0x13a   : > { %1002 = vrot.lane.b32.xlu0 %v968_v44, %s2835_s20  ;;  %v3403_v57 = vadd.f32 %v586_v45, %v551_v61  ;;  %v590_v18 = vmul.f32 %v3367_v24, %v3149_v41  ;;  %v346_v41 = vmul.f32 %v3349_v21, %v3061_v3 }
 0x13b   : > { %v511_v23 = vpop.permute.xlu1 %510 }
 0x13c   : > { %v513_v15 = vpop.permute.xlu0 %512  ;;  %v553_v44 = vadd.f32 %v511_v23, %v454_v29  ;;  %v343_v29 = vmul.f32 %v3349_v21, %v3039_v58 }
 0x13d   : > { %v554_v7 = vadd.f32 %v513_v15, %v455_v31  ;;  %1004 = vrot.lane.b32.xlu1 %v969_v32, %s2835_s20  ;;  %v971_v15 = vmul.f32 %v3365_v33, %v3286_v5  ;;  %v591_v32 = vmul.f32 %v3367_v24, %v3151_v42 }
 0x13e   : > { %1006 = vrot.lane.b32.xlu0 %v970_v14, %s2835_s20  ;;  %v3421_v61 = vadd.f32 %v588_v26, %v553_v44  ;;  %v458_v58 = vadd.f32 %v3323_v35, %v343_v29  ;;  %v459_v14 = vadd.f32 %v3325_v43, %v344_v36  ;;  %v345_v26 = vmul.f32 %v3349_v21, %v3051_v0 }
 0x13f   : > { %v3423_v45 = vadd.f32 %v589_v1, %v554_v7  ;;  %v515_v31 = vpop.permute.xlu1 %514  ;;  %v974_v35 = vmul.f32 %v3365_v33, %v3302_v16  ;;  %v592_v36 = vmul.f32 %v3367_v24, %v3159_v46  ;;  %v348_v46 = vmul.f32 %v3349_v21, %v3073_v9 }
 0x140   : > { %v517_v23 = vpop.permute.xlu0 %516  ;;  %v555_v47 = vadd.f32 %v515_v31, %v456_v51  ;;  %v593_v31 = vmul.f32 %v3367_v24, %v3161_v48  ;;  %v460_v0 = vadd.f32 %v3337_v12, %v345_v26  ;;  %v976_v12 = vmul.f32 %v3365_v33, %v3316_v34 }
 0x141   : > { %v556_v19 = vadd.f32 %v517_v23, %v457_v38  ;;  %1008 = vrot.lane.b32.xlu1 %v971_v15, %s2835_s20  ;;  %v973_v38 = vmul.f32 %v3365_v33, %v3300_v13  ;;  %v461_v23 = vadd.f32 %v3339_v20, %v346_v41  ;;  %v463_v41 = vadd.f32 %v3355_v63, %v348_v46 }
 0x142   : > { %1010 = vrot.lane.b32.xlu0 %v972_v17, %s2835_s20  ;;  %v3441_v44 = vadd.f32 %v590_v18, %v555_v47  ;;  %v347_v47 = vmul.f32 %v3349_v21, %v3063_v4  ;;  %v595_v4 = vmul.f32 %v3367_v24, %v3171_v54  ;;  %v597_v63 = vmul.f32 %v3367_v24, %v3181_v60  ;;  %v3574_v54 = vld [vmem:[#allocation2 + $0x58] sm:$0xf] }
 0x143   : > { %v3443_v7 = vadd.f32 %v591_v32, %v556_v19  ;;  %v519_v1 = vpop.permute.xlu1 %518  ;;  %v975_v32 = vmul.f32 %v3365_v33, %v3314_v25 }
 0x144   : > { %v521_v51 = vpop.permute.xlu0 %520  ;;  %v557_v29 = vadd.f32 %v519_v1, %v458_v58  ;;  %v462_v26 = vadd.f32 %v3353_v52, %v347_v47  ;;  %v596_v52 = vmul.f32 %v3367_v24, %v3179_v59 }
 0x145   : > { %v558_v43 = vadd.f32 %v521_v51, %v459_v14  ;;  %1012 = vrot.lane.b32.xlu1 %v973_v38, %s2835_s20  ;;  %v594_v14 = vmul.f32 %v3367_v24, %v3169_v53  ;;  %v349_v38 = vmul.f32 %v3349_v21, %v3075_v10 }
 0x146   : > { %1014 = vrot.lane.b32.xlu0 %v974_v35, %s2835_s20  ;;  %v3462_v15 = vadd.f32 %v592_v36, %v557_v29  ;;  %v977_v29 = vmul.f32 %v3365_v33, %v3331_v2 }
 0x147   : > { %v3464_v17 = vadd.f32 %v593_v31, %v558_v43  ;;  %v523_v19 = vpop.permute.xlu1 %522  ;;  %v978_v43 = vmul.f32 %v3365_v33, %v3333_v8  ;;  %v464_v10 = vadd.f32 %v3374_v40, %v349_v38  ;;  %v5325_v38 = vld [vmem:[#allocation6_spill] sm:$0xff] }
 0x148   : > { %v525_v18 = vpop.permute.xlu0 %524  ;;  %v559_v58 = vadd.f32 %v523_v19, %v460_v0  ;;  %v5321_v19 = vld [vmem:[#allocation29_spill] sm:$0xff] }
 0x149   : > { %v560_v20 = vadd.f32 %v525_v18, %v461_v23  ;;  %1016 = vrot.lane.b32.xlu1 %v975_v32, %s2835_s20  ;;  %v979_v18 = vmul.f32 %v3365_v33, %v5321_v19  ;;  %v5322_v32 = vld [vmem:[#allocation30_spill] sm:$0xff] }
 0x14a   : > { %1018 = vrot.lane.b32.xlu0 %v976_v12, %s2835_s20  ;;  %v3482_v1 = vadd.f32 %v594_v14, %v559_v58  ;;  %v980_v59 = vmul.f32 %v3365_v33, %v5322_v32  ;;  %v3507_v58 = vstv %s1114_s3  ;;  %5327 = vst [vmem:[#allocation30_spill] sm:$0xff] %v3574_v54  ;;  %s1862_s3 = sld [smem:[#allocation3 + %s1861_s30]] }
 0x14b   : > { %v3484_v51 = vadd.f32 %v595_v4, %v560_v20  ;;  %v527_v35 = vpop.permute.xlu1 %526  ;;  %v5323_v20 = vld [vmem:[#allocation17_spill] sm:$0xff]  ;;  %v1125_v42 = vmul.f32 %v3507_v58, %v3574_v54  ;;  %v1126_v22 = vmul.f32 %v3507_v58, %v3061_v3 }
 0x14c   : > { %v529_v53 = vpop.permute.xlu0 %528  ;;  %v561_v36 = vadd.f32 %v527_v35, %v462_v26  ;;  %v598_v14 = vmul.f32 %v3367_v24, %v5323_v20  ;;  %v1116_v35 = vmul.f32 %v3507_v58, %v5325_v38 }
 0x14d   : > { %v562_v31 = vadd.f32 %v529_v53, %v463_v41  ;;  %1020 = vrot.lane.b32.xlu1 %v977_v29, %s2835_s20  ;;  %v981_v41 = vmul.f32 %v3365_v33, %v3363_v11  ;;  %v3523_v53 = vld [vmem:[#allocation2 + $0x18] sm:$0xf] }
 0x14e   : > { %1022 = vrot.lane.b32.xlu0 %v978_v43, %s2835_s20  ;;  %v3499_v0 = vadd.f32 %v596_v52, %v561_v36  ;;  %v1117_v36 = vmul.f32 %v3507_v58, %v3523_v53  ;;  %v3535_v52 = vld [vmem:[#allocation2 + $0x28] sm:$0xf] }
 0x14f   : > { %v3501_v23 = vadd.f32 %v597_v63, %v562_v31  ;;  %v531_v47 = vpop.permute.xlu1 %530  ;;  %v5326_v31 = vld [vmem:[#allocation7_spill] sm:$0xff] }
 0x150   : > { %v655_v46 = vpop.permute.xlu0 %654  ;;  %v563_v12 = vadd.f32 %v531_v47, %v464_v10  ;;  %v1118_v33 = vmul.f32 %v3507_v58, %v5326_v31  ;;  %v1119_v47 = vmul.f32 %v3507_v58, %v3535_v52  ;;  %v338_v60 = vmul.f32 %v3349_v21, %v5326_v31  ;;  %v3589_v21 = vld [vmem:[#allocation2 + $0x68] sm:$0xf] }
 0x151   : > { %1024 = vrot.lane.b32.xlu1 %v979_v18, %s2835_s20  ;;  %v1120_v18 = vmul.f32 %v3507_v58, %v3023_v49  ;;  %v1127_v3 = vmul.f32 %v3507_v58, %v3589_v21 }
 0x152   : > { %1026 = vrot.lane.b32.xlu0 %v980_v59, %s2835_s20  ;;  %v3513_v40 = vadd.f32 %v598_v14, %v563_v12  ;;  %v3547_v59 = vld [vmem:[#allocation2 + $0x38] sm:$0xf] }
 0x153   : > { %v3515_v4 = vpop.permute.xlu1 %656  ;;  %v1121_v14 = vmul.f32 %v3507_v58, %v3547_v59 }
 0x154   : > { %5324 = vst [vmem:[#allocation29_spill] sm:$0xff] %v3513_v40  ;;  %v3517_v26 = vpop.permute.xlu0 %658  ;;  %v3604_v40 = vld [vmem:[#allocation2 + $0x78] sm:$0xf] }
 0x155   : > { %1028 = vrot.lane.b32.xlu1 %v981_v41, %s2835_s20  ;;  %v1122_v41 = vmul.f32 %v3507_v58, %v3037_v56 }
 0x156   : > { %1148 = vrot.lane.b32.xlu0 %v1116_v35, %s2834_s19  ;;  %v3560_v35 = vld [vmem:[#allocation2 + $0x48] sm:$0xf] }
 0x157   : > { %v3527_v29 = vpop.permute.xlu1 %660 }
 0x158   : > { %v3529_v43 = vpop.permute.xlu0 %662 }
 0x159   : > { %1150 = vrot.lane.b32.xlu1 %v1117_v36, %s2834_s19 }
 0x15a   : > { %1152 = vrot.lane.b32.xlu0 %v1118_v33, %s2834_s19 }
 0x15b   : > { %v3539_v63 = vpop.permute.xlu1 %664 }
 0x15c   : > { %v3541_v10 = vpop.permute.xlu0 %666 }
 0x15d   : > { %1154 = vrot.lane.b32.xlu1 %v1119_v47, %s2834_s19  ;;  %v1123_v47 = vmul.f32 %v3507_v58, %v3560_v35 }
 0x15e   : > { %1156 = vrot.lane.b32.xlu0 %v1120_v18, %s2834_s19  ;;  %v1124_v18 = vmul.f32 %v3507_v58, %v3049_v62 }
 0x15f   : > { %v3552_v12 = vpop.permute.xlu1 %668 }
 0x160   : > { %v3554_v20 = vpop.permute.xlu0 %670 }
 0x161   : > { %1158 = vrot.lane.b32.xlu1 %v1121_v14, %s2834_s19  ;;  %v5328_v14 = vld [vmem:[#allocation28_spill] sm:$0xff] }
 0x162   : > { %1160 = vrot.lane.b32.xlu0 %v1122_v41, %s2834_s19  ;;  %v453_v41 = vadd.f32 %v5328_v14, %v338_v60  ;;  %v3593_v60 = vstv %s814_s6  ;;  %s1561_s6 = sld [smem:[#allocation3 + %s1560_s4]] }
 0x163   : > { %v3564_v36 = vpop.permute.xlu1 %672 }
 0x164   : > { %v3566_v33 = vpop.permute.xlu0 %674  ;;  %v552_v28 = vadd.f32 %v3389_v27, %v453_v41  ;;  %v1128_v27 = vmul.f32 %v3507_v58, %v3073_v9 }
 0x165   : > { %1162 = vrot.lane.b32.xlu1 %v1123_v47, %s2834_s19  ;;  %v700_v47 = vadd.f32 %v655_v46, %v3387_v50  ;;  %v834_v50 = vmul.f32 %v3593_v60, %v3260_v39  ;;  %v701_v46 = vadd.f32 %v3515_v4, %v3403_v57  ;;  %v3621_v39 = vstv %s1213_s8  ;;  %s4387_s8 = sld [smem:[#allocation3 + %s1960_s7]] }
 0x166   : > { %1164 = vrot.lane.b32.xlu0 %v1124_v18, %s2834_s19  ;;  %v5329_v18 = vld [vmem:[#allocation11_spill] sm:$0xff]  ;;  %v835_v57 = vmul.f32 %v3593_v60, %v3272_v55  ;;  %v836_v4 = vmul.f32 %v3593_v60, %v3274_v30  ;;  %v1215_v30 = vmul.f32 %v3621_v39, %v5325_v38 }
 0x167   : > { %v3580_v37 = vpop.permute.xlu1 %676  ;;  %v587_v14 = vmul.f32 %v3367_v24, %v5329_v18 }
 0x168   : > { %v3582_v48 = vpop.permute.xlu0 %678 }
 0x169   : > { %1166 = vrot.lane.b32.xlu1 %v1125_v42, %s2834_s19  ;;  %v603_v41 = vadd.f32 %v587_v14, %v552_v28 }
 0x16a   : > { %1168 = vrot.lane.b32.xlu0 %v1126_v22, %s2834_s19  ;;  %v3606_v22 = vld [vmem:[#allocation2 + $0x80] sm:$0xff] }
 0x16b   : > { %v3598_v11 = vpop.permute.xlu1 %680  ;;  %v702_v18 = vadd.f32 %v3517_v26, %v603_v41  ;;  %v1130_v14 = vmul.f32 %v3507_v58, %v3606_v22  ;;  %v703_v26 = vadd.f32 %v3527_v29, %v3421_v61  ;;  %v704_v41 = vadd.f32 %v3529_v43, %v3423_v45 }
 0x16c   : > { %v754_v54 = vpop.permute.xlu0 %753  ;;  %v837_v61 = vmul.f32 %v3593_v60, %v3286_v5  ;;  %v838_v45 = vmul.f32 %v3593_v60, %v3288_v6  ;;  %v1216_v5 = vmul.f32 %v3621_v39, %v3523_v53  ;;  %v1217_v6 = vmul.f32 %v3621_v39, %v5326_v31 }
 0x16d   : > { %v799_v42 = vadd.f32 %v754_v54, %v700_v47  ;;  %1170 = vrot.lane.b32.xlu1 %v1127_v3, %s2834_s19  ;;  %v1129_v47 = vmul.f32 %v3507_v58, %v3604_v40 }
 0x16e   : > { %1172 = vrot.lane.b32.xlu0 %v1128_v27, %s2834_s19  ;;  %v3623_v27 = vld [vmem:[#allocation2 + $0x88] sm:$0xf] }
 0x16f   : > { %v3615_v24 = vadd.f32 %v834_v50, %v799_v42  ;;  %v756_v28 = vpop.permute.xlu1 %755  ;;  %v1131_v55 = vmul.f32 %v3507_v58, %v3623_v27  ;;  %v706_v58 = vadd.f32 %v3541_v10, %v3443_v7  ;;  %v840_v7 = vmul.f32 %v3593_v60, %v3302_v16 }
 0x170   : > { %v758_v54 = vpop.permute.xlu0 %757  ;;  %v800_v3 = vadd.f32 %v756_v28, %v701_v46  ;;  %v708_v10 = vadd.f32 %v3554_v20, %v3464_v17  ;;  %v1219_v16 = vmul.f32 %v3621_v39, %v3023_v49  ;;  %v842_v17 = vmul.f32 %v3593_v60, %v3316_v34 }
 0x171   : > { %v801_v9 = vadd.f32 %v758_v54, %v702_v18  ;;  %1174 = vrot.lane.b32.xlu1 %v1129_v47, %s2834_s19  ;;  %v710_v20 = vadd.f32 %v3566_v33, %v3484_v51  ;;  %v1221_v34 = vmul.f32 %v3621_v39, %v3037_v56  ;;  %v844_v51 = vmul.f32 %v3593_v60, %v3333_v8 }
 0x172   : > { %1176 = vrot.lane.b32.xlu0 %v1130_v14, %s2834_s19  ;;  %v3635_v42 = vadd.f32 %v835_v57, %v800_v3  ;;  %v712_v33 = vadd.f32 %v3582_v48, %v3501_v23  ;;  %v1222_v8 = vmul.f32 %v3621_v39, %v3560_v35  ;;  %v846_v48 = vmul.f32 %v3593_v60, %v5322_v32 }
 0x173   : > { %v3637_v18 = vadd.f32 %v836_v4, %v801_v9  ;;  %v760_v50 = vpop.permute.xlu1 %759  ;;  %v705_v9 = vadd.f32 %v3539_v63, %v3441_v44  ;;  %v839_v44 = vmul.f32 %v3593_v60, %v3300_v13  ;;  %v707_v63 = vadd.f32 %v3552_v12, %v3462_v15 }
 0x174   : > { %v762_v46 = vpop.permute.xlu0 %761  ;;  %v802_v28 = vadd.f32 %v760_v50, %v703_v26  ;;  %v1218_v13 = vmul.f32 %v3621_v39, %v3535_v52  ;;  %v841_v15 = vmul.f32 %v3593_v60, %v3314_v25  ;;  %v709_v12 = vadd.f32 %v3564_v36, %v3482_v1 }
 0x175   : > { %v803_v54 = vadd.f32 %v762_v46, %v704_v41  ;;  %1178 = vrot.lane.b32.xlu1 %v1131_v55, %s2834_s19  ;;  %v1220_v25 = vmul.f32 %v3621_v39, %v3547_v59  ;;  %v843_v1 = vmul.f32 %v3593_v60, %v3331_v2  ;;  %v711_v36 = vadd.f32 %v3580_v37, %v3499_v0  ;;  %v5330_v0 = vld [vmem:[#allocation29_spill] sm:$0xff] }
 0x176   : > { %1247 = vrot.lane.b32.xlu0 %v1215_v30, %s2835_s20  ;;  %v3653_v29 = vadd.f32 %v837_v61, %v802_v28  ;;  %v845_v37 = vmul.f32 %v3593_v60, %v5321_v19  ;;  %v713_v23 = vadd.f32 %v3598_v11, %v5330_v0  ;;  %v3776_v0 = vld [vmem:[#allocation2 + $0x19] sm:$0xf] }
 0x177   : > { %v3655_v38 = vadd.f32 %v838_v45, %v803_v54  ;;  %v764_v43 = vpop.permute.xlu1 %763 }
 0x178   : > { %v766_v47 = vpop.permute.xlu0 %765  ;;  %v804_v14 = vadd.f32 %v764_v43, %v705_v9  ;;  %v1223_v9 = vmul.f32 %v3621_v39, %v3049_v62 }
 0x179   : > { %v805_v3 = vadd.f32 %v766_v47, %v706_v58  ;;  %1249 = vrot.lane.b32.xlu1 %v1216_v5, %s2835_s20 }
 0x17a   : > { %1251 = vrot.lane.b32.xlu0 %v1217_v6, %s2835_s20  ;;  %v3671_v57 = vadd.f32 %v839_v44, %v804_v14  ;;  %v5331_v14 = vld [vmem:[#allocation30_spill] sm:$0xff] }
 0x17b   : > { %v3673_v31 = vadd.f32 %v840_v7, %v805_v3  ;;  %v768_v4 = vpop.permute.xlu1 %767  ;;  %v1224_v19 = vmul.f32 %v3621_v39, %v5331_v14  ;;  %v5332_v3 = vld [vmem:[#allocation8_spill] sm:$0xff] }
 0x17c   : > { %v770_v26 = vpop.permute.xlu0 %769  ;;  %v806_v41 = vadd.f32 %v768_v4, %v707_v63  ;;  %v1225_v32 = vmul.f32 %v3621_v39, %v5332_v3  ;;  %v5333_v7 = vld [vmem:[#allocation32_spill] sm:$0xff] }
 0x17d   : > { %v807_v50 = vadd.f32 %v770_v26, %v708_v10  ;;  %1253 = vrot.lane.b32.xlu1 %v1218_v13, %s2835_s20  ;;  %v847_v63 = vmul.f32 %v3593_v60, %v5333_v7  ;;  %v1226_v26 = vmul.f32 %v3621_v39, %v3589_v21  ;;  %v5334_v13 = vld [vmem:[#allocation9_spill] sm:$0xff]  ;;  %v2757_v7 = vld [vmem:[#allocation2 + $0x9] sm:$0xf] }
 0x17e   : > { %1255 = vrot.lane.b32.xlu0 %v1219_v16, %s2835_s20  ;;  %v3689_v46 = vadd.f32 %v841_v15, %v806_v41  ;;  %v1227_v16 = vmul.f32 %v3621_v39, %v5334_v13  ;;  %v2754_v41 = vld [vmem:[#allocation2] sm:$0xff]  ;;  %v3790_v13 = vld [vmem:[#allocation2 + $0x29] sm:$0xf] }
 0x17f   : > { %v3691_v49 = vadd.f32 %v842_v17, %v807_v50  ;;  %v772_v55 = vpop.permute.xlu1 %771  ;;  %v5335_v50 = vld [vmem:[#allocation31_spill] sm:$0xff] }
 0x180   : > { %v774_v30 = vpop.permute.xlu0 %773  ;;  %v808_v28 = vadd.f32 %v772_v55, %v709_v12  ;;  %v334_v15 = vmul.f32 %v2754_v41, %v5335_v50  ;;  %v1229_v55 = vmul.f32 %v3621_v39, %v3606_v22 }
 0x181   : > { %v809_v54 = vadd.f32 %v774_v30, %v710_v20  ;;  %1257 = vrot.lane.b32.xlu1 %v1220_v25, %s2835_s20  ;;  %v1228_v20 = vmul.f32 %v3621_v39, %v3604_v40  ;;  %v2755_v30 = vld [vmem:[#allocation2 + $0x8] sm:$0xf] }
 0x182   : > { %1259 = vrot.lane.b32.xlu0 %v1221_v34, %s2835_s20  ;;  %v3707_v56 = vadd.f32 %v843_v1, %v808_v28  ;;  %v335_v25 = vmul.f32 %v2755_v30, %v5335_v50  ;;  %v5336_v34 = vld [vmem:[#allocation18_spill] sm:$0xff] }
 0x183   : > { %v3709_v61 = vadd.f32 %v844_v51, %v809_v54  ;;  %v776_v45 = vpop.permute.xlu1 %775  ;;  %v449_v28 = vadd.f32 %v5336_v34, %v334_v15  ;;  %v3761_v54 = vstv %s1363_s10  ;;  %v5343_v15 = vld [vmem:[#allocation12_spill] sm:$0xff]  ;;  %v5344_v30 = vld [vmem:[#allocation22_spill] sm:$0xff]  ;;  %v3804_v34 = vld [vmem:[#allocation2 + $0x39] sm:$0xf]  ;;  %s2111_s10 = sld [smem:[#allocation3 + %s2110_s9]] }
 0x184   : > { %v778_v2 = vpop.permute.xlu0 %777  ;;  %v810_v58 = vadd.f32 %v776_v45, %v711_v36  ;;  %v1230_v36 = vmul.f32 %v3621_v39, %v3623_v27  ;;  %v1368_v50 = vmul.f32 %v3761_v54, %v3790_v13 }
 0x185   : > { %v811_v43 = vadd.f32 %v778_v2, %v712_v33  ;;  %1261 = vrot.lane.b32.xlu1 %v1222_v8, %s2835_s20  ;;  %v5337_v33 = vld [vmem:[#allocation10_spill] sm:$0xff]  ;;  %v5338_v2 = vld [vmem:[#allocation19_spill] sm:$0xff] }
 0x186   : > { %1263 = vrot.lane.b32.xlu0 %v1223_v9, %s2835_s20  ;;  %v3724_v47 = vadd.f32 %v845_v37, %v810_v58  ;;  %v1365_v45 = vmul.f32 %v3761_v54, %v5337_v33  ;;  %v450_v8 = vadd.f32 %v5338_v2, %v335_v25  ;;  %v5339_v9 = vld [vmem:[#allocation20_spill] sm:$0xff]  ;;  %v5340_v37 = vld [vmem:[#allocation33_spill] sm:$0xff]  ;;  %v1370_v33 = vmul.f32 %v3761_v54, %v3804_v34 }
 0x187   : > { %v3726_v5 = vadd.f32 %v846_v48, %v811_v43  ;;  %v780_v62 = vpop.permute.xlu1 %779  ;;  %v548_v58 = vadd.f32 %v5339_v9, %v449_v28  ;;  %v2756_v43 = vld [vmem:[#allocation2 + $0x1] sm:$0xff] }
 0x188   : > { %v3728_v6 = vpop.permute.xlu0 %899  ;;  %v812_v44 = vadd.f32 %v780_v62, %v713_v23  ;;  %v583_v48 = vmul.f32 %v2756_v43, %v5340_v37  ;;  %v1366_v62 = vmul.f32 %v3761_v54, %v3776_v0 }
 0x189   : > { %1265 = vrot.lane.b32.xlu1 %v1224_v19, %s2835_s20  ;;  %v5341_v19 = vld [vmem:[#allocation11_spill] sm:$0xff] }
 0x18a   : > { %1267 = vrot.lane.b32.xlu0 %v1225_v32, %s2835_s20  ;;  %v3738_v11 = vadd.f32 %v847_v63, %v812_v44  ;;  %v1367_v3 = vmul.f32 %v3761_v54, %v5341_v19  ;;  %v5342_v32 = vld [vmem:[#allocation21_spill] sm:$0xff]  ;;  %v584_v63 = vmul.f32 %v2757_v7, %v5340_v37  ;;  %v5348_v37 = vld [vmem:[#allocation23_spill] sm:$0xff] }
 0x18b   : > { %v3740_v10 = vpop.permute.xlu1 %901  ;;  %v549_v44 = vadd.f32 %v5342_v32, %v450_v8  ;;  %v5346_v8 = vld [vmem:[#allocation24_spill] sm:$0xff] }
 0x18c   : > { %v3742_v4 = vpop.permute.xlu0 %903 }
 0x18d   : > { %1269 = vrot.lane.b32.xlu1 %v1226_v26, %s2835_s20  ;;  %v599_v26 = vadd.f32 %v583_v48, %v548_v58  ;;  %v5347_v58 = vld [vmem:[#allocation25_spill] sm:$0xff]  ;;  %v832_v48 = vmul.f32 %v3593_v60, %v5348_v37  ;;  %v2758_v37 = vld [vmem:[#allocation2 + $0x10] sm:$0xff] }
 0x18e   : > { %1271 = vrot.lane.b32.xlu0 %v1227_v16, %s2835_s20 }
 0x18f   : > { %v3751_v17 = vpop.permute.xlu1 %905  ;;  %v698_v25 = vadd.f32 %v5344_v30, %v599_v26  ;;  %v3840_v30 = vstv %s1063_s17  ;;  %s1810_s17 = sld [smem:[#allocation3 + %s1809_s14]] }
 0x190   : > { %v3753_v12 = vpop.permute.xlu0 %907 }
 0x191   : > { %1273 = vrot.lane.b32.xlu1 %v1228_v20, %s2835_s20  ;;  %v1369_v20 = vmul.f32 %v3761_v54, %v5343_v15  ;;  %v797_v43 = vadd.f32 %v5347_v58, %v698_v25  ;;  %v5351_v15 = vld [vmem:[#allocation26_spill] sm:$0xff] }
 0x192   : > { %1275 = vrot.lane.b32.xlu0 %v1229_v55, %s2835_s20  ;;  %v600_v55 = vadd.f32 %v584_v63, %v549_v44  ;;  %v5349_v44 = vld [vmem:[#allocation14_spill] sm:$0xff]  ;;  %v5350_v63 = vld [vmem:[#allocation27_spill] sm:$0xff] }
 0x193   : > { %v3765_v1 = vpop.permute.xlu1 %909  ;;  %v1373_v7 = vmul.f32 %v3761_v54, %v5349_v44 }
 0x194   : > { %v3767_v51 = vpop.permute.xlu0 %911  ;;  %v699_v9 = vadd.f32 %v5346_v8, %v600_v55  ;;  %v3835_v55 = vld [vmem:[#allocation2 + $0x59] sm:$0xf]  ;;  %v5352_v8 = vld [vmem:[#allocation15_spill] sm:$0xff] }
 0x195   : > { %1277 = vrot.lane.b32.xlu1 %v1230_v36, %s2835_s20 }
 0x196   : > { %1397 = vrot.lane.b32.xlu0 %v1365_v45, %s2834_s19  ;;  %v5345_v45 = vld [vmem:[#allocation13_spill] sm:$0xff]  ;;  %v798_v26 = vadd.f32 %v5350_v63, %v699_v9 }
 0x197   : > { %v3780_v23 = vpop.permute.xlu1 %913  ;;  %v1371_v2 = vmul.f32 %v3761_v54, %v5345_v45 }
 0x198   : > { %v3782_v39 = vpop.permute.xlu0 %915 }
 0x199   : > { %1399 = vrot.lane.b32.xlu1 %v1366_v62, %s2834_s19  ;;  %v3820_v62 = vld [vmem:[#allocation2 + $0x49] sm:$0xf] }
 0x19a   : > { %1401 = vrot.lane.b32.xlu0 %v1367_v3, %s2834_s19  ;;  %v1372_v32 = vmul.f32 %v3761_v54, %v3820_v62 }
 0x19b   : > { %v3795_v16 = vpop.permute.xlu1 %917 }
 0x19c   : > { %v3797_v41 = vpop.permute.xlu0 %919 }
 0x19d   : > { %1403 = vrot.lane.b32.xlu1 %v1368_v50, %s2834_s19  ;;  %v848_v50 = vadd.f32 %v832_v48, %v797_v43  ;;  %v3851_v43 = vld [vmem:[#allocation2 + $0x69] sm:$0xf]  ;;  %v1081_v48 = vmul.f32 %v2758_v37, %v3840_v30 }
 0x19e   : > { %1405 = vrot.lane.b32.xlu0 %v1369_v20, %s2834_s19  ;;  %v833_v20 = vmul.f32 %v3593_v60, %v5351_v15  ;;  %v1375_v60 = vmul.f32 %v3761_v54, %v5352_v8  ;;  %v950_v8 = vadd.f32 %v3751_v17, %v3635_v42  ;;  %v3889_v42 = vld [vmem:[#allocation2 + $0x89] sm:$0xf]  ;;  %v2760_v17 = vld [vmem:[#allocation2 + $0x30] sm:$0xff] }
 0x19f   : > { %v3808_v28 = vpop.permute.xlu1 %921  ;;  %v947_v25 = vadd.f32 %v3728_v6, %v848_v50  ;;  %v5353_v50 = vld [vmem:[#allocation16_spill] sm:$0xff]  ;;  %5355 = vst [vmem:[#allocation6_spill] sm:$0xff] %v3889_v42 }
 0x1a0   : > { %v3810_v36 = vpop.permute.xlu0 %923  ;;  %v849_v9 = vadd.f32 %v833_v20, %v798_v26  ;;  %v1376_v26 = vmul.f32 %v3761_v54, %v3851_v43  ;;  %v1377_v15 = vmul.f32 %v3761_v54, %v5353_v50  ;;  %v953_v50 = vadd.f32 %v3767_v51, %v3655_v38  ;;  %v2762_v38 = vld [vmem:[#allocation2 + $0x40] sm:$0xff] }
 0x1a1   : > { %1407 = vrot.lane.b32.xlu1 %v1370_v33, %s2834_s19  ;;  %v955_v51 = vadd.f32 %v3782_v39, %v3673_v31  ;;  %v2764_v31 = vld [vmem:[#allocation2 + $0x50] sm:$0xff]  ;;  %v956_v39 = vadd.f32 %v3795_v16, %v3689_v46  ;;  %v1090_v46 = vmul.f32 %v3840_v30, %v5331_v14 }
 0x1a2   : > { %1409 = vrot.lane.b32.xlu0 %v1371_v2, %s2834_s19  ;;  %v1374_v2 = vmul.f32 %v3761_v54, %v3835_v55  ;;  %v948_v6 = vadd.f32 %v3740_v10, %v849_v9  ;;  %v2759_v10 = vld [vmem:[#allocation2 + $0x20] sm:$0xff] }
 0x1a3   : > { %v3824_v19 = vpop.permute.xlu1 %925 }
 0x1a4   : > { %v3826_v3 = vpop.permute.xlu0 %927 }
 0x1a5   : > { %1411 = vrot.lane.b32.xlu1 %v1372_v32, %s2834_s19  ;;  %v949_v32 = vadd.f32 %v3742_v4, %v3615_v24  ;;  %v1082_v24 = vmul.f32 %v3840_v30, %v3523_v53  ;;  %v1083_v4 = vmul.f32 %v2759_v10, %v3840_v30  ;;  %v3906_v10 = vld [vmem:[#allocation2 + $0x11] sm:$0xff] }
 0x1a6   : > { %1413 = vrot.lane.b32.xlu0 %v1373_v7, %s2834_s19 }
 0x1a7   : > { %v3843_v33 = vpop.permute.xlu1 %929 }
 0x1a8   : > { %v999_v45 = vpop.permute.xlu0 %998 }
 0x1a9   : > { %v1046_v58 = vadd.f32 %v999_v45, %v947_v25  ;;  %1415 = vrot.lane.b32.xlu1 %v1374_v2, %s2834_s19  ;;  %v3865_v45 = vld [vmem:[#allocation2 + $0x79] sm:$0xf]  ;;  %v3867_v2 = vld [vmem:[#allocation2 + $0x81] sm:$0xff] }
 0x1aa   : > { %1417 = vrot.lane.b32.xlu0 %v1375_v60, %s2834_s19  ;;  %v951_v60 = vadd.f32 %v3753_v12, %v3637_v18  ;;  %v1378_v53 = vmul.f32 %v3761_v54, %v3865_v45  ;;  %v1084_v18 = vmul.f32 %v3840_v30, %v3535_v52  ;;  %v1085_v12 = vmul.f32 %v2760_v17, %v3840_v30 }
 0x1ab   : > { %v3859_v44 = vadd.f32 %v1081_v48, %v1046_v58  ;;  %v1001_v7 = vpop.permute.xlu1 %1000  ;;  %v1380_v52 = vmul.f32 %v3761_v54, %v3889_v42 }
 0x1ac   : > { %v1003_v63 = vpop.permute.xlu0 %1002  ;;  %v1047_v20 = vadd.f32 %v1001_v7, %v948_v6  ;;  %v1379_v6 = vmul.f32 %v3761_v54, %v3867_v2  ;;  %v954_v54 = vadd.f32 %v3780_v23, %v3671_v57  ;;  %v1088_v57 = vmul.f32 %v3840_v30, %v3560_v35 }
 0x1ad   : > { %v1048_v25 = vadd.f32 %v1003_v63, %v949_v32  ;;  %1419 = vrot.lane.b32.xlu1 %v1376_v26, %s2834_s19  ;;  %v3887_v32 = vstv %s3849_s21  ;;  %v952_v26 = vadd.f32 %v3765_v1, %v3653_v29  ;;  %v1086_v29 = vmul.f32 %v3840_v30, %v3547_v59  ;;  %s4654_s21 = sld [smem:[#allocation3 + %s2209_s18]] }
 0x1ae   : > { %1421 = vrot.lane.b32.xlu0 %v1377_v15, %s2834_s19  ;;  %v3878_v9 = vadd.f32 %v1082_v24, %v1047_v20  ;;  %v1087_v1 = vmul.f32 %v2762_v38, %v3840_v30  ;;  %v1465_v59 = vmul.f32 %v3887_v32, %v3776_v0  ;;  %v1089_v23 = vmul.f32 %v2764_v31, %v3840_v30 }
 0x1af   : > { %v3880_v58 = vadd.f32 %v1083_v4, %v1048_v25  ;;  %v1005_v37 = vpop.permute.xlu1 %1004  ;;  %v1464_v4 = vmul.f32 %v3906_v10, %v3887_v32  ;;  %v1467_v35 = vmul.f32 %v3887_v32, %v3790_v13  ;;  %v1469_v14 = vmul.f32 %v3887_v32, %v3804_v34 }
 0x1b0   : > { %v1007_v48 = vpop.permute.xlu0 %1006  ;;  %v1049_v7 = vadd.f32 %v1005_v37, %v950_v8 }
 0x1b1   : > { %5354 = vst [vmem:[#allocation17_spill] sm:$0xff] %v3880_v58  ;;  %v1050_v63 = vadd.f32 %v1007_v48, %v951_v60  ;;  %1423 = vrot.lane.b32.xlu1 %v1378_v53, %s2834_s19 }
 0x1b2   : > { %1425 = vrot.lane.b32.xlu0 %v1379_v6, %s2834_s19  ;;  %v3900_v15 = vadd.f32 %v1084_v18, %v1049_v7  ;;  %v3925_v7 = vld [vmem:[#allocation2 + $0x21] sm:$0xff] }
 0x1b3   : > { %v3902_v20 = vadd.f32 %v1085_v12, %v1050_v63  ;;  %v1009_v25 = vpop.permute.xlu1 %1008  ;;  %5356 = vst [vmem:[#allocation7_spill] sm:$0xff] %v3925_v7  ;;  %v1466_v63 = vmul.f32 %v3925_v7, %v3887_v32  ;;  %v957_v12 = vadd.f32 %v3797_v41, %v3691_v49  ;;  %v2766_v49 = vld [vmem:[#allocation2 + $0x60] sm:$0xff]  ;;  %v958_v41 = vadd.f32 %v3808_v28, %v3707_v56 }
 0x1b4   : > { %v1011_v24 = vpop.permute.xlu0 %1010  ;;  %v1051_v8 = vadd.f32 %v1009_v25, %v952_v26  ;;  %v1091_v16 = vmul.f32 %v2766_v49, %v3840_v30  ;;  %v1092_v56 = vmul.f32 %v3840_v30, %v3589_v21 }
 0x1b5   : > { %v1052_v60 = vadd.f32 %v1011_v24, %v953_v50  ;;  %1427 = vrot.lane.b32.xlu1 %v1380_v52, %s2834_s19  ;;  %v3944_v52 = vld [vmem:[#allocation2 + $0x31] sm:$0xff] }
 0x1b6   : > { %1496 = vrot.lane.b32.xlu0 %v1464_v4, %s2835_s20  ;;  %v3919_v37 = vadd.f32 %v1086_v29, %v1051_v8  ;;  %v1468_v4 = vmul.f32 %v3944_v52, %v3887_v32  ;;  %v959_v29 = vadd.f32 %v3810_v36, %v3709_v61  ;;  %v2768_v61 = vld [vmem:[#allocation2 + $0x70] sm:$0xff]  ;;  %v960_v36 = vadd.f32 %v3824_v19, %v3724_v47 }
 0x1b7   : > { %v3921_v48 = vadd.f32 %v1087_v1, %v1052_v60  ;;  %v1013_v53 = vpop.permute.xlu1 %1012  ;;  %v1093_v28 = vmul.f32 %v2768_v61, %v3840_v30  ;;  %v1094_v47 = vmul.f32 %v3840_v30, %v3604_v40  ;;  %v962_v19 = vadd.f32 %v3843_v33, %v3738_v11 }
 0x1b8   : > { %v1015_v6 = vpop.permute.xlu0 %1014  ;;  %v1053_v18 = vadd.f32 %v1013_v53, %v954_v54  ;;  %v3963_v53 = vld [vmem:[#allocation2 + $0x41] sm:$0xff]  ;;  %v1473_v40 = vmul.f32 %v3887_v32, %v3835_v55  ;;  %v1096_v11 = vmul.f32 %v3840_v30, %v3623_v27  ;;  %v1479_v61 = vmul.f32 %v3887_v32, %v3889_v42 }
 0x1b9   : > { %v1054_v17 = vadd.f32 %v1015_v6, %v955_v51  ;;  %1498 = vrot.lane.b32.xlu1 %v1465_v59, %s2835_s20  ;;  %v1470_v6 = vmul.f32 %v3963_v53, %v3887_v32 }
 0x1ba   : > { %1500 = vrot.lane.b32.xlu0 %v1466_v63, %s2835_s20  ;;  %v3938_v26 = vadd.f32 %v1088_v57, %v1053_v18  ;;  %v961_v18 = vadd.f32 %v3826_v3, %v3726_v5  ;;  %v1095_v5 = vmul.f32 %v3840_v30, %v3606_v22 }
 0x1bb   : > { %v3940_v50 = vadd.f32 %v1089_v23, %v1054_v17  ;;  %v1017_v25 = vpop.permute.xlu1 %1016  ;;  %v1471_v23 = vmul.f32 %v3887_v32, %v3820_v62 }
 0x1bc   : > { %v1019_v24 = vpop.permute.xlu0 %1018  ;;  %v1055_v8 = vadd.f32 %v1017_v25, %v956_v39  ;;  %v3982_v39 = vld [vmem:[#allocation2 + $0x51] sm:$0xff] }
 0x1bd   : > { %v1056_v60 = vadd.f32 %v1019_v24, %v957_v12  ;;  %1502 = vrot.lane.b32.xlu1 %v1467_v35, %s2835_s20  ;;  %v1472_v12 = vmul.f32 %v3982_v39, %v3887_v32 }
 0x1be   : > { %1504 = vrot.lane.b32.xlu0 %v1468_v4, %s2835_s20  ;;  %v3957_v38 = vadd.f32 %v1090_v46, %v1055_v8 }
 0x1bf   : > { %v3959_v1 = vadd.f32 %v1091_v16, %v1056_v60  ;;  %v1021_v54 = vpop.permute.xlu1 %1020  ;;  %v4003_v60 = vld [vmem:[#allocation2 + $0x61] sm:$0xff] }
 0x1c0   : > { %v1023_v51 = vpop.permute.xlu0 %1022  ;;  %v1057_v59 = vadd.f32 %v1021_v54, %v958_v41  ;;  %v1474_v22 = vmul.f32 %v4003_v60, %v3887_v32  ;;  %v1475_v41 = vmul.f32 %v3887_v32, %v3851_v43 }
 0x1c1   : > { %v1058_v63 = vadd.f32 %v1023_v51, %v959_v29  ;;  %1506 = vrot.lane.b32.xlu1 %v1469_v14, %s2835_s20  ;;  %v4019_v29 = vld [vmem:[#allocation2 + $0x71] sm:$0xff]  ;;  %v1477_v51 = vmul.f32 %v3887_v32, %v3865_v45  ;;  %v1478_v14 = vmul.f32 %v3887_v32, %v3867_v2 }
 0x1c2   : > { %1508 = vrot.lane.b32.xlu0 %v1470_v6, %s2835_s20  ;;  %v3976_v17 = vadd.f32 %v1092_v56, %v1057_v59  ;;  %v1476_v54 = vmul.f32 %v4019_v29, %v3887_v32  ;;  %v4033_v6 = vld [vmem:[#allocation2 + $0x12] sm:$0xff]  ;;  %v4035_v59 = vstv %s1612_s23  ;;  %s2360_s23 = sld [smem:[#allocation3 + %s2359_s22]] }
 0x1c3   : > { %v3978_v57 = vadd.f32 %v1093_v28, %v1058_v63  ;;  %v1025_v31 = vpop.permute.xlu1 %1024  ;;  %v1614_v28 = vmul.f32 %v4035_v59, %v4033_v6 }
 0x1c4   : > { %v1027_v21 = vpop.permute.xlu0 %1026  ;;  %v1059_v25 = vadd.f32 %v1025_v31, %v960_v36  ;;  %v4047_v36 = vld [vmem:[#allocation2 + $0x1a] sm:$0xf] }
 0x1c5   : > { %v1060_v24 = vadd.f32 %v1027_v21, %v961_v18  ;;  %1510 = vrot.lane.b32.xlu1 %v1471_v23, %s2835_s20  ;;  %v4049_v18 = vld [vmem:[#allocation2 + $0x22] sm:$0xff]  ;;  %v1615_v23 = vmul.f32 %v4035_v59, %v4047_v36 }
 0x1c6   : > { %1512 = vrot.lane.b32.xlu0 %v1472_v12, %s2835_s20  ;;  %v3995_v3 = vadd.f32 %v1094_v47, %v1059_v25  ;;  %v1616_v32 = vmul.f32 %v4035_v59, %v4049_v18  ;;  %v4061_v12 = vld [vmem:[#allocation2 + $0x2a] sm:$0xf]  ;;  %v4063_v25 = vld [vmem:[#allocation2 + $0x32] sm:$0xff] }
 0x1c7   : > { %v3997_v35 = vadd.f32 %v1095_v5, %v1060_v24  ;;  %v1029_v4 = vpop.permute.xlu1 %1028  ;;  %v1617_v5 = vmul.f32 %v4035_v59, %v4061_v12 }
 0x1c8   : > { %v3999_v8 = vpop.permute.xlu0 %1148  ;;  %v1061_v46 = vadd.f32 %v1029_v4, %v962_v19  ;;  %v1618_v19 = vmul.f32 %v4035_v59, %v4063_v25  ;;  %v4076_v4 = vld [vmem:[#allocation2 + $0x3a] sm:$0xf] }
 0x1c9   : > { %1514 = vrot.lane.b32.xlu1 %v1473_v40, %s2835_s20  ;;  %v4078_v40 = vld [vmem:[#allocation2 + $0x42] sm:$0xff] }
 0x1ca   : > { %1516 = vrot.lane.b32.xlu0 %v1474_v22, %s2835_s20  ;;  %v4011_v33 = vadd.f32 %v1096_v11, %v1061_v46  ;;  %v1619_v11 = vmul.f32 %v4035_v59, %v4076_v4 }
 0x1cb   : > { %v4013_v49 = vpop.permute.xlu1 %1150 }
 0x1cc   : > { %5357 = vst [vmem:[#allocation28_spill] sm:$0xff] %v4011_v33  ;;  %v4015_v16 = vpop.permute.xlu0 %1152  ;;  %v4121_v33 = vld [vmem:[#allocation2 + $0x6a] sm:$0xf] }
 0x1cd   : > { %5358 = vst [vmem:[#allocation29_spill] sm:$0xff] %v4015_v16  ;;  %1518 = vrot.lane.b32.xlu1 %v1475_v41, %s2835_s20  ;;  %v1620_v41 = vmul.f32 %v4035_v59, %v4078_v40 }
 0x1ce   : > { %1520 = vrot.lane.b32.xlu0 %v1476_v54, %s2835_s20  ;;  %v4090_v54 = vld [vmem:[#allocation2 + $0x4a] sm:$0xf] }
 0x1cf   : > { %v4025_v27 = vpop.permute.xlu1 %1154 }
 0x1d0   : > { %v4027_v30 = vpop.permute.xlu0 %1156 }
 0x1d1   : > { %1522 = vrot.lane.b32.xlu1 %v1477_v51, %s2835_s20  ;;  %v4092_v51 = vld [vmem:[#allocation2 + $0x52] sm:$0xff] }
 0x1d2   : > { %1524 = vrot.lane.b32.xlu0 %v1478_v14, %s2835_s20 }
 0x1d3   : > { %v4039_v63 = vpop.permute.xlu1 %1158 }
 0x1d4   : > { %v4041_v56 = vpop.permute.xlu0 %1160 }
 0x1d5   : > { %1526 = vrot.lane.b32.xlu1 %v1479_v61, %s2835_s20 }
 0x1d6   : > { %1646 = vrot.lane.b32.xlu0 %v1614_v28, %s2834_s19  ;;  %v1621_v28 = vmul.f32 %v4035_v59, %v4090_v54 }
 0x1d7   : > { %v4053_v31 = vpop.permute.xlu1 %1162 }
 0x1d8   : > { %v4055_v21 = vpop.permute.xlu0 %1164 }
 0x1d9   : > { %1648 = vrot.lane.b32.xlu1 %v1615_v23, %s2834_s19  ;;  %v1622_v23 = vmul.f32 %v4035_v59, %v4092_v51 }
 0x1da   : > { %1650 = vrot.lane.b32.xlu0 %v1616_v32, %s2834_s19  ;;  %v4104_v32 = vld [vmem:[#allocation2 + $0x5a] sm:$0xf] }
 0x1db   : > { %v4068_v24 = vpop.permute.xlu1 %1166  ;;  %5359 = vst [vmem:[#allocation30_spill] sm:$0xff] %v4104_v32  ;;  %v1623_v16 = vmul.f32 %v4035_v59, %v4104_v32 }
 0x1dc   : > { %v4070_v47 = vpop.permute.xlu0 %1168 }
 0x1dd   : > { %1652 = vrot.lane.b32.xlu1 %v1617_v5, %s2834_s19  ;;  %v4106_v5 = vld [vmem:[#allocation2 + $0x62] sm:$0xff] }
 0x1de   : > { %1654 = vrot.lane.b32.xlu0 %v1618_v19, %s2834_s19  ;;  %5360 = vst [vmem:[#allocation8_spill] sm:$0xff] %v4106_v5  ;;  %v4111_v19 = vstv %s1312_s25  ;;  %v1624_v58 = vmul.f32 %v4035_v59, %v4106_v5  ;;  %s2060_s25 = sld [smem:[#allocation3 + %s2059_s24]] }
 0x1df   : > { %v4082_v22 = vpop.permute.xlu1 %1170 }
 0x1e0   : > { %v4084_v46 = vpop.permute.xlu0 %1172 }
 0x1e1   : > { %1656 = vrot.lane.b32.xlu1 %v1619_v11, %s2834_s19  ;;  %v1196_v11 = vadd.f32 %v3999_v8, %v3859_v44  ;;  %v1197_v44 = vadd.f32 %v4013_v49, %v3878_v9  ;;  %v1199_v9 = vadd.f32 %v4025_v27, %v3900_v15  ;;  %v1333_v15 = vmul.f32 %v4111_v19, %v3790_v13 }
 0x1e2   : > { %1658 = vrot.lane.b32.xlu0 %v1620_v41, %s2834_s19  ;;  %v1201_v27 = vadd.f32 %v4039_v63, %v3919_v37  ;;  %v1335_v37 = vmul.f32 %v4111_v19, %v3804_v34  ;;  %v1203_v63 = vadd.f32 %v4053_v31, %v3938_v26  ;;  %v1337_v26 = vmul.f32 %v4111_v19, %v3820_v62 }
 0x1e3   : > { %v4096_v14 = vpop.permute.xlu1 %1174  ;;  %v1205_v31 = vadd.f32 %v4068_v24, %v3957_v38  ;;  %v1339_v38 = vmul.f32 %v4111_v19, %v3835_v55  ;;  %v1207_v24 = vadd.f32 %v4082_v22, %v3976_v17  ;;  %v1341_v17 = vmul.f32 %v4111_v19, %v3851_v43 }
 0x1e4   : > { %v4098_v61 = vpop.permute.xlu0 %1176  ;;  %v1209_v22 = vadd.f32 %v4096_v14, %v3995_v3  ;;  %v1343_v3 = vmul.f32 %v4111_v19, %v3865_v45  ;;  %v5367_v14 = vld [vmem:[#allocation28_spill] sm:$0xff] }
 0x1e5   : > { %1660 = vrot.lane.b32.xlu1 %v1621_v28, %s2834_s19  ;;  %v4123_v28 = vld [vmem:[#allocation2 + $0x72] sm:$0xff] }
 0x1e6   : > { %1662 = vrot.lane.b32.xlu0 %v1622_v23, %s2834_s19  ;;  %v1330_v23 = vmul.f32 %v3906_v10, %v4111_v19  ;;  %v4139_v10 = vld [vmem:[#allocation2 + $0x7a] sm:$0xf] }
 0x1e7   : > { %v4115_v41 = vpop.permute.xlu1 %1178  ;;  %5364 = vst [vmem:[#allocation18_spill] sm:$0xff] %v4139_v10 }
 0x1e8   : > { %5361 = vst [vmem:[#allocation32_spill] sm:$0xff] %v4115_v41  ;;  %v1248_v7 = vpop.permute.xlu0 %1247 }
 0x1e9   : > { %v1295_v42 = vadd.f32 %v1248_v7, %v1196_v11  ;;  %1664 = vrot.lane.b32.xlu1 %v1623_v16, %s2834_s19  ;;  %v1625_v7 = vmul.f32 %v4035_v59, %v4121_v33  ;;  %v1626_v11 = vmul.f32 %v4035_v59, %v4123_v28  ;;  %v4141_v16 = vld [vmem:[#allocation2 + $0x82] sm:$0xff] }
 0x1ea   : > { %1666 = vrot.lane.b32.xlu0 %v1624_v58, %s2834_s19  ;;  %5365 = vst [vmem:[#allocation10_spill] sm:$0xff] %v4141_v16  ;;  %v1331_v58 = vmul.f32 %v4111_v19, %v3776_v0  ;;  %v1628_v0 = vmul.f32 %v4035_v59, %v4141_v16 }
 0x1eb   : > { %v4131_v8 = vadd.f32 %v1330_v23, %v1295_v42  ;;  %v1250_v32 = vpop.permute.xlu1 %1249  ;;  %v1200_v42 = vadd.f32 %v4027_v30, %v3902_v20  ;;  %v1334_v20 = vmul.f32 %v3944_v52, %v4111_v19  ;;  %v1202_v30 = vadd.f32 %v4041_v56, %v3921_v48 }
 0x1ec   : > { %v4133_v5 = vpop.permute.xlu0 %1251  ;;  %v1296_v41 = vadd.f32 %v1250_v32, %v1197_v44  ;;  %v1627_v44 = vmul.f32 %v4035_v59, %v4139_v10  ;;  %v1336_v48 = vmul.f32 %v3963_v53, %v4111_v19 }
 0x1ed   : > { %5362 = vst [vmem:[#allocation9_spill] sm:$0xff] %v4131_v8  ;;  %5363 = vst [vmem:[#allocation31_spill] sm:$0xff] %v4133_v5  ;;  %1668 = vrot.lane.b32.xlu1 %v1625_v7, %s2834_s19  ;;  %v4157_v8 = vstv %s1711_s29  ;;  %v4159_v5 = vld [vmem:[#allocation2 + $0x8a] sm:$0xf]  ;;  %s2459_s29 = sld [smem:[#allocation3 + %s2458_s26]] }
 0x1ee   : > { %1670 = vrot.lane.b32.xlu0 %v1626_v11, %s2834_s19  ;;  %v4151_v49 = vadd.f32 %v1331_v58, %v1296_v41  ;;  %5366 = vst [vmem:[#allocation19_spill] sm:$0xff] %v4159_v5  ;;  %v1629_v13 = vmul.f32 %v4035_v59, %v4159_v5  ;;  %v1713_v52 = vmul.f32 %v4157_v8, %v4033_v6 }
 0x1ef   : > { %v1254_v32 = vpop.permute.xlu1 %1253  ;;  %v1204_v59 = vadd.f32 %v4055_v21, %v3940_v50  ;;  %v1714_v34 = vmul.f32 %v4157_v8, %v4047_v36  ;;  %v1715_v53 = vmul.f32 %v4157_v8, %v4049_v18  ;;  %v1338_v50 = vmul.f32 %v3982_v39, %v4111_v19 }
 0x1f0   : > { %v1256_v23 = vpop.permute.xlu0 %1255  ;;  %v1298_v7 = vadd.f32 %v1254_v32, %v1199_v9  ;;  %v1206_v21 = vadd.f32 %v4070_v47, %v3959_v1  ;;  %v1716_v62 = vmul.f32 %v4157_v8, %v4061_v12  ;;  %v1717_v39 = vmul.f32 %v4157_v8, %v4063_v25 }
 0x1f1   : > { %v1299_v11 = vadd.f32 %v1256_v23, %v1200_v42  ;;  %1672 = vrot.lane.b32.xlu1 %v1627_v44, %s2834_s19  ;;  %v1340_v1 = vmul.f32 %v4003_v60, %v4111_v19  ;;  %v1208_v47 = vadd.f32 %v4084_v46, %v3978_v57  ;;  %v1718_v55 = vmul.f32 %v4157_v8, %v4076_v4 }
 0x1f2   : > { %1674 = vrot.lane.b32.xlu0 %v1628_v0, %s2834_s19  ;;  %v4171_v41 = vadd.f32 %v1333_v15, %v1298_v7  ;;  %v1719_v60 = vmul.f32 %v4157_v8, %v4078_v40  ;;  %v1342_v57 = vmul.f32 %v4019_v29, %v4111_v19  ;;  %v1210_v46 = vadd.f32 %v4098_v61, %v3997_v35  ;;  %v5368_v61 = vld [vmem:[#allocation32_spill] sm:$0xff] }
 0x1f3   : > { %v4173_v58 = vadd.f32 %v1334_v20, %v1299_v11  ;;  %v1258_v9 = vpop.permute.xlu1 %1257  ;;  %v1720_v29 = vmul.f32 %v4157_v8, %v4090_v54  ;;  %v1344_v35 = vmul.f32 %v4111_v19, %v3867_v2 }
 0x1f4   : > { %v1260_v42 = vpop.permute.xlu0 %1259  ;;  %v1300_v32 = vadd.f32 %v1258_v9, %v1201_v27 }
 0x1f5   : > { %v1301_v23 = vadd.f32 %v1260_v42, %v1202_v30  ;;  %1676 = vrot.lane.b32.xlu1 %v1629_v13, %s2834_s19 }
 0x1f6   : > { %1745 = vrot.lane.b32.xlu0 %v1713_v52, %s2835_s20  ;;  %v4189_v56 = vadd.f32 %v1335_v37, %v1300_v32 }
 0x1f7   : > { %v4191_v44 = vadd.f32 %v1336_v48, %v1301_v23  ;;  %v1262_v0 = vpop.permute.xlu1 %1261 }
 0x1f8   : > { %v1264_v7 = vpop.permute.xlu0 %1263  ;;  %v1302_v11 = vadd.f32 %v1262_v0, %v1203_v63 }
 0x1f9   : > { %v1303_v15 = vadd.f32 %v1264_v7, %v1204_v59  ;;  %1747 = vrot.lane.b32.xlu1 %v1714_v34, %s2835_s20  ;;  %v1721_v34 = vmul.f32 %v4157_v8, %v4092_v51 }
 0x1fa   : > { %1749 = vrot.lane.b32.xlu0 %v1715_v53, %s2835_s20  ;;  %v4207_v20 = vadd.f32 %v1337_v26, %v1302_v11 }
 0x1fb   : > { %v4209_v27 = vadd.f32 %v1338_v50, %v1303_v15  ;;  %v1266_v30 = vpop.permute.xlu1 %1265  ;;  %v1211_v15 = vadd.f32 %v5368_v61, %v5367_v14 }
 0x1fc   : > { %v1268_v9 = vpop.permute.xlu0 %1267  ;;  %v1304_v42 = vadd.f32 %v1266_v30, %v1205_v31  ;;  %v5370_v30 = vld [vmem:[#allocation30_spill] sm:$0xff] }
 0x1fd   : > { %v1305_v13 = vadd.f32 %v1268_v9, %v1206_v21  ;;  %1751 = vrot.lane.b32.xlu1 %v1716_v62, %s2835_s20  ;;  %v1722_v45 = vmul.f32 %v4157_v8, %v5370_v30  ;;  %v5371_v9 = vld [vmem:[#allocation8_spill] sm:$0xff] }
 0x1fe   : > { %1753 = vrot.lane.b32.xlu0 %v1717_v39, %s2835_s20  ;;  %v4225_v52 = vadd.f32 %v1339_v38, %v1304_v42  ;;  %v1723_v2 = vmul.f32 %v4157_v8, %v5371_v9  ;;  %v5372_v39 = vld [vmem:[#allocation6_spill] sm:$0xff] }
 0x1ff   : > { %v4227_v32 = vadd.f32 %v1340_v1, %v1305_v13  ;;  %v1270_v23 = vpop.permute.xlu1 %1269  ;;  %v1345_v42 = vmul.f32 %v4111_v19, %v5372_v39 }
 0x200   : > { %v1272_v37 = vpop.permute.xlu0 %1271  ;;  %v1306_v48 = vadd.f32 %v1270_v23, %v1207_v24  ;;  %v1724_v24 = vmul.f32 %v4157_v8, %v4121_v33 }
 0x201   : > { %v1307_v63 = vadd.f32 %v1272_v37, %v1208_v47  ;;  %1755 = vrot.lane.b32.xlu1 %v1718_v55, %s2835_s20  ;;  %v1725_v47 = vmul.f32 %v4157_v8, %v4123_v28  ;;  %v1726_v55 = vmul.f32 %v4157_v8, %v4139_v10 }
 0x202   : > { %1757 = vrot.lane.b32.xlu0 %v1719_v60, %s2835_s20  ;;  %v4243_v59 = vadd.f32 %v1341_v17, %v1306_v48  ;;  %v1727_v60 = vmul.f32 %v4157_v8, %v4141_v16  ;;  %v4294_v48 = vld [vmem:[#allocation2 + $0x20] sm:$0xff]  ;;  %v5382_v16 = vld [vmem:[#allocation7_spill] sm:$0xff] }
 0x203   : > { %v4245_v0 = vadd.f32 %v1342_v57, %v1307_v63  ;;  %v1274_v7 = vpop.permute.xlu1 %1273  ;;  %v4296_v63 = vstv %s1862_s3  ;;  %v1332_v10 = vmul.f32 %v5382_v16, %v4111_v19  ;;  %s5161_s3 = scalar_lea.vmem %s5236_s2, %s2692_s28 }
 0x204   : > { %v1276_v43 = vpop.permute.xlu0 %1275  ;;  %v1308_v53 = vadd.f32 %v1274_v7, %v1209_v22  ;;  %v1728_v22 = vmul.f32 %v4157_v8, %v4159_v5  ;;  %v4308_v7 = vld [vmem:[#allocation2 + $0x28] sm:$0xf] }
 0x205   : > { %v1309_v11 = vadd.f32 %v1276_v43, %v1210_v46  ;;  %1759 = vrot.lane.b32.xlu1 %v1720_v29, %s2835_s20  ;;  %v1864_v46 = vmul.f32 %v4296_v63, %v4294_v48  ;;  %v4310_v43 = vld [vmem:[#allocation2 + $0x30] sm:$0xff] }
 0x206   : > { %1761 = vrot.lane.b32.xlu0 %v1721_v34, %s2835_s20  ;;  %v4260_v26 = vadd.f32 %v1343_v3, %v1308_v53  ;;  %v1865_v53 = vmul.f32 %v4296_v63, %v4308_v7  ;;  %v1866_v8 = vmul.f32 %v4296_v63, %v4310_v43  ;;  %v4324_v3 = vld [vmem:[#allocation2 + $0x40] sm:$0xff] }
 0x207   : > { %v4262_v50 = vadd.f32 %v1344_v35, %v1309_v11  ;;  %v1278_v31 = vpop.permute.xlu1 %1277  ;;  %v4322_v11 = vld [vmem:[#allocation2 + $0x38] sm:$0xf] }
 0x208   : > { %v4264_v21 = vpop.permute.xlu0 %1397  ;;  %v1310_v62 = vadd.f32 %v1278_v31, %v1211_v15  ;;  %v1867_v61 = vmul.f32 %v4296_v63, %v4322_v11  ;;  %v1868_v15 = vmul.f32 %v4296_v63, %v4324_v3  ;;  %v4337_v31 = vld [vmem:[#allocation2 + $0x48] sm:$0xf] }
 0x209   : > { %5369 = vst [vmem:[#allocation20_spill] sm:$0xff] %v4262_v50  ;;  %1763 = vrot.lane.b32.xlu1 %v1722_v45, %s2835_s20  ;;  %v4339_v45 = vld [vmem:[#allocation2 + $0x50] sm:$0xff]  ;;  %v1869_v39 = vmul.f32 %v4296_v63, %v4337_v31  ;;  %v4391_v50 = vld [vmem:[#allocation2 + $0x80] sm:$0xff] }
 0x20a   : > { %1765 = vrot.lane.b32.xlu0 %v1723_v2, %s2835_s20  ;;  %v4274_v13 = vadd.f32 %v1345_v42, %v1310_v62  ;;  %v1870_v42 = vmul.f32 %v4296_v63, %v4339_v45 }
 0x20b   : > { %v4276_v38 = vpop.permute.xlu1 %1399 }
 0x20c   : > { %5373 = vst [vmem:[#allocation33_spill] sm:$0xff] %v4274_v13  ;;  %v4278_v1 = vpop.permute.xlu0 %1401  ;;  %v4368_v13 = vld [vmem:[#allocation2 + $0x68] sm:$0xf]  ;;  %v1446_v16 = vadd.f32 %v4276_v38, %v4151_v49 }
 0x20d   : > { %1767 = vrot.lane.b32.xlu1 %v1724_v24, %s2835_s20  ;;  %v4351_v24 = vld [vmem:[#allocation2 + $0x58] sm:$0xf] }
 0x20e   : > { %1769 = vrot.lane.b32.xlu0 %v1725_v47, %s2835_s20  ;;  %5374 = vst [vmem:[#allocation11_spill] sm:$0xff] %v4351_v24  ;;  %v4353_v47 = vld [vmem:[#allocation2 + $0x60] sm:$0xff] }
 0x20f   : > { %v4286_v23 = vpop.permute.xlu1 %1403  ;;  %5375 = vst [vmem:[#allocation21_spill] sm:$0xff] %v4353_v47 }
 0x210   : > { %v4288_v37 = vpop.permute.xlu0 %1405 }
 0x211   : > { %1771 = vrot.lane.b32.xlu1 %v1726_v55, %s2835_s20  ;;  %v5376_v55 = vld [vmem:[#allocation17_spill] sm:$0xff] }
 0x212   : > { %1773 = vrot.lane.b32.xlu0 %v1727_v60, %s2835_s20  ;;  %v5377_v60 = vld [vmem:[#allocation29_spill] sm:$0xff] }
 0x213   : > { %v4300_v17 = vpop.permute.xlu1 %1407 }
 0x214   : > { %v4302_v57 = vpop.permute.xlu0 %1409 }
 0x215   : > { %1775 = vrot.lane.b32.xlu1 %v1728_v22, %s2835_s20  ;;  %v1198_v22 = vadd.f32 %v5377_v60, %v5376_v55  ;;  %v5381_v55 = vld [vmem:[#allocation9_spill] sm:$0xff] }
 0x216   : > { %1896 = vrot.lane.b32.xlu0 %v1864_v46, %s2834_s19  ;;  %v1445_v60 = vadd.f32 %v4264_v21, %v5381_v55  ;;  %v4400_v55 = vld [vmem:[#allocation2 + $0x90] sm:$0xff] }
 0x217   : > { %v4314_v29 = vpop.permute.xlu1 %1411  ;;  %5383 = vst [vmem:[#allocation13_spill] sm:$0xff] %v4400_v55 }
 0x218   : > { %v4316_v34 = vpop.permute.xlu0 %1413 }
 0x219   : > { %1898 = vrot.lane.b32.xlu1 %v1865_v53, %s2834_s19 }
 0x21a   : > { %1900 = vrot.lane.b32.xlu0 %v1866_v8, %s2834_s19  ;;  %v1871_v8 = vmul.f32 %v4296_v63, %v4351_v24 }
 0x21b   : > { %v4329_v35 = vpop.permute.xlu1 %1415 }
 0x21c   : > { %v4331_v14 = vpop.permute.xlu0 %1417 }
 0x21d   : > { %1902 = vrot.lane.b32.xlu1 %v1867_v61, %s2834_s19  ;;  %v1872_v61 = vmul.f32 %v4296_v63, %v4353_v47 }
 0x21e   : > { %1904 = vrot.lane.b32.xlu0 %v1868_v15, %s2834_s19  ;;  %v5379_v15 = vld [vmem:[#allocation31_spill] sm:$0xff] }
 0x21f   : > { %v4343_v2 = vpop.permute.xlu1 %1419  ;;  %v1297_v5 = vadd.f32 %v5379_v15, %v1198_v22  ;;  %v1873_v15 = vmul.f32 %v4296_v63, %v4368_v13 }
 0x220   : > { %v4345_v62 = vpop.permute.xlu0 %1421 }
 0x221   : > { %1906 = vrot.lane.b32.xlu1 %v1869_v39, %s2834_s19  ;;  %v4370_v39 = vld [vmem:[#allocation2 + $0x70] sm:$0xff] }
 0x222   : > { %1908 = vrot.lane.b32.xlu0 %v1870_v42, %s2834_s19  ;;  %5380 = vst [vmem:[#allocation22_spill] sm:$0xff] %v4370_v39  ;;  %v4375_v42 = vstv %s1561_s6  ;;  %v1874_v24 = vmul.f32 %v4296_v63, %v4370_v39  ;;  %v4408_v39 = vld [vmem:[#allocation2 + $0x88] sm:$0xf] }
 0x223   : > { %v4359_v46 = vpop.permute.xlu1 %1423  ;;  %v1579_v19 = vmul.f32 %v4375_v42, %v4033_v6  ;;  %v1876_v6 = vmul.f32 %v4296_v63, %v4391_v50  ;;  %5384 = vst [vmem:[#allocation24_spill] sm:$0xff] %v4408_v39  ;;  %v1580_v49 = vmul.f32 %v4375_v42, %v4047_v36  ;;  %v1581_v38 = vmul.f32 %v4375_v42, %v4049_v18 }
 0x224   : > { %v4361_v53 = vpop.permute.xlu0 %1425 }
 0x225   : > { %5378 = vst [vmem:[#allocation12_spill] sm:$0xff] %v4361_v53  ;;  %1910 = vrot.lane.b32.xlu1 %v1871_v8, %s2834_s19  ;;  %v1348_v8 = vadd.f32 %v1332_v10, %v1297_v5  ;;  %v4389_v53 = vld [vmem:[#allocation2 + $0x78] sm:$0xf] }
 0x226   : > { %1912 = vrot.lane.b32.xlu0 %v1872_v61, %s2834_s19 }
 0x227   : > { %v4381_v47 = vpop.permute.xlu1 %1427  ;;  %v1447_v21 = vadd.f32 %v4278_v1, %v1348_v8  ;;  %v1878_v1 = vmul.f32 %v4296_v63, %v4400_v55  ;;  %v1448_v8 = vadd.f32 %v4286_v23, %v4171_v41  ;;  %v1582_v41 = vmul.f32 %v4375_v42, %v4061_v12 }
 0x228   : > { %v1497_v22 = vpop.permute.xlu0 %1496 }
 0x229   : > { %v1544_v61 = vadd.f32 %v1497_v22, %v1445_v60  ;;  %1914 = vrot.lane.b32.xlu1 %v1873_v15, %s2834_s19  ;;  %v1875_v22 = vmul.f32 %v4296_v63, %v4389_v53 }
 0x22a   : > { %1916 = vrot.lane.b32.xlu0 %v1874_v24, %s2834_s19 }
 0x22b   : > { %v4402_v5 = vadd.f32 %v1579_v19, %v1544_v61  ;;  %v1499_v10 = vpop.permute.xlu1 %1498  ;;  %v1449_v61 = vadd.f32 %v4288_v37, %v4173_v58  ;;  %v4422_v19 = vld [vmem:[#allocation2 + $0x98] sm:$0xf]  ;;  %v1583_v58 = vmul.f32 %v4375_v42, %v4063_v25  ;;  %v1450_v37 = vadd.f32 %v4300_v17, %v4189_v56 }
 0x22c   : > { %v1501_v60 = vpop.permute.xlu0 %1500  ;;  %v1545_v15 = vadd.f32 %v1499_v10, %v1446_v16  ;;  %5385 = vst [vmem:[#allocation25_spill] sm:$0xff] %v4422_v19  ;;  %v1877_v10 = vmul.f32 %v4296_v63, %v4408_v39  ;;  %v1879_v23 = vmul.f32 %v4296_v63, %v4422_v19  ;;  %v1584_v63 = vmul.f32 %v4375_v42, %v4076_v4 }
 0x22d   : > { %v1546_v24 = vadd.f32 %v1501_v60, %v1447_v21  ;;  %1918 = vrot.lane.b32.xlu1 %v1875_v22, %s2834_s19  ;;  %v4431_v60 = vstv %s4387_s8  ;;  %v1585_v56 = vmul.f32 %v4375_v42, %v4078_v40  ;;  %v1453_v17 = vadd.f32 %v4316_v34, %v4209_v27 }
 0x22e   : > { %1920 = vrot.lane.b32.xlu0 %v1876_v6, %s2834_s19  ;;  %v4424_v16 = vadd.f32 %v1580_v49, %v1545_v15  ;;  %v1451_v15 = vadd.f32 %v4302_v57, %v4191_v44  ;;  %v1963_v25 = vmul.f32 %v4431_v60, %v4294_v48  ;;  %v1452_v44 = vadd.f32 %v4314_v29, %v4207_v20 }
 0x22f   : > { %v4426_v36 = vadd.f32 %v1581_v38, %v1546_v24  ;;  %v1503_v18 = vpop.permute.xlu1 %1502  ;;  %v1964_v4 = vmul.f32 %v4431_v60, %v4308_v7  ;;  %v1965_v40 = vmul.f32 %v4431_v60, %v4310_v43  ;;  %v1586_v20 = vmul.f32 %v4375_v42, %v4090_v54 }
 0x230   : > { %v1505_v21 = vpop.permute.xlu0 %1504  ;;  %v1547_v22 = vadd.f32 %v1503_v18, %v1448_v8  ;;  %v1587_v27 = vmul.f32 %v4375_v42, %v4092_v51  ;;  %v1454_v29 = vadd.f32 %v4329_v35, %v4225_v52  ;;  %v1455_v34 = vadd.f32 %v4331_v14, %v4227_v32 }
 0x231   : > { %v1548_v6 = vadd.f32 %v1505_v21, %v1449_v61  ;;  %1922 = vrot.lane.b32.xlu1 %v1877_v10, %s2834_s19  ;;  %v1966_v54 = vmul.f32 %v4431_v60, %v4322_v11  ;;  %v1967_v51 = vmul.f32 %v4431_v60, %v4324_v3  ;;  %v1588_v52 = vmul.f32 %v4375_v42, %v5370_v30 }
 0x232   : > { %1924 = vrot.lane.b32.xlu0 %v1878_v1, %s2834_s19  ;;  %v4445_v24 = vadd.f32 %v1582_v41, %v1547_v22  ;;  %v1589_v32 = vmul.f32 %v4375_v42, %v5371_v9  ;;  %v1456_v35 = vadd.f32 %v4343_v2, %v4243_v59  ;;  %v1457_v14 = vadd.f32 %v4345_v62, %v4245_v0  ;;  %v5386_v62 = vld [vmem:[#allocation20_spill] sm:$0xff] }
 0x233   : > { %v4447_v49 = vadd.f32 %v1583_v58, %v1548_v6  ;;  %v1507_v12 = vpop.permute.xlu1 %1506  ;;  %v1968_v30 = vmul.f32 %v4431_v60, %v4337_v31  ;;  %v1969_v9 = vmul.f32 %v4431_v60, %v4339_v45  ;;  %v1590_v59 = vmul.f32 %v4375_v42, %v4121_v33 }
 0x234   : > { %v1509_v38 = vpop.permute.xlu0 %1508  ;;  %v1549_v8 = vadd.f32 %v1507_v12, %v1450_v37  ;;  %v1591_v0 = vmul.f32 %v4375_v42, %v4123_v28  ;;  %v1458_v2 = vadd.f32 %v4359_v46, %v4260_v26  ;;  %v5391_v46 = vld [vmem:[#allocation10_spill] sm:$0xff] }
 0x235   : > { %v1550_v1 = vadd.f32 %v1509_v38, %v1451_v15  ;;  %1926 = vrot.lane.b32.xlu1 %v1879_v23, %s2834_s19 }
 0x236   : > { %1995 = vrot.lane.b32.xlu0 %v1963_v25, %s2835_s20  ;;  %v4461_v57 = vadd.f32 %v1584_v63, %v1549_v8 }
 0x237   : > { %v4463_v61 = vadd.f32 %v1585_v56, %v1550_v1  ;;  %v1511_v18 = vpop.permute.xlu1 %1510  ;;  %v5387_v56 = vld [vmem:[#allocation12_spill] sm:$0xff] }
 0x238   : > { %v1513_v21 = vpop.permute.xlu0 %1512  ;;  %v1551_v10 = vadd.f32 %v1511_v18, %v1452_v44  ;;  %v1459_v44 = vadd.f32 %v5387_v56, %v5386_v62  ;;  %v4568_v62 = vstv %s2111_s10  ;;  %v1978_v56 = vmul.f32 %v4431_v60, %v4422_v19 }
 0x239   : > { %v1552_v22 = vadd.f32 %v1513_v21, %v1453_v17  ;;  %1997 = vrot.lane.b32.xlu1 %v1964_v4, %s2835_s20  ;;  %v5388_v4 = vld [vmem:[#allocation11_spill] sm:$0xff] }
 0x23a   : > { %1999 = vrot.lane.b32.xlu0 %v1965_v40, %s2835_s20  ;;  %v4479_v6 = vadd.f32 %v1586_v20, %v1551_v10  ;;  %v1970_v28 = vmul.f32 %v4431_v60, %v5388_v4  ;;  %v5389_v40 = vld [vmem:[#allocation21_spill] sm:$0xff] }
 0x23b   : > { %v4481_v41 = vadd.f32 %v1587_v27, %v1552_v22  ;;  %v1515_v58 = vpop.permute.xlu1 %1514  ;;  %v1971_v10 = vmul.f32 %v4431_v60, %v5389_v40  ;;  %v5390_v27 = vld [vmem:[#allocation18_spill] sm:$0xff] }
 0x23c   : > { %v1517_v23 = vpop.permute.xlu0 %1516  ;;  %v1553_v37 = vadd.f32 %v1515_v58, %v1454_v29  ;;  %v1592_v26 = vmul.f32 %v4375_v42, %v5390_v27  ;;  %v1593_v29 = vmul.f32 %v4375_v42, %v5391_v46  ;;  %v4596_v46 = vld [vmem:[#allocation2 + $0x41] sm:$0xff] }
 0x23d   : > { %v1554_v15 = vadd.f32 %v1517_v23, %v1455_v34  ;;  %2001 = vrot.lane.b32.xlu1 %v1966_v54, %s2835_s20  ;;  %v5392_v34 = vld [vmem:[#allocation33_spill] sm:$0xff] }
 0x23e   : > { %2003 = vrot.lane.b32.xlu0 %v1967_v51, %s2835_s20  ;;  %v4497_v12 = vadd.f32 %v1588_v52, %v1553_v37  ;;  %v1460_v58 = vadd.f32 %v4381_v47, %v5392_v34  ;;  %v5393_v52 = vld [vmem:[#allocation22_spill] sm:$0xff] }
 0x23f   : > { %v4499_v38 = vadd.f32 %v1589_v32, %v1554_v15  ;;  %v1519_v25 = vpop.permute.xlu1 %1518  ;;  %v1972_v15 = vmul.f32 %v4431_v60, %v4368_v13  ;;  %v1973_v32 = vmul.f32 %v4431_v60, %v5393_v52 }
 0x240   : > { %v1521_v8 = vpop.permute.xlu0 %1520  ;;  %v1555_v1 = vadd.f32 %v1519_v25, %v1456_v35 }
 0x241   : > { %v1556_v63 = vadd.f32 %v1521_v8, %v1457_v14  ;;  %2005 = vrot.lane.b32.xlu1 %v1968_v30, %s2835_s20  ;;  %v5394_v14 = vld [vmem:[#allocation19_spill] sm:$0xff] }
 0x242   : > { %2007 = vrot.lane.b32.xlu0 %v1969_v9, %s2835_s20  ;;  %v4515_v17 = vadd.f32 %v1590_v59, %v1555_v1  ;;  %v1594_v25 = vmul.f32 %v4375_v42, %v5394_v14  ;;  %v1974_v9 = vmul.f32 %v4431_v60, %v4389_v53  ;;  %v1975_v1 = vmul.f32 %v4431_v60, %v4391_v50 }
 0x243   : > { %v4517_v18 = vadd.f32 %v1591_v0, %v1556_v63  ;;  %v1523_v21 = vpop.permute.xlu1 %1522  ;;  %v1977_v42 = vmul.f32 %v4431_v60, %v4400_v55  ;;  %v1976_v0 = vmul.f32 %v4431_v60, %v4408_v39 }
 0x244   : > { %v1525_v33 = vpop.permute.xlu0 %1524  ;;  %v1557_v22 = vadd.f32 %v1523_v21, %v1458_v2  ;;  %v4566_v2 = vld [vmem:[#allocation2 + $0x21] sm:$0xff] }
 0x245   : > { %v1558_v20 = vadd.f32 %v1525_v33, %v1459_v44  ;;  %2009 = vrot.lane.b32.xlu1 %v1970_v28, %s2835_s20  ;;  %v2113_v33 = vmul.f32 %v4568_v62, %v4566_v2  ;;  %v4580_v28 = vld [vmem:[#allocation2 + $0x29] sm:$0xf] }
 0x246   : > { %2011 = vrot.lane.b32.xlu0 %v1971_v10, %s2835_s20  ;;  %v4532_v23 = vadd.f32 %v1592_v26, %v1557_v22  ;;  %v4582_v10 = vld [vmem:[#allocation2 + $0x31] sm:$0xff]  ;;  %v2114_v60 = vmul.f32 %v4568_v62, %v4580_v28  ;;  %v4594_v26 = vld [vmem:[#allocation2 + $0x39] sm:$0xf] }
 0x247   : > { %v4534_v54 = vadd.f32 %v1593_v29, %v1558_v20  ;;  %v1527_v51 = vpop.permute.xlu1 %1526  ;;  %v2115_v27 = vmul.f32 %v4568_v62, %v4582_v10 }
 0x248   : > { %v4536_v37 = vpop.permute.xlu0 %1646  ;;  %v1559_v35 = vadd.f32 %v1527_v51, %v1460_v58  ;;  %v2116_v58 = vmul.f32 %v4568_v62, %v4594_v26  ;;  %v2117_v51 = vmul.f32 %v4568_v62, %v4596_v46 }
 0x249   : > { %2013 = vrot.lane.b32.xlu1 %v1972_v15, %s2835_s20  ;;  %v4609_v15 = vld [vmem:[#allocation2 + $0x49] sm:$0xf] }
 0x24a   : > { %2015 = vrot.lane.b32.xlu0 %v1973_v32, %s2835_s20  ;;  %v4546_v47 = vadd.f32 %v1594_v25, %v1559_v35  ;;  %v4611_v32 = vld [vmem:[#allocation2 + $0x51] sm:$0xff]  ;;  %v2118_v25 = vmul.f32 %v4568_v62, %v4609_v15 }
 0x24b   : > { %v4548_v8 = vpop.permute.xlu1 %1648 }
 0x24c   : > { %5395 = vst [vmem:[#allocation23_spill] sm:$0xff] %v4546_v47  ;;  %v4550_v30 = vpop.permute.xlu0 %1650 }
 0x24d   : > { %2017 = vrot.lane.b32.xlu1 %v1974_v9, %s2835_s20  ;;  %v2119_v9 = vmul.f32 %v4568_v62, %v4611_v32 }
 0x24e   : > { %2019 = vrot.lane.b32.xlu0 %v1975_v1, %s2835_s20  ;;  %v4623_v1 = vld [vmem:[#allocation2 + $0x59] sm:$0xf] }
 0x24f   : > { %v4560_v63 = vpop.permute.xlu1 %1652  ;;  %5396 = vst [vmem:[#allocation14_spill] sm:$0xff] %v4623_v1 }
 0x250   : > { %v4562_v59 = vpop.permute.xlu0 %1654 }
 0x251   : > { %2021 = vrot.lane.b32.xlu1 %v1976_v0, %s2835_s20 }
 0x252   : > { %2023 = vrot.lane.b32.xlu0 %v1977_v42, %s2835_s20  ;;  %v4625_v42 = vld [vmem:[#allocation2 + $0x61] sm:$0xff] }
 0x253   : > { %v4574_v44 = vpop.permute.xlu1 %1656  ;;  %5397 = vst [vmem:[#allocation27_spill] sm:$0xff] %v4625_v42 }
 0x254   : > { %v4576_v21 = vpop.permute.xlu0 %1658 }
 0x255   : > { %2025 = vrot.lane.b32.xlu1 %v1978_v56, %s2835_s20 }
 0x256   : > { %2145 = vrot.lane.b32.xlu0 %v2113_v33, %s2834_s19  ;;  %v2120_v33 = vmul.f32 %v4568_v62, %v4623_v1  ;;  %v4676_v1 = vld [vmem:[#allocation2 + $0x89] sm:$0xf] }
 0x257   : > { %v4586_v22 = vpop.permute.xlu1 %1660 }
 0x258   : > { %v4588_v20 = vpop.permute.xlu0 %1662 }
 0x259   : > { %2147 = vrot.lane.b32.xlu1 %v2114_v60, %s2834_s19  ;;  %v2121_v60 = vmul.f32 %v4568_v62, %v4625_v42 }
 0x25a   : > { %2149 = vrot.lane.b32.xlu0 %v2115_v27, %s2834_s19  ;;  %v4637_v27 = vld [vmem:[#allocation2 + $0x69] sm:$0xf] }
 0x25b   : > { %v4601_v29 = vpop.permute.xlu1 %1664  ;;  %5398 = vst [vmem:[#allocation26_spill] sm:$0xff] %v4637_v27  ;;  %v2122_v55 = vmul.f32 %v4568_v62, %v4637_v27 }
 0x25c   : > { %v4603_v34 = vpop.permute.xlu0 %1666 }
 0x25d   : > { %2151 = vrot.lane.b32.xlu1 %v2116_v58, %s2834_s19  ;;  %v4639_v58 = vld [vmem:[#allocation2 + $0x71] sm:$0xff] }
 0x25e   : > { %2153 = vrot.lane.b32.xlu0 %v2117_v51, %s2834_s19  ;;  %5399 = vst [vmem:[#allocation15_spill] sm:$0xff] %v4639_v58  ;;  %v4644_v51 = vstv %s1810_s17  ;;  %v2123_v47 = vmul.f32 %v4568_v62, %v4639_v58  ;;  %v4668_v58 = vld [vmem:[#allocation2 + $0x91] sm:$0xff] }
 0x25f   : > { %v4615_v35 = vpop.permute.xlu1 %1668  ;;  %v1829_v42 = vmul.f32 %v4644_v51, %v4294_v48 }
 0x260   : > { %v4617_v14 = vpop.permute.xlu0 %1670 }
 0x261   : > { %2155 = vrot.lane.b32.xlu1 %v2118_v25, %s2834_s19  ;;  %v1694_v25 = vadd.f32 %v4536_v37, %v4402_v5  ;;  %v1695_v5 = vadd.f32 %v4548_v8, %v4424_v16  ;;  %v1696_v37 = vadd.f32 %v4550_v30, %v4426_v36  ;;  %v1830_v16 = vmul.f32 %v4644_v51, %v4308_v7 }
 0x262   : > { %2157 = vrot.lane.b32.xlu0 %v2119_v9, %s2834_s19  ;;  %v2127_v36 = vmul.f32 %v4568_v62, %v4668_v58  ;;  %v1697_v8 = vadd.f32 %v4560_v63, %v4445_v24  ;;  %v1698_v30 = vadd.f32 %v4562_v59, %v4447_v49  ;;  %v1832_v24 = vmul.f32 %v4644_v51, %v4322_v11 }
 0x263   : > { %v4629_v0 = vpop.permute.xlu1 %1672  ;;  %v1833_v49 = vmul.f32 %v4644_v51, %v4324_v3  ;;  %v1699_v59 = vadd.f32 %v4574_v44, %v4461_v57  ;;  %v1835_v57 = vmul.f32 %v4644_v51, %v4339_v45  ;;  %v1702_v44 = vadd.f32 %v4588_v20, %v4481_v41 }
 0x264   : > { %v4631_v56 = vpop.permute.xlu0 %1674  ;;  %v1837_v41 = vmul.f32 %v4644_v51, %v5389_v40  ;;  %v1704_v20 = vadd.f32 %v4603_v34, %v4499_v38  ;;  %v1839_v38 = vmul.f32 %v4644_v51, %v5393_v52  ;;  %v1706_v34 = vadd.f32 %v4617_v14, %v4517_v18 }
 0x265   : > { %2159 = vrot.lane.b32.xlu1 %v2120_v33, %s2834_s19  ;;  %v4656_v33 = vld [vmem:[#allocation2 + $0x79] sm:$0xf]  ;;  %v1841_v18 = vmul.f32 %v4644_v51, %v4391_v50  ;;  %v1708_v14 = vadd.f32 %v4631_v56, %v4534_v54  ;;  %v5404_v54 = vld [vmem:[#allocation23_spill] sm:$0xff] }
 0x266   : > { %2161 = vrot.lane.b32.xlu0 %v2121_v60, %s2834_s19  ;;  %v4658_v60 = vld [vmem:[#allocation2 + $0x81] sm:$0xff] }
 0x267   : > { %v4648_v9 = vpop.permute.xlu1 %1676  ;;  %v2125_v48 = vmul.f32 %v4568_v62, %v4658_v60 }
 0x268   : > { %5400 = vst [vmem:[#allocation16_spill] sm:$0xff] %v4648_v9  ;;  %v1746_v19 = vpop.permute.xlu0 %1745  ;;  %v2124_v9 = vmul.f32 %v4568_v62, %v4656_v33 }
 0x269   : > { %v1793_v39 = vadd.f32 %v1746_v19, %v1694_v25  ;;  %2163 = vrot.lane.b32.xlu1 %v2122_v55, %s2834_s19 }
 0x26a   : > { %2165 = vrot.lane.b32.xlu0 %v2123_v47, %s2834_s19 }
 0x26b   : > { %v4670_v19 = vadd.f32 %v1829_v42, %v1793_v39  ;;  %v1748_v25 = vpop.permute.xlu1 %1747  ;;  %v1831_v39 = vmul.f32 %v4644_v51, %v4310_v43  ;;  %v4690_v42 = vld [vmem:[#allocation2 + $0x99] sm:$0xf] }
 0x26c   : > { %v1750_v27 = vpop.permute.xlu0 %1749  ;;  %v1794_v55 = vadd.f32 %v1748_v25, %v1695_v5  ;;  %v2128_v63 = vmul.f32 %v4568_v62, %v4690_v42 }
 0x26d   : > { %v1795_v47 = vadd.f32 %v1750_v27, %v1696_v37  ;;  %2167 = vrot.lane.b32.xlu1 %v2124_v9, %s2834_s19  ;;  %v2126_v9 = vmul.f32 %v4568_v62, %v4676_v1  ;;  %v4699_v37 = vstv %s4654_s21  ;;  %v1834_v62 = vmul.f32 %v4644_v51, %v4337_v31 }
 0x26e   : > { %2169 = vrot.lane.b32.xlu0 %v2125_v48, %s2834_s19  ;;  %v4692_v27 = vadd.f32 %v1830_v16, %v1794_v55  ;;  %v1700_v55 = vadd.f32 %v4576_v21, %v4463_v61  ;;  %v2212_v3 = vmul.f32 %v4699_v37, %v4566_v2  ;;  %v1701_v61 = vadd.f32 %v4586_v22, %v4479_v6 }
 0x26f   : > { %v4694_v7 = vadd.f32 %v1831_v39, %v1795_v47  ;;  %v1752_v43 = vpop.permute.xlu1 %1751  ;;  %v2213_v31 = vmul.f32 %v4699_v37, %v4580_v28  ;;  %v2214_v45 = vmul.f32 %v4699_v37, %v4582_v10  ;;  %v1836_v6 = vmul.f32 %v4644_v51, %v5388_v4 }
 0x270   : > { %v1754_v5 = vpop.permute.xlu0 %1753  ;;  %v1796_v25 = vadd.f32 %v1752_v43, %v1697_v8  ;;  %v1703_v22 = vadd.f32 %v4601_v29, %v4497_v12  ;;  %v2215_v4 = vmul.f32 %v4699_v37, %v4594_v26  ;;  %v2216_v40 = vmul.f32 %v4699_v37, %v4596_v46 }
 0x271   : > { %v1797_v48 = vadd.f32 %v1754_v5, %v1698_v30  ;;  %2171 = vrot.lane.b32.xlu1 %v2126_v9, %s2834_s19  ;;  %v1838_v12 = vmul.f32 %v4644_v51, %v4368_v13  ;;  %v1705_v29 = vadd.f32 %v4615_v35, %v4515_v17  ;;  %v2217_v13 = vmul.f32 %v4699_v37, %v4609_v15 }
 0x272   : > { %2173 = vrot.lane.b32.xlu0 %v2127_v36, %s2834_s19  ;;  %v4713_v47 = vadd.f32 %v1832_v24, %v1796_v25  ;;  %v2218_v52 = vmul.f32 %v4699_v37, %v4611_v32  ;;  %v1840_v17 = vmul.f32 %v4644_v51, %v4389_v53  ;;  %v1707_v35 = vadd.f32 %v4629_v0, %v4532_v23  ;;  %v5405_v0 = vld [vmem:[#allocation16_spill] sm:$0xff] }
 0x273   : > { %v4715_v16 = vadd.f32 %v1833_v49, %v1797_v48  ;;  %v1756_v11 = vpop.permute.xlu1 %1755  ;;  %v1709_v56 = vadd.f32 %v5405_v0, %v5404_v54 }
 0x274   : > { %v1758_v39 = vpop.permute.xlu0 %1757  ;;  %v1798_v8 = vadd.f32 %v1756_v11, %v1699_v59 }
 0x275   : > { %v1799_v36 = vadd.f32 %v1758_v39, %v1700_v55  ;;  %2175 = vrot.lane.b32.xlu1 %v2128_v63, %s2834_s19 }
 0x276   : > { %2244 = vrot.lane.b32.xlu0 %v2212_v3, %s2835_s20  ;;  %v4729_v21 = vadd.f32 %v1834_v62, %v1798_v8 }
 0x277   : > { %v4731_v30 = vadd.f32 %v1835_v57, %v1799_v36  ;;  %v1760_v43 = vpop.permute.xlu1 %1759 }
 0x278   : > { %v1762_v5 = vpop.permute.xlu0 %1761  ;;  %v1800_v9 = vadd.f32 %v1760_v43, %v1701_v61  ;;  %v5401_v43 = vld [vmem:[#allocation14_spill] sm:$0xff] }
 0x279   : > { %v1801_v25 = vadd.f32 %v1762_v5, %v1702_v44  ;;  %2246 = vrot.lane.b32.xlu1 %v2213_v31, %s2835_s20  ;;  %v2219_v50 = vmul.f32 %v4699_v37, %v5401_v43  ;;  %v5402_v5 = vld [vmem:[#allocation27_spill] sm:$0xff] }
 0x27a   : > { %2248 = vrot.lane.b32.xlu0 %v2214_v45, %s2835_s20  ;;  %v4747_v48 = vadd.f32 %v1836_v6, %v1800_v9  ;;  %v2220_v31 = vmul.f32 %v4699_v37, %v5402_v5 }
 0x27b   : > { %v4749_v24 = vadd.f32 %v1837_v41, %v1801_v25  ;;  %v1764_v49 = vpop.permute.xlu1 %1763  ;;  %v5403_v25 = vld [vmem:[#allocation24_spill] sm:$0xff] }
 0x27c   : > { %v1766_v63 = vpop.permute.xlu0 %1765  ;;  %v1802_v59 = vadd.f32 %v1764_v49, %v1703_v22  ;;  %v1842_v23 = vmul.f32 %v4644_v51, %v5403_v25  ;;  %v4867_v25 = vld [vmem:[#allocation2 + $0x3a] sm:$0xf] }
 0x27d   : > { %v1803_v55 = vadd.f32 %v1766_v63, %v1704_v20  ;;  %2250 = vrot.lane.b32.xlu1 %v2215_v4, %s2835_s20  ;;  %v5406_v20 = vld [vmem:[#allocation26_spill] sm:$0xff]  ;;  %v5407_v63 = vld [vmem:[#allocation15_spill] sm:$0xff] }
 0x27e   : > { %2252 = vrot.lane.b32.xlu0 %v2216_v40, %s2835_s20  ;;  %v4765_v11 = vadd.f32 %v1838_v12, %v1802_v59  ;;  %v2221_v49 = vmul.f32 %v4699_v37, %v5406_v20  ;;  %v2222_v4 = vmul.f32 %v4699_v37, %v5407_v63 }
 0x27f   : > { %v4767_v39 = vadd.f32 %v1839_v38, %v1803_v55  ;;  %v1768_v3 = vpop.permute.xlu1 %1767  ;;  %v2223_v38 = vmul.f32 %v4699_v37, %v4656_v33 }
 0x280   : > { %v1770_v8 = vpop.permute.xlu0 %1769  ;;  %v1804_v36 = vadd.f32 %v1768_v3, %v1705_v29  ;;  %v2224_v29 = vmul.f32 %v4699_v37, %v4658_v60 }
 0x281   : > { %v1805_v62 = vadd.f32 %v1770_v8, %v1706_v34  ;;  %2254 = vrot.lane.b32.xlu1 %v2217_v13, %s2835_s20 }
 0x282   : > { %2256 = vrot.lane.b32.xlu0 %v2218_v52, %s2835_s20  ;;  %v4783_v57 = vadd.f32 %v1840_v17, %v1804_v36  ;;  %v2225_v52 = vmul.f32 %v4699_v37, %v4676_v1  ;;  %v2227_v17 = vmul.f32 %v4699_v37, %v4690_v42 }
 0x283   : > { %v4785_v61 = vadd.f32 %v1841_v18, %v1805_v62  ;;  %v1772_v44 = vpop.permute.xlu1 %1771  ;;  %v4837_v62 = vstv %s2360_s23 }
 0x284   : > { %v1774_v53 = vpop.permute.xlu0 %1773  ;;  %v1806_v45 = vadd.f32 %v1772_v44, %v1707_v35  ;;  %v4851_v44 = vld [vmem:[#allocation2 + $0x2a] sm:$0xf] }
 0x285   : > { %v4791_v9 = vadd.f32 %v1774_v53, %v1708_v14  ;;  %2258 = vrot.lane.b32.xlu1 %v2219_v50, %s2835_s20  ;;  %v4853_v53 = vld [vmem:[#allocation2 + $0x32] sm:$0xff] }
 0x286   : > { %2260 = vrot.lane.b32.xlu0 %v2220_v31, %s2835_s20  ;;  %v4800_v6 = vadd.f32 %v1842_v23, %v1806_v45  ;;  %v2363_v31 = vmul.f32 %v4837_v62, %v4851_v44  ;;  %v4869_v23 = vld [vmem:[#allocation2 + $0x42] sm:$0xff] }
 0x287   : > { %v1776_v41 = vpop.permute.xlu1 %1775 }
 0x288   : > { %v1897_v22 = vpop.permute.xlu0 %1896  ;;  %v4806_v40 = vadd.f32 %v1776_v41, %v1709_v56  ;;  %v2365_v56 = vmul.f32 %v4837_v62, %v4867_v25 }
 0x289   : > { %v4809_v59 = vadd.f32 %v1897_v22, %v4670_v19  ;;  %2262 = vrot.lane.b32.xlu1 %v2221_v49, %s2835_s20  ;;  %v2226_v19 = vmul.f32 %v4699_v37, %v4668_v58  ;;  %v4884_v22 = vld [vmem:[#allocation2 + $0x4a] sm:$0xf]  ;;  %v4886_v49 = vld [vmem:[#allocation2 + $0x52] sm:$0xff] }
 0x28a   : > { %2264 = vrot.lane.b32.xlu0 %v2222_v4, %s2835_s20  ;;  %v5408_v4 = vld [vmem:[#allocation13_spill] sm:$0xff] }
 0x28b   : > { %v1899_v55 = vpop.permute.xlu1 %1898 }
 0x28c   : > { %v1901_v12 = vpop.permute.xlu0 %1900  ;;  %v4818_v34 = vadd.f32 %v1899_v55, %v4692_v27  ;;  %v1843_v55 = vmul.f32 %v4644_v51, %v5408_v4 }
 0x28d   : > { %v4821_v3 = vadd.f32 %v1901_v12, %v4694_v7  ;;  %2266 = vrot.lane.b32.xlu1 %v2223_v38, %s2835_s20  ;;  %v4835_v7 = vld [vmem:[#allocation2 + $0x22] sm:$0xff] }
 0x28e   : > { %2268 = vrot.lane.b32.xlu0 %v2224_v29, %s2835_s20 }
 0x28f   : > { %v1903_v8 = vpop.permute.xlu1 %1902 }
 0x290   : > { %v1905_v13 = vpop.permute.xlu0 %1904  ;;  %v4830_v36 = vadd.f32 %v1903_v8, %v4713_v47  ;;  %v2362_v47 = vmul.f32 %v4837_v62, %v4835_v7  ;;  %v4902_v8 = vld [vmem:[#allocation2 + $0x5a] sm:$0xf] }
 0x291   : > { %v4833_v27 = vadd.f32 %v1905_v13, %v4715_v16  ;;  %2270 = vrot.lane.b32.xlu1 %v2225_v52, %s2835_s20  ;;  %v4904_v13 = vld [vmem:[#allocation2 + $0x62] sm:$0xff]  ;;  %v1859_v52 = vadd.f32 %v1843_v55, %v4791_v9  ;;  %v4937_v55 = vld [vmem:[#allocation2 + $0x7a] sm:$0xf] }
 0x292   : > { %2272 = vrot.lane.b32.xlu0 %v2226_v19, %s2835_s20 }
 0x293   : > { %v1907_v18 = vpop.permute.xlu1 %1906 }
 0x294   : > { %v1909_v35 = vpop.permute.xlu0 %1908  ;;  %v4846_v14 = vadd.f32 %v1907_v18, %v4729_v21  ;;  %v2364_v21 = vmul.f32 %v4837_v62, %v4853_v53 }
 0x295   : > { %v4849_v16 = vadd.f32 %v1909_v35, %v4731_v30  ;;  %2274 = vrot.lane.b32.xlu1 %v2227_v17, %s2835_s20  ;;  %v5409_v17 = vld [vmem:[#allocation25_spill] sm:$0xff] }
 0x296   : > { %2394 = vrot.lane.b32.xlu0 %v2362_v47, %s2834_s19  ;;  %v1844_v18 = vmul.f32 %v4644_v51, %v5409_v17  ;;  %v2369_v47 = vmul.f32 %v4837_v62, %v4902_v8  ;;  %v4927_v51 = vstv %s2060_s25 }
 0x297   : > { %v1911_v37 = vpop.permute.xlu1 %1910 }
 0x298   : > { %v1913_v50 = vpop.permute.xlu0 %1912  ;;  %v4862_v45 = vadd.f32 %v1911_v37, %v4747_v48  ;;  %v2366_v48 = vmul.f32 %v4837_v62, %v4869_v23  ;;  %v1860_v9 = vadd.f32 %v1844_v18, %v4806_v40  ;;  %v2078_v40 = vmul.f32 %v4927_v51, %v4566_v2 }
 0x299   : > { %v4865_v30 = vadd.f32 %v1913_v50, %v4749_v24  ;;  %2396 = vrot.lane.b32.xlu1 %v2363_v31, %s2834_s19  ;;  %v4920_v31 = vld [vmem:[#allocation2 + $0x6a] sm:$0xf] }
 0x29a   : > { %2398 = vrot.lane.b32.xlu0 %v2364_v21, %s2834_s19  ;;  %v4922_v21 = vld [vmem:[#allocation2 + $0x72] sm:$0xff] }
 0x29b   : > { %v1915_v54 = vpop.permute.xlu1 %1914 }
 0x29c   : > { %v1917_v0 = vpop.permute.xlu0 %1916  ;;  %v4879_v24 = vadd.f32 %v1915_v54, %v4765_v11  ;;  %v2367_v11 = vmul.f32 %v4837_v62, %v4884_v22 }
 0x29d   : > { %v4882_v41 = vadd.f32 %v1917_v0, %v4767_v39  ;;  %2400 = vrot.lane.b32.xlu1 %v2365_v56, %s2834_s19  ;;  %v2368_v39 = vmul.f32 %v4837_v62, %v4886_v49  ;;  %v2372_v56 = vmul.f32 %v4837_v62, %v4922_v21 }
 0x29e   : > { %2402 = vrot.lane.b32.xlu0 %v2366_v48, %s2834_s19 }
 0x29f   : > { %v1919_v12 = vpop.permute.xlu1 %1918 }
 0x2a0   : > { %v1921_v38 = vpop.permute.xlu0 %1920  ;;  %v4897_v29 = vadd.f32 %v1919_v12, %v4783_v57  ;;  %v4939_v12 = vld [vmem:[#allocation2 + $0x82] sm:$0xff] }
 0x2a1   : > { %v4900_v19 = vadd.f32 %v1921_v38, %v4785_v61  ;;  %2404 = vrot.lane.b32.xlu1 %v2367_v11, %s2834_s19  ;;  %v2370_v61 = vmul.f32 %v4837_v62, %v4904_v13  ;;  %v4945_v38 = vld [vmem:[#allocation2 + $0x92] sm:$0xff]  ;;  %v2374_v17 = vmul.f32 %v4837_v62, %v4939_v12 }
 0x2a2   : > { %2406 = vrot.lane.b32.xlu0 %v2368_v39, %s2834_s19 }
 0x2a3   : > { %v1923_v35 = vpop.permute.xlu1 %1922 }
 0x2a4   : > { %v1925_v57 = vpop.permute.xlu0 %1924  ;;  %v4916_v37 = vadd.f32 %v1923_v35, %v4800_v6  ;;  %v2371_v6 = vmul.f32 %v4837_v62, %v4920_v31  ;;  %v4955_v35 = vld [vmem:[#allocation2 + $0x8a] sm:$0xf] }
 0x2a5   : > { %v4918_v50 = vadd.f32 %v1925_v57, %v1859_v52  ;;  %2408 = vrot.lane.b32.xlu1 %v2369_v47, %s2834_s19  ;;  %v2079_v57 = vmul.f32 %v4927_v51, %v4580_v28  ;;  %v2080_v47 = vmul.f32 %v4927_v51, %v4582_v10  ;;  %v2375_v28 = vmul.f32 %v4837_v62, %v4955_v35 }
 0x2a6   : > { %2410 = vrot.lane.b32.xlu0 %v2370_v61, %s2834_s19  ;;  %v2376_v61 = vmul.f32 %v4837_v62, %v4945_v38 }
 0x2a7   : > { %v1927_v54 = vpop.permute.xlu1 %1926 }
 0x2a8   : > { %v1996_v0 = vpop.permute.xlu0 %1995  ;;  %v4934_v48 = vadd.f32 %v1927_v54, %v1860_v9  ;;  %v4965_v9 = vld [vmem:[#allocation2 + $0x9a] sm:$0xf] }
 0x2a9   : > { %v2043_v4 = vadd.f32 %v1996_v0, %v4809_v59  ;;  %2412 = vrot.lane.b32.xlu1 %v2371_v6, %s2834_s19  ;;  %v2373_v59 = vmul.f32 %v4837_v62, %v4937_v55  ;;  %v4973_v6 = vstv %s2459_s29 }
 0x2aa   : > { %2414 = vrot.lane.b32.xlu0 %v2372_v56, %s2834_s19 }
 0x2ab   : > { %v4947_v11 = vadd.f32 %v2078_v40, %v2043_v4  ;;  %v1998_v39 = vpop.permute.xlu1 %1997  ;;  %v2081_v4 = vmul.f32 %v4927_v51, %v4594_v26  ;;  %v2082_v40 = vmul.f32 %v4927_v51, %v4596_v46 }
 0x2ac   : > { %v2000_v52 = vpop.permute.xlu0 %1999  ;;  %v2044_v18 = vadd.f32 %v1998_v39, %v4818_v34  ;;  %v2377_v39 = vmul.f32 %v4837_v62, %v4965_v9 }
 0x2ad   : > { %v2045_v2 = vadd.f32 %v2000_v52, %v4821_v3  ;;  %2416 = vrot.lane.b32.xlu1 %v2373_v59, %s2834_s19 }
 0x2ae   : > { %2418 = vrot.lane.b32.xlu0 %v2374_v17, %s2834_s19  ;;  %v4967_v34 = vadd.f32 %v2079_v57, %v2044_v18  ;;  %v2083_v18 = vmul.f32 %v4927_v51, %v4609_v15 }
 0x2af   : > { %v4969_v3 = vadd.f32 %v2080_v47, %v2045_v2  ;;  %v2002_v54 = vpop.permute.xlu1 %2001  ;;  %v2084_v2 = vmul.f32 %v4927_v51, %v4611_v32 }
 0x2b0   : > { %v2004_v0 = vpop.permute.xlu0 %2003  ;;  %v2046_v10 = vadd.f32 %v2002_v54, %v4830_v36  ;;  %v2085_v54 = vmul.f32 %v4927_v51, %v5401_v43 }
 0x2b1   : > { %v2047_v56 = vadd.f32 %v2004_v0, %v4833_v27  ;;  %2420 = vrot.lane.b32.xlu1 %v2375_v28, %s2834_s19  ;;  %v2461_v27 = vmul.f32 %v4973_v6, %v4835_v7  ;;  %v2086_v0 = vmul.f32 %v4927_v51, %v5402_v5 }
 0x2b2   : > { %2422 = vrot.lane.b32.xlu0 %v2376_v61, %s2834_s19  ;;  %v4985_v52 = vadd.f32 %v2081_v4, %v2046_v10 }
 0x2b3   : > { %v4987_v59 = vadd.f32 %v2082_v40, %v2047_v56  ;;  %v2006_v36 = vpop.permute.xlu1 %2005  ;;  %v2087_v40 = vmul.f32 %v4927_v51, %v5406_v20 }
 0x2b4   : > { %v2008_v17 = vpop.permute.xlu0 %2007  ;;  %v2048_v26 = vadd.f32 %v2006_v36, %v4846_v14  ;;  %v2462_v14 = vmul.f32 %v4973_v6, %v4851_v44 }
 0x2b5   : > { %v2049_v46 = vadd.f32 %v2008_v17, %v4849_v16  ;;  %2424 = vrot.lane.b32.xlu1 %v2377_v39, %s2834_s19  ;;  %v2463_v16 = vmul.f32 %v4973_v6, %v4853_v53  ;;  %v2088_v39 = vmul.f32 %v4927_v51, %v5407_v63  ;;  %v2089_v63 = vmul.f32 %v4927_v51, %v4656_v33  ;;  %s2308_s19 = sadd.s32 24, %s2950_s5 }
 0x2b6   : > { %2493 = vrot.lane.b32.xlu0 %v2461_v27, %s2835_s20  ;;  %v4999_v62 = vadd.f32 %v2083_v18, %v2048_v26  ;;  %v2090_v18 = vmul.f32 %v4927_v51, %v4658_v60  ;;  %v2091_v60 = vmul.f32 %v4927_v51, %v4676_v1  ;;  %s2309_s30 = sld [smem:[#allocation3 + %s2308_s19]] }
 0x2b7   : > { %v5001_v57 = vadd.f32 %v2084_v2, %v2049_v46  ;;  %v2010_v47 = vpop.permute.xlu1 %2009  ;;  %v2466_v46 = vmul.f32 %v4973_v6, %v4884_v22 }
 0x2b8   : > { %v2012_v61 = vpop.permute.xlu0 %2011  ;;  %v2050_v15 = vadd.f32 %v2010_v47, %v4862_v45  ;;  %v2464_v45 = vmul.f32 %v4973_v6, %v4867_v25 }
 0x2b9   : > { %v2051_v32 = vadd.f32 %v2012_v61, %v4865_v30  ;;  %2495 = vrot.lane.b32.xlu1 %v2462_v14, %s2835_s20  ;;  %v2465_v30 = vmul.f32 %v4973_v6, %v4869_v23 }
 0x2ba   : > { %2497 = vrot.lane.b32.xlu0 %v2463_v16, %s2835_s20  ;;  %v5015_v28 = vadd.f32 %v2085_v54, %v2050_v15  ;;  %v2468_v16 = vmul.f32 %v4973_v6, %v4902_v8 }
 0x2bb   : > { %v5017_v10 = vadd.f32 %v2086_v0, %v2051_v32  ;;  %v2014_v56 = vpop.permute.xlu1 %2013  ;;  %v2470_v0 = vmul.f32 %v4973_v6, %v4920_v31 }
 0x2bc   : > { %v2016_v4 = vpop.permute.xlu0 %2015  ;;  %v2052_v43 = vadd.f32 %v2014_v56, %v4879_v24  ;;  %v2467_v24 = vmul.f32 %v4973_v6, %v4886_v49  ;;  %v2471_v56 = vmul.f32 %v4973_v6, %v4922_v21 }
 0x2bd   : > { %v2053_v5 = vadd.f32 %v2016_v4, %v4882_v41  ;;  %2499 = vrot.lane.b32.xlu1 %v2464_v45, %s2835_s20  ;;  %v2472_v45 = vmul.f32 %v4973_v6, %v4937_v55 }
 0x2be   : > { %2501 = vrot.lane.b32.xlu0 %v2465_v30, %s2835_s20  ;;  %v2103_v36 = vadd.f32 %v2087_v40, %v2052_v43  ;;  %v2473_v30 = vmul.f32 %v4973_v6, %v4939_v12 }
 0x2bf   : > { %v2104_v17 = vadd.f32 %v2088_v39, %v2053_v5  ;;  %v2018_v27 = vpop.permute.xlu1 %2017  ;;  %v2474_v39 = vmul.f32 %v4973_v6, %v4955_v35 }
 0x2c0   : > { %v2020_v26 = vpop.permute.xlu0 %2019  ;;  %v2054_v41 = vadd.f32 %v2018_v27, %v4897_v29  ;;  %v2469_v29 = vmul.f32 %v4973_v6, %v4904_v13 }
 0x2c1   : > { %v2055_v20 = vadd.f32 %v2020_v26, %v4900_v19  ;;  %2503 = vrot.lane.b32.xlu1 %v2466_v46, %s2835_s20 }
 0x2c2   : > { %2505 = vrot.lane.b32.xlu0 %v2467_v24, %s2835_s20  ;;  %v2105_v2 = vadd.f32 %v2089_v63, %v2054_v41 }
 0x2c3   : > { %v2106_v47 = vadd.f32 %v2090_v18, %v2055_v20  ;;  %v2022_v61 = vpop.permute.xlu1 %2021 }
 0x2c4   : > { %v2024_v14 = vpop.permute.xlu0 %2023  ;;  %v2056_v19 = vadd.f32 %v2022_v61, %v4916_v37 }
 0x2c5   : > { %v2057_v33 = vadd.f32 %v2024_v14, %v4918_v50  ;;  %2507 = vrot.lane.b32.xlu1 %v2468_v16, %s2835_s20 }
 0x2c6   : > { %2509 = vrot.lane.b32.xlu0 %v2469_v29, %s2835_s20  ;;  %v2107_v15 = vadd.f32 %v2091_v60, %v2056_v19 }
 0x2c7   : > { %v2026_v32 = vpop.permute.xlu1 %2025 }
 0x2c8   : > { %v2146_v54 = vpop.permute.xlu0 %2145  ;;  %v2058_v37 = vadd.f32 %v2026_v32, %v4934_v48  ;;  %v2475_v48 = vmul.f32 %v4973_v6, %v4945_v38  ;;  %v2093_v32 = vmul.f32 %v4927_v51, %v4690_v42 }
 0x2c9   : > { %v2193_v50 = vadd.f32 %v2146_v54, %v4947_v11  ;;  %2511 = vrot.lane.b32.xlu1 %v2470_v0, %s2835_s20 }
 0x2ca   : > { %2513 = vrot.lane.b32.xlu0 %v2471_v56, %s2835_s20  ;;  %v5091_v56 = vstv %s2309_s30 }
 0x2cb   : > { %v2148_v1 = vpop.permute.xlu1 %2147 }
 0x2cc   : > { %v2150_v4 = vpop.permute.xlu0 %2149  ;;  %v2194_v43 = vadd.f32 %v2148_v1, %v4967_v34  ;;  %v2476_v34 = vmul.f32 %v4973_v6, %v4965_v9  ;;  %v2092_v6 = vmul.f32 %v4927_v51, %v4668_v58 }
 0x2cd   : > { %v2195_v5 = vadd.f32 %v2150_v4, %v4969_v3  ;;  %2515 = vrot.lane.b32.xlu1 %v2472_v45, %s2835_s20 }
 0x2ce   : > { %2517 = vrot.lane.b32.xlu0 %v2473_v30, %s2835_s20  ;;  %v2108_v60 = vadd.f32 %v2092_v6, %v2057_v33  ;;  %v2334_v6 = vmul.f32 %v5091_v56, %v4902_v8 }
 0x2cf   : > { %v2152_v11 = vpop.permute.xlu1 %2151 }
 0x2d0   : > { %v2154_v40 = vpop.permute.xlu0 %2153  ;;  %v2196_v27 = vadd.f32 %v2152_v11, %v4985_v52 }
 0x2d1   : > { %v2197_v26 = vadd.f32 %v2154_v40, %v4987_v59  ;;  %2519 = vrot.lane.b32.xlu1 %v2474_v39, %s2835_s20  ;;  %v2330_v39 = vmul.f32 %v5091_v56, %v4867_v25 }
 0x2d2   : > { %2521 = vrot.lane.b32.xlu0 %v2475_v48, %s2835_s20 }
 0x2d3   : > { %v2156_v3 = vpop.permute.xlu1 %2155 }
 0x2d4   : > { %v2158_v46 = vpop.permute.xlu0 %2157  ;;  %v2198_v24 = vadd.f32 %v2156_v3, %v4999_v62 }
 0x2d5   : > { %v2199_v41 = vadd.f32 %v2158_v46, %v5001_v57  ;;  %2523 = vrot.lane.b32.xlu1 %v2476_v34, %s2835_s20 }
 0x2d7   : > { %v2160_v20 = vpop.permute.xlu1 %2159 }
 0x2d8   : > { %v2162_v63 = vpop.permute.xlu0 %2161  ;;  %v2200_v52 = vadd.f32 %v2160_v20, %v5015_v28  ;;  %v2332_v20 = vmul.f32 %v5091_v56, %v4884_v22 }
 0x2d9   : > { %v2201_v59 = vadd.f32 %v2162_v63, %v5017_v10 }
 0x2db   : > { %v2164_v18 = vpop.permute.xlu1 %2163 }
 0x2dc   : > { %v2166_v61 = vpop.permute.xlu0 %2165  ;;  %v2202_v14 = vadd.f32 %v2164_v18, %v2103_v36  ;;  %v2109_v36 = vadd.f32 %v2093_v32, %v2058_v37  ;;  %v2329_v37 = vmul.f32 %v5091_v56, %v4853_v53  ;;  %v2336_v32 = vmul.f32 %v5091_v56, %v4920_v31 }
 0x2dd   : > { %v2203_v16 = vadd.f32 %v2166_v61, %v2104_v17 }
 0x2df   : > { %v2168_v62 = vpop.permute.xlu1 %2167 }
 0x2e0   : > { %v2170_v29 = vpop.permute.xlu0 %2169  ;;  %v2204_v57 = vadd.f32 %v2168_v62, %v2105_v2  ;;  %v2327_v2 = vmul.f32 %v5091_v56, %v4835_v7 }
 0x2e1   : > { %v2205_v19 = vadd.f32 %v2170_v29, %v2106_v47 }
 0x2e3   : > { %v2172_v28 = vpop.permute.xlu1 %2171 }
 0x2e4   : > { %v2174_v54 = vpop.permute.xlu0 %2173  ;;  %v2206_v10 = vadd.f32 %v2172_v28, %v2107_v15  ;;  %v2328_v15 = vmul.f32 %v5091_v56, %v4851_v44 }
 0x2e5   : > { %v5089_v0 = vadd.f32 %v2174_v54, %v2108_v60 }
 0x2e7   : > { %v2176_v17 = vpop.permute.xlu1 %2175 }
 0x2e8   : > { %v2245_v1 = vpop.permute.xlu0 %2244  ;;  %v5093_v4 = vadd.f32 %v2176_v17, %v2109_v36  ;;  %v2338_v17 = vmul.f32 %v5091_v56, %v4937_v55 }
 0x2e9   : > { %v2292_v58 = vadd.f32 %v2245_v1, %v2193_v50 }
 0x2eb   : > { %v5097_v47 = vadd.f32 %v2327_v2, %v2292_v58  ;;  %v2247_v33 = vpop.permute.xlu1 %2246  ;;  %v2340_v2 = vmul.f32 %v5091_v56, %v4955_v35 }
 0x2ec   : > { %v2249_v42 = vpop.permute.xlu0 %2248  ;;  %v2293_v51 = vadd.f32 %v2247_v33, %v2194_v43  ;;  %v2331_v43 = vmul.f32 %v5091_v56, %v4869_v23 }
 0x2ed   : > { %v2294_v45 = vadd.f32 %v2249_v42, %v2195_v5 }
 0x2ee   : > { %v5103_v30 = vadd.f32 %v2328_v15, %v2293_v51 }
 0x2ef   : > { %v5105_v48 = vadd.f32 %v2329_v37, %v2294_v45  ;;  %v2251_v50 = vpop.permute.xlu1 %2250 }
 0x2f0   : > { %v2253_v11 = vpop.permute.xlu0 %2252  ;;  %v2295_v40 = vadd.f32 %v2251_v50, %v2196_v27  ;;  %v2333_v27 = vmul.f32 %v5091_v56, %v4886_v49 }
 0x2f1   : > { %v2296_v7 = vadd.f32 %v2253_v11, %v2197_v26 }
 0x2f2   : > { %v5111_v5 = vadd.f32 %v2330_v39, %v2295_v40 }
 0x2f3   : > { %v5113_v44 = vadd.f32 %v2331_v43, %v2296_v7  ;;  %v2255_v34 = vpop.permute.xlu1 %2254 }
 0x2f4   : > { %v2257_v53 = vpop.permute.xlu0 %2256  ;;  %v2297_v3 = vadd.f32 %v2255_v34, %v2198_v24  ;;  %v2335_v24 = vmul.f32 %v5091_v56, %v4904_v13 }
 0x2f5   : > { %v2298_v46 = vadd.f32 %v2257_v53, %v2199_v41 }
 0x2f6   : > { %v5119_v26 = vadd.f32 %v2332_v20, %v2297_v3 }
 0x2f7   : > { %v5121_v25 = vadd.f32 %v2333_v27, %v2298_v46  ;;  %v2259_v63 = vpop.permute.xlu1 %2258 }
 0x2f8   : > { %v2261_v23 = vpop.permute.xlu0 %2260  ;;  %v2299_v18 = vadd.f32 %v2259_v63, %v2200_v52  ;;  %v2337_v52 = vmul.f32 %v5091_v56, %v4922_v21 }
 0x2f9   : > { %v2300_v61 = vadd.f32 %v2261_v23, %v2201_v59 }
 0x2fa   : > { %v5127_v41 = vadd.f32 %v2334_v6, %v2299_v18 }
 0x2fb   : > { %v5129_v22 = vadd.f32 %v2335_v24, %v2300_v61  ;;  %v2263_v62 = vpop.permute.xlu1 %2262 }
 0x2fc   : > { %v2265_v49 = vpop.permute.xlu0 %2264  ;;  %v2301_v29 = vadd.f32 %v2263_v62, %v2202_v14  ;;  %v2339_v14 = vmul.f32 %v5091_v56, %v4939_v12 }
 0x2fd   : > { %v2302_v60 = vadd.f32 %v2265_v49, %v2203_v16 }
 0x2fe   : > { %v5135_v59 = vadd.f32 %v2336_v32, %v2301_v29 }
 0x2ff   : > { %v5137_v8 = vadd.f32 %v2337_v52, %v2302_v60  ;;  %v2267_v28 = vpop.permute.xlu1 %2266 }
 0x300   : > { %v2269_v13 = vpop.permute.xlu0 %2268  ;;  %v2303_v54 = vadd.f32 %v2267_v28, %v2204_v57 }
 0x301   : > { %v2304_v36 = vadd.f32 %v2269_v13, %v2205_v19 }
 0x302   : > { %v5143_v16 = vadd.f32 %v2338_v17, %v2303_v54 }
 0x303   : > { %v5145_v31 = vadd.f32 %v2339_v14, %v2304_v36  ;;  %v2271_v1 = vpop.permute.xlu1 %2270  ;;  %v2341_v14 = vmul.f32 %v5091_v56, %v4945_v38 }
 0x304   : > { %v5147_v21 = vpop.permute.xlu0 %2272  ;;  %v2305_v58 = vadd.f32 %v2271_v1, %v2206_v10 }
 0x305   : > { %v2306_v17 = vadd.f32 %v5147_v21, %v5089_v0 }
 0x306   : > { %v5151_v33 = vadd.f32 %v2340_v2, %v2305_v58  ;;  %v2342_v2 = vmul.f32 %v5091_v56, %v4965_v9 }
 0x307   : > { %v5153_v57 = vpop.permute.xlu1 %2274  ;;  %v2357_v21 = vadd.f32 %v2341_v14, %v2306_v17 }
 0x308   : > { %v2395_v19 = vpop.permute.xlu0 %2394  ;;  %v2307_v38 = vadd.f32 %v5153_v57, %v5093_v4 }
 0x309   : > { %v2442_v43 = vadd.f32 %v2395_v19, %v5097_v47 }
 0x30a   : > { %v2358_v56 = vadd.f32 %v2342_v2, %v2307_v38 }
 0x30b   : > { %v2397_v55 = vpop.permute.xlu1 %2396 }
 0x30c   : > { %v2399_v42 = vpop.permute.xlu0 %2398  ;;  %v2443_v46 = vadd.f32 %v2397_v55, %v5103_v30 }
 0x30d   : > { %v2444_v20 = vadd.f32 %v2399_v42, %v5105_v48 }
 0x30f   : > { %v2401_v12 = vpop.permute.xlu1 %2400 }
 0x310   : > { %v2403_v51 = vpop.permute.xlu0 %2402  ;;  %v2445_v18 = vadd.f32 %v2401_v12, %v5111_v5 }
 0x311   : > { %v2446_v61 = vadd.f32 %v2403_v51, %v5113_v44 }
 0x313   : > { %v2405_v45 = vpop.permute.xlu1 %2404 }
 0x314   : > { %v2407_v15 = vpop.permute.xlu0 %2406  ;;  %v2447_v62 = vadd.f32 %v2405_v45, %v5119_v26 }
 0x315   : > { %v2448_v49 = vadd.f32 %v2407_v15, %v5121_v25 }
 0x317   : > { %v2409_v37 = vpop.permute.xlu1 %2408 }
 0x318   : > { %v2411_v50 = vpop.permute.xlu0 %2410  ;;  %v2449_v32 = vadd.f32 %v2409_v37, %v5127_v41 }
 0x319   : > { %v2450_v52 = vadd.f32 %v2411_v50, %v5129_v22 }
 0x31b   : > { %v2413_v11 = vpop.permute.xlu1 %2412 }
 0x31c   : > { %v2415_v40 = vpop.permute.xlu0 %2414  ;;  %v2451_v54 = vadd.f32 %v2413_v11, %v5135_v59 }
 0x31d   : > { %v2452_v36 = vadd.f32 %v2415_v40, %v5137_v8 }
 0x31f   : > { %v2417_v10 = vpop.permute.xlu1 %2416 }
 0x320   : > { %v2419_v7 = vpop.permute.xlu0 %2418  ;;  %v2453_v59 = vadd.f32 %v2417_v10, %v5143_v16 }
 0x321   : > { %v2454_v8 = vadd.f32 %v2419_v7, %v5145_v31 }
 0x323   : > { %v2421_v39 = vpop.permute.xlu1 %2420 }
 0x324   : > { %v2423_v35 = vpop.permute.xlu0 %2422  ;;  %v2455_v31 = vadd.f32 %v2421_v39, %v5151_v33 }
 0x325   : > { %v2456_v42 = vadd.f32 %v2423_v35, %v2357_v21 }
 0x327   : > { %v5163_v34 = vpop.permute.xlu1 %2424 }
 0x328   : > { %v2494_v53 = vpop.permute.xlu0 %2493  ;;  %v2457_v15 = vadd.f32 %v5163_v34, %v2358_v56 }
 0x329   : > { %v2541_v3 = vadd.f32 %v2494_v53, %v2442_v43 }
 0x32b   : > { %2558 = vst.msk [vmem:[%s5161_s3] sm:$0xff] %vm2557_vm4, %v2541_v3  ;;  %v2496_v47 = vpop.permute.xlu1 %2495 }
 0x32c   : > { %v2498_v27 = vpop.permute.xlu0 %2497  ;;  %v2542_v63 = vadd.f32 %v2496_v47, %v2443_v46 }
 0x32d   : > { %v2543_v23 = vadd.f32 %v2498_v27, %v2444_v20 }
 0x32e   : > { %2560 = vst.msk [vmem:[%s5161_s3 + $0x8] sm:$0xf] %vm2559_vm5, %v2542_v63 }
 0x32f   : > { %2561 = vst.msk [vmem:[%s5161_s3 + $0x10] sm:$0xff] %vm2557_vm4, %v2543_v23  ;;  %v2500_v30 = vpop.permute.xlu1 %2499 }
 0x330   : > { %v2502_v48 = vpop.permute.xlu0 %2501  ;;  %v2544_v6 = vadd.f32 %v2500_v30, %v2445_v18 }
 0x331   : > { %v2545_v24 = vadd.f32 %v2502_v48, %v2446_v61 }
 0x332   : > { %2562 = vst.msk [vmem:[%s5161_s3 + $0x18] sm:$0xf] %vm2559_vm5, %v2544_v6 }
 0x333   : > { %2563 = vst.msk [vmem:[%s5161_s3 + $0x20] sm:$0xff] %vm2557_vm4, %v2545_v24  ;;  %v2504_v5 = vpop.permute.xlu1 %2503 }
 0x334   : > { %v2506_v44 = vpop.permute.xlu0 %2505  ;;  %v2546_v29 = vadd.f32 %v2504_v5, %v2447_v62 }
 0x335   : > { %v2547_v60 = vadd.f32 %v2506_v44, %v2448_v49 }
 0x336   : > { %2564 = vst.msk [vmem:[%s5161_s3 + $0x28] sm:$0xf] %vm2559_vm5, %v2546_v29 }
 0x337   : > { %2565 = vst.msk [vmem:[%s5161_s3 + $0x30] sm:$0xff] %vm2557_vm4, %v2547_v60  ;;  %v2508_v26 = vpop.permute.xlu1 %2507 }
 0x338   : > { %v2510_v25 = vpop.permute.xlu0 %2509  ;;  %v2548_v28 = vadd.f32 %v2508_v26, %v2449_v32 }
 0x339   : > { %v2549_v13 = vadd.f32 %v2510_v25, %v2450_v52 }
 0x33a   : > { %2566 = vst.msk [vmem:[%s5161_s3 + $0x38] sm:$0xf] %vm2559_vm5, %v2548_v28 }
 0x33b   : > { %2567 = vst.msk [vmem:[%s5161_s3 + $0x40] sm:$0xff] %vm2557_vm4, %v2549_v13  ;;  %v2512_v41 = vpop.permute.xlu1 %2511 }
 0x33c   : > { %v2514_v22 = vpop.permute.xlu0 %2513  ;;  %v2550_v1 = vadd.f32 %v2512_v41, %v2451_v54 }
 0x33d   : > { %v2551_v58 = vadd.f32 %v2514_v22, %v2452_v36 }
 0x33e   : > { %2568 = vst.msk [vmem:[%s5161_s3 + $0x48] sm:$0xf] %vm2559_vm5, %v2550_v1 }
 0x33f   : > { %2569 = vst.msk [vmem:[%s5161_s3 + $0x50] sm:$0xff] %vm2557_vm4, %v2551_v58  ;;  %v2516_v19 = vpop.permute.xlu1 %2515 }
 0x340   : > { %v2518_v0 = vpop.permute.xlu0 %2517  ;;  %v2552_v55 = vadd.f32 %v2516_v19, %v2453_v59 }
 0x341   : > { %v2553_v16 = vadd.f32 %v2518_v0, %v2454_v8 }
 0x342   : > { %2570 = vst.msk [vmem:[%s5161_s3 + $0x58] sm:$0xf] %vm2559_vm5, %v2552_v55 }
 0x343   : > { %2571 = vst.msk [vmem:[%s5161_s3 + $0x60] sm:$0xff] %vm2557_vm4, %v2553_v16  ;;  %v2520_v12 = vpop.permute.xlu1 %2519 }
 0x344   : > { %v2522_v9 = vpop.permute.xlu0 %2521  ;;  %v2554_v51 = vadd.f32 %v2520_v12, %v2455_v31 }
 0x345   : > { %v2555_v45 = vadd.f32 %v2522_v9, %v2456_v42 }
 0x346   : > { %2572 = vst.msk [vmem:[%s5161_s3 + $0x68] sm:$0xf] %vm2559_vm5, %v2554_v51 }
 0x347   : > { %2573 = vst.msk [vmem:[%s5161_s3 + $0x70] sm:$0xff] %vm2557_vm4, %v2555_v45  ;;  %v2524_v4 = vpop.permute.xlu1 %2523 }
 0x348   : > { %v2556_v57 = vadd.f32 %v2524_v4, %v2457_v15 }
 0x34a   : > { %2574 = vst.msk [vmem:[%s5161_s3 + $0x78] sm:$0xf] %vm2559_vm5, %v2556_v57 }
 0x34b PF: > { %s13_s13 = sadd.s32 1, %s2829_s13   ;;  %s5410_s9 = smov %s2821_s11 }
 0x34c   : > { %p10_p3 = scmp.ge.s32.totalorder %s13_s13, 10   ;;  %s5411_s10 = smov %s2825_s12 }
 0x34d   : > { %s5412_s11 = smov %s5415_s15  ;;  %s5413_s12 = smov %s5419_s16 }
 0x34e   :  { %12 = sbr.rel (!%p10_p3) target bundleno = 3 (0x3), region = 65 }
 0x353   :  { %2604 = vsyncpa [#allocation4], 1 }
 0x354   :  { %2606 = vsyncpa [#allocation4 + $0x1], 1 }

</bundles_post_ra>
